<compile_context>
chip_gen: v5e
topology: v5e:2x2
jax: 0.10.0
libtpu: 0.0.40
codegen_flags: <defaults>
</compile_context>

<pallas_src>
import functools

import jax
import jax.numpy as jnp
from jax.experimental import pallas as pl
from jax.experimental.pallas import tpu as pltpu


# ----------------------------------------------------------------------------
# Kernel 1: stage conv as a transposed matmul with fused bias + LeakyReLU.
#   W_T (Cout, K) @ A_T (K, M) + b (Cout, 1);  bf16 MXU operands, f32 epilogue.
#   The M axis (all frames x output pixels) is tiled and marked "parallel";
#   the output (Cout, M) is lane-dense.
# ----------------------------------------------------------------------------

def _conv_mm_kernel(w_ref, a_ref, b_ref, o_ref, *, act):
    acc = jnp.dot(w_ref[...], a_ref[...], preferred_element_type=jnp.float32)
    acc = acc + b_ref[...]                       # (Cout, 1) broadcast over lanes
    if act == "leaky":
        acc = jnp.where(acc >= 0.0, acc, 0.2 * acc)
    o_ref[...] = acc


def _pick_tile(m):
    # Prefer lane-dense tiles (multiples of 128) giving an EVEN block count so
    # v7x's two TensorCores stay balanced; fall back to any divisor, then m.
    for t in (2048, 1024, 768, 512, 384, 256, 128):
        if m % t == 0 and (m // t) % 2 == 0:
            return t
    for t in (2048, 1024, 768, 512, 384, 256, 128):
        if m % t == 0:
            return t
    return m


def _conv_matmul_T(w_T, a_T, b_col, act="leaky"):
    """w_T:(Cout,K) f32, a_T:(K,M) f32, b_col:(Cout,1) f32 -> (Cout,M) f32."""
    cout, K = w_T.shape
    _, M = a_T.shape
    tn = _pick_tile(M)
    kern = functools.partial(_conv_mm_kernel, act=act)
    return pl.pallas_call(
        kern,
        out_shape=jax.ShapeDtypeStruct((cout, M), jnp.float32),
        grid=(M // tn,),
        in_specs=[
            pl.BlockSpec((cout, K), lambda j: (0, 0)),
            pl.BlockSpec((K, tn), lambda j: (0, j)),
            pl.BlockSpec((cout, 1), lambda j: (0, 0)),
        ],
        out_specs=pl.BlockSpec((cout, tn), lambda j: (0, j)),
        compiler_params=pltpu.CompilerParams(
            dimension_semantics=("parallel",),
            vmem_limit_bytes=48 * 1024 * 1024),
    )(w_T.astype(jnp.bfloat16), a_T.astype(jnp.bfloat16), b_col)


# ----------------------------------------------------------------------------
# Kernel 2: one fused ConvGRU over a whole sequence (one launch per stage).
#
# Layout per (batch b, step t) grid point:
#   * hidden state hbuf: (hid, L) f32, L = round_up((Ho+2)*(Wo+2), 128) lanes of
#     padded-flat spatial positions (zero pad ring + zero lane tail).
#   * a 3x3 tap shift is a constant lane offset, so each conv is: build a
#     (9*C, L) tap patch in VMEM via pltpu.roll (aligned 8-row stores), then one
#     bf16 MXU matmul W (out, 9*C) @ patch (9*C, L) with f32 accumulation.
#   * per step: 1 matmul for the fused input-to-hidden contribution (z,r,n),
#     1 for the z/r hidden conv, 1 for the candidate conv over r*h.
#   * hbuf persists across the "arbitrary" time axis; batch axis is "parallel".
# ----------------------------------------------------------------------------

def _gru_seq_kernel(y_ref, h0_ref, mask_ref, wx_ref, bx_ref, wzrh_ref, wnh_ref,
                    o_ref, hbuf, patch, *, hid, cout, taps, Lb):
    t = pl.program_id(1)

    @pl.when(t == 0)
    def _init():
        hbuf[...] = h0_ref[0]

    def build_patch(src, nch):
        # src: (nch, Lb) f32 value.  Writes 9 tap-shifted copies into the VMEM
        # patch scratch at aligned 8-row offsets (tap-major, channel-minor).
        for p, d in enumerate(taps):
            shifted = src if d == 0 else pltpu.roll(src, (-d) % Lb, axis=1)
            patch[p * nch:(p + 1) * nch, :] = shifted

    # --- input-to-hidden contribution for z, r and n: one stacked-K matmul ---
    build_patch(y_ref[0, 0], cout)
    yk = patch[0:9 * cout, :].astype(jnp.bfloat16)
    xacc = jnp.dot(wx_ref[...], yk, preferred_element_type=jnp.float32)
    xacc = xacc + bx_ref[...]                                # (3*hid, Lb) f32

    # --- hidden-to-hidden conv for the z/r gates ---
    h = hbuf[...]                                            # (hid, Lb) f32
    build_patch(h, hid)
    hk = patch[0:9 * hid, :].astype(jnp.bfloat16)
    zr = xacc[0:2 * hid, :] + jnp.dot(wzrh_ref[...], hk,
                                      preferred_element_type=jnp.float32)
    z = jax.nn.sigmoid(zr[0:hid, :])
    r = jax.nn.sigmoid(zr[hid:2 * hid, :])

    # --- hidden-to-hidden conv for the candidate over r*h ---
    build_patch(r * h, hid)
    rk = patch[0:9 * hid, :].astype(jnp.bfloat16)
    n = jnp.tanh(xacc[2 * hid:3 * hid, :] +
                 jnp.dot(wnh_ref[...], rk, preferred_element_type=jnp.float32))

    # f32 blend; keep the zero pad ring / lane tail zeroed (mask is (1, Lb)).
    h_new = ((1.0 - z) * h + z * n) * mask_ref[...]
    hbuf[...] = h_new

    @pl.when(t == pl.num_programs(1) - 1)
    def _emit():
        o_ref[0] = h_new


def _conv_gru_fused(y_all, h0, mask, wx, bx, wzrh, wnh,
                    *, S, B, hid, cout, Lb, Pp):
    taps = tuple((ki - 1) * Pp + (kj - 1) for ki in range(3) for kj in range(3))
    kern = functools.partial(_gru_seq_kernel, hid=hid, cout=cout, taps=taps, Lb=Lb)
    prows = 9 * max(hid, cout)
    return pl.pallas_call(
        kern,
        out_shape=jax.ShapeDtypeStruct((B, hid, Lb), jnp.float32),
        grid=(B, S),
        in_specs=[
            pl.BlockSpec((1, 1, cout, Lb), lambda b, t: (t, b, 0, 0)),
            pl.BlockSpec((1, hid, Lb), lambda b, t: (b, 0, 0)),
            pl.BlockSpec((1, Lb), lambda b, t: (0, 0)),
            pl.BlockSpec((3 * hid, 9 * cout), lambda b, t: (0, 0)),
            pl.BlockSpec((3 * hid, 1), lambda b, t: (0, 0)),
            pl.BlockSpec((2 * hid, 9 * hid), lambda b, t: (0, 0)),
            pl.BlockSpec((hid, 9 * hid), lambda b, t: (0, 0)),
        ],
        out_specs=pl.BlockSpec((1, hid, Lb), lambda b, t: (b, 0, 0)),
        scratch_shapes=[
            pltpu.VMEM((hid, Lb), jnp.float32),     # resident hidden state
            pltpu.VMEM((prows, Lb), jnp.float32),   # stacked-K tap patch
        ],
        compiler_params=pltpu.CompilerParams(
            dimension_semantics=("parallel", "arbitrary"),
            vmem_limit_bytes=48 * 1024 * 1024),
    )(y_all, h0, mask, wx, bx, wzrh, wnh)


# ----------------------------------------------------------------------------
# Glue (plain JAX): transposed im2col for the strided stage convs, layout prep.
# ----------------------------------------------------------------------------

def _im2col_T(x, k, stride, pad):
    """x:(N,C,H,W) NCHW -> A_T:(k*k*C, N*Ho*Wo), rows tap-major / channel-minor."""
    N, C, H, W = x.shape
    Ho = (H + 2 * pad - k) // stride + 1
    Wo = (W + 2 * pad - k) // stride + 1
    xp = jnp.pad(x, ((0, 0), (0, 0), (pad, pad), (pad, pad)))
    taps = []
    for ki in range(k):
        for kj in range(k):
            taps.append(xp[:, :, ki:ki + Ho * stride:stride,
                           kj:kj + Wo * stride:stride])
    a = jnp.stack(taps, axis=1)                  # (N, 9, C, Ho, Wo)
    a = jnp.moveaxis(a, 0, 2)                    # (9, C, N, Ho, Wo)
    return a.reshape(k * k * C, N * Ho * Wo), Ho, Wo


# ----------------------------------------------------------------------------
# Encoder forward (mirrors Encoder.forward / forward_by_stage, GRU path)
# ----------------------------------------------------------------------------

def encoder_forward(inputs, state_stages, params):
    """inputs:(S,B,C,H,W) NCHW (PyTorch layout); returns 3 NCHW hidden states."""
    S, B, C, H, W = inputs.shape
    x = inputs.reshape(S * B, C, H, W)           # NCHW frames
    seq = S
    hidden_states = []
    for i in range(3):
        sp = params["stages"][i]
        rp = params["rnns"][i]
        hid = rp["hid"]
        cout = sp["w_T"].shape[0]

        # --- stage conv + LeakyReLU(0.2): lane-dense transposed matmul ---
        # TODO(synk): the stage conv still builds its im2col operand with XLA
        # slices in HBM; only the GRU-side im2col/matmul was fully eliminated.
        a_T, Ho, Wo = _im2col_T(x, 3, sp["stride"], sp["pad"])
        y_cm = _conv_matmul_T(sp["w_T"], a_T, sp["b_col"], act="leaky")

        # --- layout for the recurrent kernel: (seq, B, cout, Lb) padded-flat ---
        Qp, Pp = Ho + 2, Wo + 2
        Mb = Qp * Pp
        Lb = ((Mb + 127) // 128) * 128
        y = y_cm.reshape(cout, seq, B, Ho, Wo).transpose(1, 2, 0, 3, 4)
        y = jnp.pad(y, ((0, 0), (0, 0), (0, 0), (1, 1), (1, 1)))
        y = y.reshape(seq, B, cout, Mb)
        y = jnp.pad(y, ((0, 0), (0, 0), (0, 0), (0, Lb - Mb)))

        h0 = state_stages[i]
        if h0 is None:
            h0 = jnp.zeros((B, hid, Ho, Wo), jnp.float32)
        h0 = jnp.pad(h0, ((0, 0), (0, 0), (1, 1), (1, 1))).reshape(B, hid, Mb)
        h0 = jnp.pad(h0, ((0, 0), (0, 0), (0, Lb - Mb)))

        mask = jnp.pad(jnp.ones((Ho, Wo), jnp.float32), ((1, 1), (1, 1)))
        mask = jnp.pad(mask.reshape(1, Mb), ((0, 0), (0, Lb - Mb)))

        hL = _conv_gru_fused(y, h0, mask, rp["wx"], rp["bx"],
                             rp["wzrh"], rp["wnh"],
                             S=seq, B=B, hid=hid, cout=cout, Lb=Lb, Pp=Pp)

        hy = hL[:, :, :Mb].reshape(B, hid, Qp, Pp)[:, :, 1:Ho + 1, 1:Wo + 1]
        hidden_states.append(hy)                 # already NCHW
        x = hy                                   # next stage input, seq = 1
        seq = 1
    return tuple(hidden_states)


# ----------------------------------------------------------------------------
# Deterministic parameter construction (weights pre-laid-out for the kernels;
# raw torch-layout copies kept for the pure-JAX reference check).
# ----------------------------------------------------------------------------

def make_params(key):
    # stage conv configs: (cin, cout, k, stride, pad); ConvGRU hidden = cout
    cfgs = [(2, 8, 3, 1, 1), (8, 16, 3, 2, 1), (16, 16, 3, 2, 1)]
    stages, rnns, raw_stages, raw_rnns = [], [], [], []
    for (cin, cout, k, s, p) in cfgs:
        key, k1, k2, k3, k4 = jax.random.split(key, 5)
        w = 0.1 * jax.random.normal(k1, (cout, cin, k, k), jnp.float32)
        b = 0.01 * jax.random.normal(k2, (cout,), jnp.float32)
        raw_stages.append(dict(w=w, b=b, stride=s, pad=p))
        stages.append(dict(
            w_T=jnp.transpose(w, (0, 2, 3, 1)).reshape(cout, k * k * cin),
            b_col=b.reshape(cout, 1), stride=s, pad=p))

        hid = cout
        w_zr = 0.1 * jax.random.normal(k3, (2 * hid, cout + hid, k, k), jnp.float32)
        w_n = 0.1 * jax.random.normal(k4, (hid, cout + hid, k, k), jnp.float32)
        b_zr = jnp.zeros((2 * hid,), jnp.float32)
        b_n = jnp.zeros((hid,), jnp.float32)
        raw_rnns.append(dict(hid=hid, w_zr=w_zr, b_zr=b_zr, w_n=w_n, b_n=b_n))

        # Input-to-hidden halves fused into one (3*hid, 9*cout) bf16 matrix,
        # columns tap-major / channel-minor to match the in-kernel patch rows.
        wzr_x = jnp.transpose(w_zr[:, :cout], (0, 2, 3, 1)).reshape(2 * hid, k * k * cout)
        wn_x = jnp.transpose(w_n[:, :cout], (0, 2, 3, 1)).reshape(hid, k * k * cout)
        wx = jnp.concatenate([wzr_x, wn_x], axis=0).astype(jnp.bfloat16)
        bx = jnp.concatenate([b_zr, b_n]).reshape(3 * hid, 1)

        # Hidden-to-hidden halves as stacked-K bf16 matrices.
        wzrh = jnp.transpose(w_zr[:, cout:], (0, 2, 3, 1)).reshape(
            2 * hid, k * k * hid).astype(jnp.bfloat16)
        wnh = jnp.transpose(w_n[:, cout:], (0, 2, 3, 1)).reshape(
            hid, k * k * hid).astype(jnp.bfloat16)
        rnns.append(dict(hid=hid, wx=wx, bx=bx, wzrh=wzrh, wnh=wnh))
    return dict(stages=stages, rnns=rnns), dict(stages=raw_stages, rnns=raw_rnns)


# ----------------------------------------------------------------------------
# Pure-JAX f32 reference (validation only; the implementation above is Pallas).
# ----------------------------------------------------------------------------

def _ref_forward(inputs, state_stages, raw):
    def conv3(xx, w, b, stride=1):
        out = jax.lax.conv_general_dilated(
            xx, w, (stride, stride), [(1, 1), (1, 1)],
            dimension_numbers=("NCHW", "OIHW", "NCHW"),
            precision=jax.lax.Precision.HIGHEST)
        return out + b.reshape(1, -1, 1, 1)

    S, B, C, H, W = inputs.shape
    x = inputs.reshape(S * B, C, H, W)
    seq = S
    outs = []
    for i in range(3):
        st = raw["stages"][i]
        rn = raw["rnns"][i]
        y = conv3(x, st["w"], st["b"], st["stride"])
        y = jnp.where(y >= 0, y, 0.2 * y)
        _, cout, Ho, Wo = y.shape
        y = y.reshape(seq, B, cout, Ho, Wo)
        hid = rn["hid"]
        h = state_stages[i]
        if h is None:
            h = jnp.zeros((B, hid, Ho, Wo), jnp.float32)
        for t in range(seq):
            xt = y[t]
            zr = conv3(jnp.concatenate([xt, h], axis=1), rn["w_zr"], rn["b_zr"])
            z = jax.nn.sigmoid(zr[:, :hid])
            r = jax.nn.sigmoid(zr[:, hid:])
            n = jnp.tanh(conv3(jnp.concatenate([xt, r * h], axis=1),
                               rn["w_n"], rn["b_n"]))
            h = (1.0 - z) * h + z * n
        outs.append(h)
        x = h
        seq = 1
    return tuple(outs)


if __name__ == "__main__":
    key = jax.random.PRNGKey(0)
    kp, kx = jax.random.split(key)
    params, raw = make_params(kp)

    # (seq=8, batch=2, channels=2, H=16, W=16)
    inputs = jax.random.normal(kx, (8, 2, 2, 16, 16), jnp.float32)

    run = jax.jit(lambda inp: encoder_forward(inp, [None, None, None], params))
    outs = jax.block_until_ready(run(inputs))

    expected = [(2, 8, 16, 16), (2, 16, 8, 8), (2, 16, 4, 4)]
    assert len(outs) == 3
    refs = _ref_forward(inputs, [None, None, None], raw)
    for o, es, r in zip(outs, expected, refs):
        assert o.shape == es, (o.shape, es)
        assert bool(jnp.all(jnp.isfinite(o)))
        # Loose tolerance: kernel uses bf16 MXU operands with f32 accumulation.
        assert float(jnp.max(jnp.abs(o - r))) < 1e-1, float(jnp.max(jnp.abs(o - r)))
    print("KERNEL_OK")
</pallas_src>

<mosaic_0001>
module attributes {stable_mosaic.version = 11 : i64} {
  func.func @_conv_mm_kernel(%arg0: i32, %arg1: memref<8x18xbf16, #tpu.memory_space<vmem>>, %arg2: memref<18x2048xbf16, #tpu.memory_space<vmem>>, %arg3: memref<8x1xf32, #tpu.memory_space<vmem>>, %arg4: memref<8x2048xf32, #tpu.memory_space<vmem>>) attributes {dimension_semantics = [#tpu.dimension_semantics<parallel>], iteration_bounds = array<i64: 2>, scalar_prefetch = 0 : i64, scratch_operands = 0 : i64, tpu.core_type = #tpu.core_type<tc>, window_params = [{pipeline_mode = #tpu.pipeline_mode<synchronous>, transform_indices = @transform_0, window_bounds = array<i64: 8, 18>}, {transform_indices = @transform_1, window_bounds = array<i64: 18, 2048>}, {pipeline_mode = #tpu.pipeline_mode<synchronous>, transform_indices = @transform_2, window_bounds = array<i64: 8, 1>}, {transform_indices = @transform_3, window_bounds = array<i64: 8, 2048>}]} {
    %c0 = arith.constant 0 : index
    %c0_0 = arith.constant 0 : index
    %0 = vector.load %arg1[%c0, %c0_0] : memref<8x18xbf16, #tpu.memory_space<vmem>>, vector<8x18xbf16>
    %c0_1 = arith.constant 0 : index
    %c0_2 = arith.constant 0 : index
    %1 = vector.load %arg2[%c0_1, %c0_2] : memref<18x2048xbf16, #tpu.memory_space<vmem>>, vector<18x2048xbf16>
    %cst = arith.constant dense<0.000000e+00> : vector<8x2048xf32>
    %2 = tpu.matmul %0, %1, %cst {dimension_numbers = #tpu.dot_dimension_numbers<[1], [0], [0], [1], [0, 0, 1, 1], [], []>} : vector<8x18xbf16>, vector<18x2048xbf16>, vector<8x2048xf32> -> vector<8x2048xf32>
    %c0_3 = arith.constant 0 : index
    %c0_4 = arith.constant 0 : index
    %3 = vector.load %arg3[%c0_3, %c0_4] : memref<8x1xf32, #tpu.memory_space<vmem>>, vector<8x1xf32>
    %4 = vector.broadcast %3 : vector<8x1xf32> to vector<8x2048xf32>
    %5 = arith.addf %2, %4 : vector<8x2048xf32>
    %cst_5 = arith.constant 0.000000e+00 : f32
    %6 = vector.broadcast %cst_5 : f32 to vector<8x2048xf32>
    %7 = arith.cmpf oge, %5, %6 : vector<8x2048xf32>
    %cst_6 = arith.constant 2.000000e-01 : f32
    %8 = vector.broadcast %cst_6 : f32 to vector<8x2048xf32>
    %9 = arith.mulf %8, %5 : vector<8x2048xf32>
    %10 = arith.select %7, %5, %9 : vector<8x2048xi1>, vector<8x2048xf32>
    %c0_7 = arith.constant 0 : index
    %c0_8 = arith.constant 0 : index
    %11 = vector.load %arg4[%c0_7, %c0_8] : memref<8x2048xf32, #tpu.memory_space<vmem>>, vector<8x2048xf32>
    tpu.vector_store %arg4[%c0_7, %c0_8], %10 {strides = array<i32>} : memref<8x2048xf32, #tpu.memory_space<vmem>>, vector<8x2048xf32>,
    return
  }
  func.func @transform_0(%arg0: i32) -> (i32, i32) {
    %c0_i32 = arith.constant 0 : i32
    %c0_i32_0 = arith.constant 0 : i32
    %c0_i32_1 = arith.constant 0 : i32
    return %c0_i32, %c0_i32_0 : i32, i32
  }
  func.func @transform_1(%arg0: i32) -> (i32, i32) {
    %c0_i32 = arith.constant 0 : i32
    %c0_i32_0 = arith.constant 0 : i32
    return %c0_i32, %arg0 : i32, i32
  }
  func.func @transform_2(%arg0: i32) -> (i32, i32) {
    %c0_i32 = arith.constant 0 : i32
    %c0_i32_0 = arith.constant 0 : i32
    %c0_i32_1 = arith.constant 0 : i32
    return %c0_i32, %c0_i32_0 : i32, i32
  }
  func.func @transform_3(%arg0: i32) -> (i32, i32) {
    %c0_i32 = arith.constant 0 : i32
    %c0_i32_0 = arith.constant 0 : i32
    return %c0_i32, %arg0 : i32, i32
  }
}

module attributes {stable_mosaic.version = 11 : i64} {
  func.func @_gru_seq_kernel(%arg0: i32, %arg1: i32, %arg2: memref<1x1x8x384xf32, #tpu.memory_space<vmem>>, %arg3: memref<1x8x384xf32, #tpu.memory_space<vmem>>, %arg4: memref<1x384xf32, #tpu.memory_space<vmem>>, %arg5: memref<24x72xbf16, #tpu.memory_space<vmem>>, %arg6: memref<24x1xf32, #tpu.memory_space<vmem>>, %arg7: memref<16x72xbf16, #tpu.memory_space<vmem>>, %arg8: memref<8x72xbf16, #tpu.memory_space<vmem>>, %arg9: memref<1x8x384xf32, #tpu.memory_space<vmem>>, %arg10: memref<8x384xf32, #tpu.memory_space<vmem>>, %arg11: memref<72x384xf32, #tpu.memory_space<vmem>>) attributes {dimension_semantics = [#tpu.dimension_semantics<parallel>, #tpu.dimension_semantics<arbitrary>], iteration_bounds = array<i64: 2, 8>, scalar_prefetch = 0 : i64, scratch_operands = 2 : i64, tpu.core_type = #tpu.core_type<tc>, window_params = [{transform_indices = @transform_0, window_bounds = array<i64: 1, 1, 8, 384>}, {transform_indices = @transform_1, window_bounds = array<i64: 1, 8, 384>}, {pipeline_mode = #tpu.pipeline_mode<synchronous>, transform_indices = @transform_2, window_bounds = array<i64: 1, 384>}, {pipeline_mode = #tpu.pipeline_mode<synchronous>, transform_indices = @transform_3, window_bounds = array<i64: 24, 72>}, {pipeline_mode = #tpu.pipeline_mode<synchronous>, transform_indices = @transform_4, window_bounds = array<i64: 24, 1>}, {pipeline_mode = #tpu.pipeline_mode<synchronous>, transform_indices = @transform_5, window_bounds = array<i64: 16, 72>}, {pipeline_mode = #tpu.pipeline_mode<synchronous>, transform_indices = @transform_6, window_bounds = array<i64: 8, 72>}, {transform_indices = @transform_7, window_bounds = array<i64: 1, 8, 384>}]} {
    %c0_i32 = arith.constant 0 : i32
    %0 = arith.cmpi eq, %arg1, %c0_i32 : i32
    %1 = arith.extui %0 : i1 to i32
    %c0_i32_0 = arith.constant 0 : i32
    %2 = arith.cmpi ne, %1, %c0_i32_0 : i32
    scf.if %2 {
      %c0_92 = arith.constant 0 : index
      %c0_93 = arith.constant 0 : index
      %c0_94 = arith.constant 0 : index
      %102 = vector.load %arg3[%c0_92, %c0_93, %c0_94] : memref<1x8x384xf32, #tpu.memory_space<vmem>>, vector<1x8x384xf32>
      %103 = vector.shape_cast %102 : vector<1x8x384xf32> to vector<8x384xf32>
      %c0_95 = arith.constant 0 : index
      %c0_96 = arith.constant 0 : index
      %104 = vector.load %arg10[%c0_95, %c0_96] : memref<8x384xf32, #tpu.memory_space<vmem>>, vector<8x384xf32>
      tpu.vector_store %arg10[%c0_95, %c0_96], %103 {strides = array<i32>} : memref<8x384xf32, #tpu.memory_space<vmem>>, vector<8x384xf32>,
    } else {
    }
    %c0 = arith.constant 0 : index
    %c0_1 = arith.constant 0 : index
    %c0_2 = arith.constant 0 : index
    %c0_3 = arith.constant 0 : index
    %3 = vector.load %arg2[%c0, %c0_1, %c0_2, %c0_3] : memref<1x1x8x384xf32, #tpu.memory_space<vmem>>, vector<1x1x8x384xf32>
    %4 = vector.shape_cast %3 : vector<1x1x8x384xf32> to vector<8x384xf32>
    %c19_i32 = arith.constant 19 : i32
    %5 = tpu.dynamic_rotate %4 by %c19_i32 dim 1 : vector<8x384xf32>, i32 -> vector<8x384xf32>
    %c0_4 = arith.constant 0 : index
    %c0_5 = arith.constant 0 : index
    %6 = vector.load %arg11[%c0_4, %c0_5] : memref<72x384xf32, #tpu.memory_space<vmem>>, vector<8x384xf32>
    tpu.vector_store %arg11[%c0_4, %c0_5], %5 {strides = array<i32>} : memref<72x384xf32, #tpu.memory_space<vmem>>, vector<8x384xf32>,
    %c18_i32 = arith.constant 18 : i32
    %7 = tpu.dynamic_rotate %4 by %c18_i32 dim 1 : vector<8x384xf32>, i32 -> vector<8x384xf32>
    %c8 = arith.constant 8 : index
    %c0_6 = arith.constant 0 : index
    %8 = vector.load %arg11[%c8, %c0_6] : memref<72x384xf32, #tpu.memory_space<vmem>>, vector<8x384xf32>
    tpu.vector_store %arg11[%c8, %c0_6], %7 {strides = array<i32>} : memref<72x384xf32, #tpu.memory_space<vmem>>, vector<8x384xf32>,
    %c17_i32 = arith.constant 17 : i32
    %9 = tpu.dynamic_rotate %4 by %c17_i32 dim 1 : vector<8x384xf32>, i32 -> vector<8x384xf32>
    %c16 = arith.constant 16 : index
    %c0_7 = arith.constant 0 : index
    %10 = vector.load %arg11[%c16, %c0_7] : memref<72x384xf32, #tpu.memory_space<vmem>>, vector<8x384xf32>
    tpu.vector_store %arg11[%c16, %c0_7], %9 {strides = array<i32>} : memref<72x384xf32, #tpu.memory_space<vmem>>, vector<8x384xf32>,
    %c1_i32 = arith.constant 1 : i32
    %11 = tpu.dynamic_rotate %4 by %c1_i32 dim 1 : vector<8x384xf32>, i32 -> vector<8x384xf32>
    %c24 = arith.constant 24 : index
    %c0_8 = arith.constant 0 : index
    %12 = vector.load %arg11[%c24, %c0_8] : memref<72x384xf32, #tpu.memory_space<vmem>>, vector<8x384xf32>
    tpu.vector_store %arg11[%c24, %c0_8], %11 {strides = array<i32>} : memref<72x384xf32, #tpu.memory_space<vmem>>, vector<8x384xf32>,
    %c32 = arith.constant 32 : index
    %c0_9 = arith.constant 0 : index
    %13 = vector.load %arg11[%c32, %c0_9] : memref<72x384xf32, #tpu.memory_space<vmem>>, vector<8x384xf32>
    tpu.vector_store %arg11[%c32, %c0_9], %4 {strides = array<i32>} : memref<72x384xf32, #tpu.memory_space<vmem>>, vector<8x384xf32>,
    %c383_i32 = arith.constant 383 : i32
    %14 = tpu.dynamic_rotate %4 by %c383_i32 dim 1 : vector<8x384xf32>, i32 -> vector<8x384xf32>
    %c40 = arith.constant 40 : index
    %c0_10 = arith.constant 0 : index
    %15 = vector.load %arg11[%c40, %c0_10] : memref<72x384xf32, #tpu.memory_space<vmem>>, vector<8x384xf32>
    tpu.vector_store %arg11[%c40, %c0_10], %14 {strides = array<i32>} : memref<72x384xf32, #tpu.memory_space<vmem>>, vector<8x384xf32>,
    %c367_i32 = arith.constant 367 : i32
    %16 = tpu.dynamic_rotate %4 by %c367_i32 dim 1 : vector<8x384xf32>, i32 -> vector<8x384xf32>
    %c48 = arith.constant 48 : index
    %c0_11 = arith.constant 0 : index
    %17 = vector.load %arg11[%c48, %c0_11] : memref<72x384xf32, #tpu.memory_space<vmem>>, vector<8x384xf32>
    tpu.vector_store %arg11[%c48, %c0_11], %16 {strides = array<i32>} : memref<72x384xf32, #tpu.memory_space<vmem>>, vector<8x384xf32>,
    %c366_i32 = arith.constant 366 : i32
    %18 = tpu.dynamic_rotate %4 by %c366_i32 dim 1 : vector<8x384xf32>, i32 -> vector<8x384xf32>
    %c56 = arith.constant 56 : index
    %c0_12 = arith.constant 0 : index
    %19 = vector.load %arg11[%c56, %c0_12] : memref<72x384xf32, #tpu.memory_space<vmem>>, vector<8x384xf32>
    tpu.vector_store %arg11[%c56, %c0_12], %18 {strides = array<i32>} : memref<72x384xf32, #tpu.memory_space<vmem>>, vector<8x384xf32>,
    %c365_i32 = arith.constant 365 : i32
    %20 = tpu.dynamic_rotate %4 by %c365_i32 dim 1 : vector<8x384xf32>, i32 -> vector<8x384xf32>
    %c64 = arith.constant 64 : index
    %c0_13 = arith.constant 0 : index
    %21 = vector.load %arg11[%c64, %c0_13] : memref<72x384xf32, #tpu.memory_space<vmem>>, vector<8x384xf32>
    tpu.vector_store %arg11[%c64, %c0_13], %20 {strides = array<i32>} : memref<72x384xf32, #tpu.memory_space<vmem>>, vector<8x384xf32>,
    %c0_14 = arith.constant 0 : index
    %c0_15 = arith.constant 0 : index
    %22 = vector.load %arg11[%c0_14, %c0_15] : memref<72x384xf32, #tpu.memory_space<vmem>>, vector<72x384xf32>
    %23 = arith.truncf %22 : vector<72x384xf32> to vector<72x384xbf16>
    %c0_16 = arith.constant 0 : index
    %c0_17 = arith.constant 0 : index
    %24 = vector.load %arg5[%c0_16, %c0_17] : memref<24x72xbf16, #tpu.memory_space<vmem>>, vector<24x72xbf16>
    %cst = arith.constant dense<0.000000e+00> : vector<24x384xf32>
    %25 = tpu.matmul %24, %23, %cst {dimension_numbers = #tpu.dot_dimension_numbers<[1], [0], [0], [1], [0, 0, 1, 1], [], []>} : vector<24x72xbf16>, vector<72x384xbf16>, vector<24x384xf32> -> vector<24x384xf32>
    %c0_18 = arith.constant 0 : index
    %c0_19 = arith.constant 0 : index
    %26 = vector.load %arg6[%c0_18, %c0_19] : memref<24x1xf32, #tpu.memory_space<vmem>>, vector<24x1xf32>
    %27 = vector.broadcast %26 : vector<24x1xf32> to vector<24x384xf32>
    %28 = arith.addf %25, %27 : vector<24x384xf32>
    %c0_20 = arith.constant 0 : index
    %c0_21 = arith.constant 0 : index
    %29 = vector.load %arg10[%c0_20, %c0_21] : memref<8x384xf32, #tpu.memory_space<vmem>>, vector<8x384xf32>
    %c19_i32_22 = arith.constant 19 : i32
    %30 = tpu.dynamic_rotate %29 by %c19_i32_22 dim 1 : vector<8x384xf32>, i32 -> vector<8x384xf32>
    %c0_23 = arith.constant 0 : index
    %c0_24 = arith.constant 0 : index
    %31 = vector.load %arg11[%c0_23, %c0_24] : memref<72x384xf32, #tpu.memory_space<vmem>>, vector<8x384xf32>
    tpu.vector_store %arg11[%c0_23, %c0_24], %30 {strides = array<i32>} : memref<72x384xf32, #tpu.memory_space<vmem>>, vector<8x384xf32>,
    %c18_i32_25 = arith.constant 18 : i32
    %32 = tpu.dynamic_rotate %29 by %c18_i32_25 dim 1 : vector<8x384xf32>, i32 -> vector<8x384xf32>
    %c8_26 = arith.constant 8 : index
    %c0_27 = arith.constant 0 : index
    %33 = vector.load %arg11[%c8_26, %c0_27] : memref<72x384xf32, #tpu.memory_space<vmem>>, vector<8x384xf32>
    tpu.vector_store %arg11[%c8_26, %c0_27], %32 {strides = array<i32>} : memref<72x384xf32, #tpu.memory_space<vmem>>, vector<8x384xf32>,
    %c17_i32_28 = arith.constant 17 : i32
    %34 = tpu.dynamic_rotate %29 by %c17_i32_28 dim 1 : vector<8x384xf32>, i32 -> vector<8x384xf32>
    %c16_29 = arith.constant 16 : index
    %c0_30 = arith.constant 0 : index
    %35 = vector.load %arg11[%c16_29, %c0_30] : memref<72x384xf32, #tpu.memory_space<vmem>>, vector<8x384xf32>
    tpu.vector_store %arg11[%c16_29, %c0_30], %34 {strides = array<i32>} : memref<72x384xf32, #tpu.memory_space<vmem>>, vector<8x384xf32>,
    %c1_i32_31 = arith.constant 1 : i32
    %36 = tpu.dynamic_rotate %29 by %c1_i32_31 dim 1 : vector<8x384xf32>, i32 -> vector<8x384xf32>
    %c24_32 = arith.constant 24 : index
    %c0_33 = arith.constant 0 : index
    %37 = vector.load %arg11[%c24_32, %c0_33] : memref<72x384xf32, #tpu.memory_space<vmem>>, vector<8x384xf32>
    tpu.vector_store %arg11[%c24_32, %c0_33], %36 {strides = array<i32>} : memref<72x384xf32, #tpu.memory_space<vmem>>, vector<8x384xf32>,
    %c32_34 = arith.constant 32 : index
    %c0_35 = arith.constant 0 : index
    %38 = vector.load %arg11[%c32_34, %c0_35] : memref<72x384xf32, #tpu.memory_space<vmem>>, vector<8x384xf32>
    tpu.vector_store %arg11[%c32_34, %c0_35], %29 {strides = array<i32>} : memref<72x384xf32, #tpu.memory_space<vmem>>, vector<8x384xf32>,
    %c383_i32_36 = arith.constant 383 : i32
    %39 = tpu.dynamic_rotate %29 by %c383_i32_36 dim 1 : vector<8x384xf32>, i32 -> vector<8x384xf32>
    %c40_37 = arith.constant 40 : index
    %c0_38 = arith.constant 0 : index
    %40 = vector.load %arg11[%c40_37, %c0_38] : memref<72x384xf32, #tpu.memory_space<vmem>>, vector<8x384xf32>
    tpu.vector_store %arg11[%c40_37, %c0_38], %39 {strides = array<i32>} : memref<72x384xf32, #tpu.memory_space<vmem>>, vector<8x384xf32>,
    %c367_i32_39 = arith.constant 367 : i32
    %41 = tpu.dynamic_rotate %29 by %c367_i32_39 dim 1 : vector<8x384xf32>, i32 -> vector<8x384xf32>
    %c48_40 = arith.constant 48 : index
    %c0_41 = arith.constant 0 : index
    %42 = vector.load %arg11[%c48_40, %c0_41] : memref<72x384xf32, #tpu.memory_space<vmem>>, vector<8x384xf32>
    tpu.vector_store %arg11[%c48_40, %c0_41], %41 {strides = array<i32>} : memref<72x384xf32, #tpu.memory_space<vmem>>, vector<8x384xf32>,
    %c366_i32_42 = arith.constant 366 : i32
    %43 = tpu.dynamic_rotate %29 by %c366_i32_42 dim 1 : vector<8x384xf32>, i32 -> vector<8x384xf32>
    %c56_43 = arith.constant 56 : index
    %c0_44 = arith.constant 0 : index
    %44 = vector.load %arg11[%c56_43, %c0_44] : memref<72x384xf32, #tpu.memory_space<vmem>>, vector<8x384xf32>
    tpu.vector_store %arg11[%c56_43, %c0_44], %43 {strides = array<i32>} : memref<72x384xf32, #tpu.memory_space<vmem>>, vector<8x384xf32>,
    %c365_i32_45 = arith.constant 365 : i32
    %45 = tpu.dynamic_rotate %29 by %c365_i32_45 dim 1 : vector<8x384xf32>, i32 -> vector<8x384xf32>
    %c64_46 = arith.constant 64 : index
    %c0_47 = arith.constant 0 : index
    %46 = vector.load %arg11[%c64_46, %c0_47] : memref<72x384xf32, #tpu.memory_space<vmem>>, vector<8x384xf32>
    tpu.vector_store %arg11[%c64_46, %c0_47], %45 {strides = array<i32>} : memref<72x384xf32, #tpu.memory_space<vmem>>, vector<8x384xf32>,
    %c0_48 = arith.constant 0 : index
    %c0_49 = arith.constant 0 : index
    %47 = vector.load %arg11[%c0_48, %c0_49] : memref<72x384xf32, #tpu.memory_space<vmem>>, vector<72x384xf32>
    %48 = arith.truncf %47 : vector<72x384xf32> to vector<72x384xbf16>
    %49 = vector.extract_strided_slice %28 {offsets = [0, 0], sizes = [16, 384], strides = [1, 1]} : vector<24x384xf32> to vector<16x384xf32>
    %c0_50 = arith.constant 0 : index
    %c0_51 = arith.constant 0 : index
    %50 = vector.load %arg7[%c0_50, %c0_51] : memref<16x72xbf16, #tpu.memory_space<vmem>>, vector<16x72xbf16>
    %cst_52 = arith.constant dense<0.000000e+00> : vector<16x384xf32>
    %51 = tpu.matmul %50, %48, %cst_52 {dimension_numbers = #tpu.dot_dimension_numbers<[1], [0], [0], [1], [0, 0, 1, 1], [], []>} : vector<16x72xbf16>, vector<72x384xbf16>, vector<16x384xf32> -> vector<16x384xf32>
    %52 = arith.addf %49, %51 : vector<16x384xf32>
    %53 = vector.extract_strided_slice %52 {offsets = [0, 0], sizes = [8, 384], strides = [1, 1]} : vector<16x384xf32> to vector<8x384xf32>
    %54 = arith.negf %53 : vector<8x384xf32>
    %55 = math.exp %54 : vector<8x384xf32>
    %cst_53 = arith.constant 1.000000e+00 : f32
    %56 = vector.broadcast %cst_53 : f32 to vector<8x384xf32>
    %57 = arith.addf %56, %55 : vector<8x384xf32>
    %58 = arith.divf %56, %57 : vector<8x384xf32>
    %59 = vector.extract_strided_slice %52 {offsets = [8, 0], sizes = [8, 384], strides = [1, 1]} : vector<16x384xf32> to vector<8x384xf32>
    %60 = arith.negf %59 : vector<8x384xf32>
    %61 = math.exp %60 : vector<8x384xf32>
    %cst_54 = arith.constant 1.000000e+00 : f32
    %62 = vector.broadcast %cst_54 : f32 to vector<8x384xf32>
    %63 = arith.addf %62, %61 : vector<8x384xf32>
    %64 = arith.divf %62, %63 : vector<8x384xf32>
    %65 = arith.mulf %64, %29 : vector<8x384xf32>
    %c19_i32_55 = arith.constant 19 : i32
    %66 = tpu.dynamic_rotate %65 by %c19_i32_55 dim 1 : vector<8x384xf32>, i32 -> vector<8x384xf32>
    %c0_56 = arith.constant 0 : index
    %c0_57 = arith.constant 0 : index
    %67 = vector.load %arg11[%c0_56, %c0_57] : memref<72x384xf32, #tpu.memory_space<vmem>>, vector<8x384xf32>
    tpu.vector_store %arg11[%c0_56, %c0_57], %66 {strides = array<i32>} : memref<72x384xf32, #tpu.memory_space<vmem>>, vector<8x384xf32>,
    %c18_i32_58 = arith.constant 18 : i32
    %68 = tpu.dynamic_rotate %65 by %c18_i32_58 dim 1 : vector<8x384xf32>, i32 -> vector<8x384xf32>
    %c8_59 = arith.constant 8 : index
    %c0_60 = arith.constant 0 : index
    %69 = vector.load %arg11[%c8_59, %c0_60] : memref<72x384xf32, #tpu.memory_space<vmem>>, vector<8x384xf32>
    tpu.vector_store %arg11[%c8_59, %c0_60], %68 {strides = array<i32>} : memref<72x384xf32, #tpu.memory_space<vmem>>, vector<8x384xf32>,
    %c17_i32_61 = arith.constant 17 : i32
    %70 = tpu.dynamic_rotate %65 by %c17_i32_61 dim 1 : vector<8x384xf32>, i32 -> vector<8x384xf32>
    %c16_62 = arith.constant 16 : index
    %c0_63 = arith.constant 0 : index
    %71 = vector.load %arg11[%c16_62, %c0_63] : memref<72x384xf32, #tpu.memory_space<vmem>>, vector<8x384xf32>
    tpu.vector_store %arg11[%c16_62, %c0_63], %70 {strides = array<i32>} : memref<72x384xf32, #tpu.memory_space<vmem>>, vector<8x384xf32>,
    %c1_i32_64 = arith.constant 1 : i32
    %72 = tpu.dynamic_rotate %65 by %c1_i32_64 dim 1 : vector<8x384xf32>, i32 -> vector<8x384xf32>
    %c24_65 = arith.constant 24 : index
    %c0_66 = arith.constant 0 : index
    %73 = vector.load %arg11[%c24_65, %c0_66] : memref<72x384xf32, #tpu.memory_space<vmem>>, vector<8x384xf32>
    tpu.vector_store %arg11[%c24_65, %c0_66], %72 {strides = array<i32>} : memref<72x384xf32, #tpu.memory_space<vmem>>, vector<8x384xf32>,
    %c32_67 = arith.constant 32 : index
    %c0_68 = arith.constant 0 : index
    %74 = vector.load %arg11[%c32_67, %c0_68] : memref<72x384xf32, #tpu.memory_space<vmem>>, vector<8x384xf32>
    tpu.vector_store %arg11[%c32_67, %c0_68], %65 {strides = array<i32>} : memref<72x384xf32, #tpu.memory_space<vmem>>, vector<8x384xf32>,
    %c383_i32_69 = arith.constant 383 : i32
    %75 = tpu.dynamic_rotate %65 by %c383_i32_69 dim 1 : vector<8x384xf32>, i32 -> vector<8x384xf32>
    %c40_70 = arith.constant 40 : index
    %c0_71 = arith.constant 0 : index
    %76 = vector.load %arg11[%c40_70, %c0_71] : memref<72x384xf32, #tpu.memory_space<vmem>>, vector<8x384xf32>
    tpu.vector_store %arg11[%c40_70, %c0_71], %75 {strides = array<i32>} : memref<72x384xf32, #tpu.memory_space<vmem>>, vector<8x384xf32>,
    %c367_i32_72 = arith.constant 367 : i32
    %77 = tpu.dynamic_rotate %65 by %c367_i32_72 dim 1 : vector<8x384xf32>, i32 -> vector<8x384xf32>
    %c48_73 = arith.constant 48 : index
    %c0_74 = arith.constant 0 : index
    %78 = vector.load %arg11[%c48_73, %c0_74] : memref<72x384xf32, #tpu.memory_space<vmem>>, vector<8x384xf32>
    tpu.vector_store %arg11[%c48_73, %c0_74], %77 {strides = array<i32>} : memref<72x384xf32, #tpu.memory_space<vmem>>, vector<8x384xf32>,
    %c366_i32_75 = arith.constant 366 : i32
    %79 = tpu.dynamic_rotate %65 by %c366_i32_75 dim 1 : vector<8x384xf32>, i32 -> vector<8x384xf32>
    %c56_76 = arith.constant 56 : index
    %c0_77 = arith.constant 0 : index
    %80 = vector.load %arg11[%c56_76, %c0_77] : memref<72x384xf32, #tpu.memory_space<vmem>>, vector<8x384xf32>
    tpu.vector_store %arg11[%c56_76, %c0_77], %79 {strides = array<i32>} : memref<72x384xf32, #tpu.memory_space<vmem>>, vector<8x384xf32>,
    %c365_i32_78 = arith.constant 365 : i32
    %81 = tpu.dynamic_rotate %65 by %c365_i32_78 dim 1 : vector<8x384xf32>, i32 -> vector<8x384xf32>
    %c64_79 = arith.constant 64 : index
    %c0_80 = arith.constant 0 : index
    %82 = vector.load %arg11[%c64_79, %c0_80] : memref<72x384xf32, #tpu.memory_space<vmem>>, vector<8x384xf32>
    tpu.vector_store %arg11[%c64_79, %c0_80], %81 {strides = array<i32>} : memref<72x384xf32, #tpu.memory_space<vmem>>, vector<8x384xf32>,
    %c0_81 = arith.constant 0 : index
    %c0_82 = arith.constant 0 : index
    %83 = vector.load %arg11[%c0_81, %c0_82] : memref<72x384xf32, #tpu.memory_space<vmem>>, vector<72x384xf32>
    %84 = arith.truncf %83 : vector<72x384xf32> to vector<72x384xbf16>
    %85 = vector.extract_strided_slice %28 {offsets = [16, 0], sizes = [8, 384], strides = [1, 1]} : vector<24x384xf32> to vector<8x384xf32>
    %c0_83 = arith.constant 0 : index
    %c0_84 = arith.constant 0 : index
    %86 = vector.load %arg8[%c0_83, %c0_84] : memref<8x72xbf16, #tpu.memory_space<vmem>>, vector<8x72xbf16>
    %cst_85 = arith.constant dense<0.000000e+00> : vector<8x384xf32>
    %87 = tpu.matmul %86, %84, %cst_85 {dimension_numbers = #tpu.dot_dimension_numbers<[1], [0], [0], [1], [0, 0, 1, 1], [], []>} : vector<8x72xbf16>, vector<72x384xbf16>, vector<8x384xf32> -> vector<8x384xf32>
    %88 = arith.addf %85, %87 : vector<8x384xf32>
    %89 = math.tanh %88 : vector<8x384xf32>
    %cst_86 = arith.constant 1.000000e+00 : f32
    %90 = vector.broadcast %cst_86 : f32 to vector<8x384xf32>
    %91 = arith.subf %90, %58 : vector<8x384xf32>
    %92 = arith.mulf %91, %29 : vector<8x384xf32>
    %93 = arith.mulf %58, %89 : vector<8x384xf32>
    %94 = arith.addf %92, %93 : vector<8x384xf32>
    %c0_87 = arith.constant 0 : index
    %c0_88 = arith.constant 0 : index
    %95 = vector.load %arg4[%c0_87, %c0_88] : memref<1x384xf32, #tpu.memory_space<vmem>>, vector<1x384xf32>
    %96 = vector.broadcast %95 : vector<1x384xf32> to vector<8x384xf32>
    %97 = arith.mulf %94, %96 : vector<8x384xf32>
    %c0_89 = arith.constant 0 : index
    %c0_90 = arith.constant 0 : index
    %98 = vector.load %arg10[%c0_89, %c0_90] : memref<8x384xf32, #tpu.memory_space<vmem>>, vector<8x384xf32>
    tpu.vector_store %arg10[%c0_89, %c0_90], %97 {strides = array<i32>} : memref<8x384xf32, #tpu.memory_space<vmem>>, vector<8x384xf32>,
    %c7_i32 = arith.constant 7 : i32
    %99 = arith.cmpi eq, %arg1, %c7_i32 : i32
    %100 = arith.extui %99 : i1 to i32
    %c0_i32_91 = arith.constant 0 : i32
    %101 = arith.cmpi ne, %100, %c0_i32_91 : i32
    scf.if %101 {
      %c0_92 = arith.constant 0 : index
      %c0_93 = arith.constant 0 : index
      %c0_94 = arith.constant 0 : index
      %102 = vector.load %arg9[%c0_92, %c0_93, %c0_94] : memref<1x8x384xf32, #tpu.memory_space<vmem>>, vector<1x8x384xf32>
      %103 = vector.shape_cast %102 : vector<1x8x384xf32> to vector<8x384xf32>
      %104 = vector.shape_cast %97 : vector<8x384xf32> to vector<1x8x384xf32>
      tpu.vector_store %arg9[%c0_92, %c0_93, %c0_94], %104 {strides = array<i32>} : memref<1x8x384xf32, #tpu.memory_space<vmem>>, vector<1x8x384xf32>,
    } else {
    }
    return
  }
  func.func @transform_0(%arg0: i32, %arg1: i32) -> (i32, i32, i32, i32) {
    %c0_i32 = arith.constant 0 : i32
    %c0_i32_0 = arith.constant 0 : i32
    %c0_i32_1 = arith.constant 0 : i32
    return %arg1, %arg0, %c0_i32, %c0_i32_0 : i32, i32, i32, i32
  }
  func.func @transform_1(%arg0: i32, %arg1: i32) -> (i32, i32, i32) {
    %c0_i32 = arith.constant 0 : i32
    %c0_i32_0 = arith.constant 0 : i32
    %c0_i32_1 = arith.constant 0 : i32
    return %arg0, %c0_i32, %c0_i32_0 : i32, i32, i32
  }
  func.func @transform_2(%arg0: i32, %arg1: i32) -> (i32, i32) {
    %c0_i32 = arith.constant 0 : i32
    %c0_i32_0 = arith.constant 0 : i32
    %c0_i32_1 = arith.constant 0 : i32
    return %c0_i32, %c0_i32_0 : i32, i32
  }
  func.func @transform_3(%arg0: i32, %arg1: i32) -> (i32, i32) {
    %c0_i32 = arith.constant 0 : i32
    %c0_i32_0 = arith.constant 0 : i32
    %c0_i32_1 = arith.constant 0 : i32
    return %c0_i32, %c0_i32_0 : i32, i32
  }
  func.func @transform_4(%arg0: i32, %arg1: i32) -> (i32, i32) {
    %c0_i32 = arith.constant 0 : i32
    %c0_i32_0 = arith.constant 0 : i32
    %c0_i32_1 = arith.constant 0 : i32
    return %c0_i32, %c0_i32_0 : i32, i32
  }
  func.func @transform_5(%arg0: i32, %arg1: i32) -> (i32, i32) {
    %c0_i32 = arith.constant 0 : i32
    %c0_i32_0 = arith.constant 0 : i32
    %c0_i32_1 = arith.constant 0 : i32
    return %c0_i32, %c0_i32_0 : i32, i32
  }
  func.func @transform_6(%arg0: i32, %arg1: i32) -> (i32, i32) {
    %c0_i32 = arith.constant 0 : i32
    %c0_i32_0 = arith.constant 0 : i32
    %c0_i32_1 = arith.constant 0 : i32
    return %c0_i32, %c0_i32_0 : i32, i32
  }
  func.func @transform_7(%arg0: i32, %arg1: i32) -> (i32, i32, i32) {
    %c0_i32 = arith.constant 0 : i32
    %c0_i32_0 = arith.constant 0 : i32
    %c0_i32_1 = arith.constant 0 : i32
    return %arg0, %c0_i32, %c0_i32_0 : i32, i32, i32
  }
}

module attributes {stable_mosaic.version = 11 : i64} {
  func.func @_conv_mm_kernel(%arg0: i32, %arg1: memref<16x72xbf16, #tpu.memory_space<vmem>>, %arg2: memref<72x128xbf16, #tpu.memory_space<vmem>>, %arg3: memref<16x1xf32, #tpu.memory_space<vmem>>, %arg4: memref<16x128xf32, #tpu.memory_space<vmem>>) attributes {dimension_semantics = [#tpu.dimension_semantics<parallel>], iteration_bounds = array<i64: 1>, scalar_prefetch = 0 : i64, scratch_operands = 0 : i64, tpu.core_type = #tpu.core_type<tc>, window_params = [{pipeline_mode = #tpu.pipeline_mode<synchronous>, transform_indices = @transform_0, window_bounds = array<i64: 16, 72>}, {transform_indices = @transform_1, window_bounds = array<i64: 72, 128>}, {pipeline_mode = #tpu.pipeline_mode<synchronous>, transform_indices = @transform_2, window_bounds = array<i64: 16, 1>}, {transform_indices = @transform_3, window_bounds = array<i64: 16, 128>}]} {
    %c0 = arith.constant 0 : index
    %c0_0 = arith.constant 0 : index
    %0 = vector.load %arg1[%c0, %c0_0] : memref<16x72xbf16, #tpu.memory_space<vmem>>, vector<16x72xbf16>
    %c0_1 = arith.constant 0 : index
    %c0_2 = arith.constant 0 : index
    %1 = vector.load %arg2[%c0_1, %c0_2] : memref<72x128xbf16, #tpu.memory_space<vmem>>, vector<72x128xbf16>
    %cst = arith.constant dense<0.000000e+00> : vector<16x128xf32>
    %2 = tpu.matmul %0, %1, %cst {dimension_numbers = #tpu.dot_dimension_numbers<[1], [0], [0], [1], [0, 0, 1, 1], [], []>} : vector<16x72xbf16>, vector<72x128xbf16>, vector<16x128xf32> -> vector<16x128xf32>
    %c0_3 = arith.constant 0 : index
    %c0_4 = arith.constant 0 : index
    %3 = vector.load %arg3[%c0_3, %c0_4] : memref<16x1xf32, #tpu.memory_space<vmem>>, vector<16x1xf32>
    %4 = vector.broadcast %3 : vector<16x1xf32> to vector<16x128xf32>
    %5 = arith.addf %2, %4 : vector<16x128xf32>
    %cst_5 = arith.constant 0.000000e+00 : f32
    %6 = vector.broadcast %cst_5 : f32 to vector<16x128xf32>
    %7 = arith.cmpf oge, %5, %6 : vector<16x128xf32>
    %cst_6 = arith.constant 2.000000e-01 : f32
    %8 = vector.broadcast %cst_6 : f32 to vector<16x128xf32>
    %9 = arith.mulf %8, %5 : vector<16x128xf32>
    %10 = arith.select %7, %5, %9 : vector<16x128xi1>, vector<16x128xf32>
    %c0_7 = arith.constant 0 : index
    %c0_8 = arith.constant 0 : index
    %11 = vector.load %arg4[%c0_7, %c0_8] : memref<16x128xf32, #tpu.memory_space<vmem>>, vector<16x128xf32>
    tpu.vector_store %arg4[%c0_7, %c0_8], %10 {strides = array<i32>} : memref<16x128xf32, #tpu.memory_space<vmem>>, vector<16x128xf32>,
    return
  }
  func.func @transform_0(%arg0: i32) -> (i32, i32) {
    %c0_i32 = arith.constant 0 : i32
    %c0_i32_0 = arith.constant 0 : i32
    %c0_i32_1 = arith.constant 0 : i32
    return %c0_i32, %c0_i32_0 : i32, i32
  }
  func.func @transform_1(%arg0: i32) -> (i32, i32) {
    %c0_i32 = arith.constant 0 : i32
    %c0_i32_0 = arith.constant 0 : i32
    return %c0_i32, %arg0 : i32, i32
  }
  func.func @transform_2(%arg0: i32) -> (i32, i32) {
    %c0_i32 = arith.constant 0 : i32
    %c0_i32_0 = arith.constant 0 : i32
    %c0_i32_1 = arith.constant 0 : i32
    return %c0_i32, %c0_i32_0 : i32, i32
  }
  func.func @transform_3(%arg0: i32) -> (i32, i32) {
    %c0_i32 = arith.constant 0 : i32
    %c0_i32_0 = arith.constant 0 : i32
    return %c0_i32, %arg0 : i32, i32
  }
}

module attributes {stable_mosaic.version = 11 : i64} {
  func.func @_gru_seq_kernel(%arg0: i32, %arg1: i32, %arg2: memref<1x1x16x128xf32, #tpu.memory_space<vmem>>, %arg3: memref<1x16x128xf32, #tpu.memory_space<vmem>>, %arg4: memref<1x128xf32, #tpu.memory_space<vmem>>, %arg5: memref<48x144xbf16, #tpu.memory_space<vmem>>, %arg6: memref<48x1xf32, #tpu.memory_space<vmem>>, %arg7: memref<32x144xbf16, #tpu.memory_space<vmem>>, %arg8: memref<16x144xbf16, #tpu.memory_space<vmem>>, %arg9: memref<1x16x128xf32, #tpu.memory_space<vmem>>, %arg10: memref<16x128xf32, #tpu.memory_space<vmem>>, %arg11: memref<144x128xf32, #tpu.memory_space<vmem>>) attributes {dimension_semantics = [#tpu.dimension_semantics<parallel>, #tpu.dimension_semantics<arbitrary>], iteration_bounds = array<i64: 2, 1>, scalar_prefetch = 0 : i64, scratch_operands = 2 : i64, tpu.core_type = #tpu.core_type<tc>, window_params = [{transform_indices = @transform_0, window_bounds = array<i64: 1, 1, 16, 128>}, {transform_indices = @transform_1, window_bounds = array<i64: 1, 16, 128>}, {pipeline_mode = #tpu.pipeline_mode<synchronous>, transform_indices = @transform_2, window_bounds = array<i64: 1, 128>}, {pipeline_mode = #tpu.pipeline_mode<synchronous>, transform_indices = @transform_3, window_bounds = array<i64: 48, 144>}, {pipeline_mode = #tpu.pipeline_mode<synchronous>, transform_indices = @transform_4, window_bounds = array<i64: 48, 1>}, {pipeline_mode = #tpu.pipeline_mode<synchronous>, transform_indices = @transform_5, window_bounds = array<i64: 32, 144>}, {pipeline_mode = #tpu.pipeline_mode<synchronous>, transform_indices = @transform_6, window_bounds = array<i64: 16, 144>}, {transform_indices = @transform_7, window_bounds = array<i64: 1, 16, 128>}]} {
    %c0_i32 = arith.constant 0 : i32
    %0 = arith.cmpi eq, %arg1, %c0_i32 : i32
    %1 = arith.extui %0 : i1 to i32
    %c0_i32_0 = arith.constant 0 : i32
    %2 = arith.cmpi ne, %1, %c0_i32_0 : i32
    scf.if %2 {
      %c0_93 = arith.constant 0 : index
      %c0_94 = arith.constant 0 : index
      %c0_95 = arith.constant 0 : index
      %102 = vector.load %arg3[%c0_93, %c0_94, %c0_95] : memref<1x16x128xf32, #tpu.memory_space<vmem>>, vector<1x16x128xf32>
      %103 = vector.shape_cast %102 : vector<1x16x128xf32> to vector<16x128xf32>
      %c0_96 = arith.constant 0 : index
      %c0_97 = arith.constant 0 : index
      %104 = vector.load %arg10[%c0_96, %c0_97] : memref<16x128xf32, #tpu.memory_space<vmem>>, vector<16x128xf32>
      tpu.vector_store %arg10[%c0_96, %c0_97], %103 {strides = array<i32>} : memref<16x128xf32, #tpu.memory_space<vmem>>, vector<16x128xf32>,
    } else {
    }
    %c0 = arith.constant 0 : index
    %c0_1 = arith.constant 0 : index
    %c0_2 = arith.constant 0 : index
    %c0_3 = arith.constant 0 : index
    %3 = vector.load %arg2[%c0, %c0_1, %c0_2, %c0_3] : memref<1x1x16x128xf32, #tpu.memory_space<vmem>>, vector<1x1x16x128xf32>
    %4 = vector.shape_cast %3 : vector<1x1x16x128xf32> to vector<16x128xf32>
    %c11_i32 = arith.constant 11 : i32
    %5 = tpu.dynamic_rotate %4 by %c11_i32 dim 1 : vector<16x128xf32>, i32 -> vector<16x128xf32>
    %c0_4 = arith.constant 0 : index
    %c0_5 = arith.constant 0 : index
    %6 = vector.load %arg11[%c0_4, %c0_5] : memref<144x128xf32, #tpu.memory_space<vmem>>, vector<16x128xf32>
    tpu.vector_store %arg11[%c0_4, %c0_5], %5 {strides = array<i32>} : memref<144x128xf32, #tpu.memory_space<vmem>>, vector<16x128xf32>,
    %c10_i32 = arith.constant 10 : i32
    %7 = tpu.dynamic_rotate %4 by %c10_i32 dim 1 : vector<16x128xf32>, i32 -> vector<16x128xf32>
    %c16 = arith.constant 16 : index
    %c0_6 = arith.constant 0 : index
    %8 = vector.load %arg11[%c16, %c0_6] : memref<144x128xf32, #tpu.memory_space<vmem>>, vector<16x128xf32>
    tpu.vector_store %arg11[%c16, %c0_6], %7 {strides = array<i32>} : memref<144x128xf32, #tpu.memory_space<vmem>>, vector<16x128xf32>,
    %c9_i32 = arith.constant 9 : i32
    %9 = tpu.dynamic_rotate %4 by %c9_i32 dim 1 : vector<16x128xf32>, i32 -> vector<16x128xf32>
    %c32 = arith.constant 32 : index
    %c0_7 = arith.constant 0 : index
    %10 = vector.load %arg11[%c32, %c0_7] : memref<144x128xf32, #tpu.memory_space<vmem>>, vector<16x128xf32>
    tpu.vector_store %arg11[%c32, %c0_7], %9 {strides = array<i32>} : memref<144x128xf32, #tpu.memory_space<vmem>>, vector<16x128xf32>,
    %c1_i32 = arith.constant 1 : i32
    %11 = tpu.dynamic_rotate %4 by %c1_i32 dim 1 : vector<16x128xf32>, i32 -> vector<16x128xf32>
    %c48 = arith.constant 48 : index
    %c0_8 = arith.constant 0 : index
    %12 = vector.load %arg11[%c48, %c0_8] : memref<144x128xf32, #tpu.memory_space<vmem>>, vector<16x128xf32>
    tpu.vector_store %arg11[%c48, %c0_8], %11 {strides = array<i32>} : memref<144x128xf32, #tpu.memory_space<vmem>>, vector<16x128xf32>,
    %c64 = arith.constant 64 : index
    %c0_9 = arith.constant 0 : index
    %13 = vector.load %arg11[%c64, %c0_9] : memref<144x128xf32, #tpu.memory_space<vmem>>, vector<16x128xf32>
    tpu.vector_store %arg11[%c64, %c0_9], %4 {strides = array<i32>} : memref<144x128xf32, #tpu.memory_space<vmem>>, vector<16x128xf32>,
    %c127_i32 = arith.constant 127 : i32
    %14 = tpu.dynamic_rotate %4 by %c127_i32 dim 1 : vector<16x128xf32>, i32 -> vector<16x128xf32>
    %c80 = arith.constant 80 : index
    %c0_10 = arith.constant 0 : index
    %15 = vector.load %arg11[%c80, %c0_10] : memref<144x128xf32, #tpu.memory_space<vmem>>, vector<16x128xf32>
    tpu.vector_store %arg11[%c80, %c0_10], %14 {strides = array<i32>} : memref<144x128xf32, #tpu.memory_space<vmem>>, vector<16x128xf32>,
    %c119_i32 = arith.constant 119 : i32
    %16 = tpu.dynamic_rotate %4 by %c119_i32 dim 1 : vector<16x128xf32>, i32 -> vector<16x128xf32>
    %c96 = arith.constant 96 : index
    %c0_11 = arith.constant 0 : index
    %17 = vector.load %arg11[%c96, %c0_11] : memref<144x128xf32, #tpu.memory_space<vmem>>, vector<16x128xf32>
    tpu.vector_store %arg11[%c96, %c0_11], %16 {strides = array<i32>} : memref<144x128xf32, #tpu.memory_space<vmem>>, vector<16x128xf32>,
    %c118_i32 = arith.constant 118 : i32
    %18 = tpu.dynamic_rotate %4 by %c118_i32 dim 1 : vector<16x128xf32>, i32 -> vector<16x128xf32>
    %c112 = arith.constant 112 : index
    %c0_12 = arith.constant 0 : index
    %19 = vector.load %arg11[%c112, %c0_12] : memref<144x128xf32, #tpu.memory_space<vmem>>, vector<16x128xf32>
    tpu.vector_store %arg11[%c112, %c0_12], %18 {strides = array<i32>} : memref<144x128xf32, #tpu.memory_space<vmem>>, vector<16x128xf32>,
    %c117_i32 = arith.constant 117 : i32
    %20 = tpu.dynamic_rotate %4 by %c117_i32 dim 1 : vector<16x128xf32>, i32 -> vector<16x128xf32>
    %c128 = arith.constant 128 : index
    %c0_13 = arith.constant 0 : index
    %21 = vector.load %arg11[%c128, %c0_13] : memref<144x128xf32, #tpu.memory_space<vmem>>, vector<16x128xf32>
    tpu.vector_store %arg11[%c128, %c0_13], %20 {strides = array<i32>} : memref<144x128xf32, #tpu.memory_space<vmem>>, vector<16x128xf32>,
    %c0_14 = arith.constant 0 : index
    %c0_15 = arith.constant 0 : index
    %22 = vector.load %arg11[%c0_14, %c0_15] : memref<144x128xf32, #tpu.memory_space<vmem>>, vector<144x128xf32>
    %23 = arith.truncf %22 : vector<144x128xf32> to vector<144x128xbf16>
    %c0_16 = arith.constant 0 : index
    %c0_17 = arith.constant 0 : index
    %24 = vector.load %arg5[%c0_16, %c0_17] : memref<48x144xbf16, #tpu.memory_space<vmem>>, vector<48x144xbf16>
    %cst = arith.constant dense<0.000000e+00> : vector<48x128xf32>
    %25 = tpu.matmul %24, %23, %cst {dimension_numbers = #tpu.dot_dimension_numbers<[1], [0], [0], [1], [0, 0, 1, 1], [], []>} : vector<48x144xbf16>, vector<144x128xbf16>, vector<48x128xf32> -> vector<48x128xf32>
    %c0_18 = arith.constant 0 : index
    %c0_19 = arith.constant 0 : index
    %26 = vector.load %arg6[%c0_18, %c0_19] : memref<48x1xf32, #tpu.memory_space<vmem>>, vector<48x1xf32>
    %27 = vector.broadcast %26 : vector<48x1xf32> to vector<48x128xf32>
    %28 = arith.addf %25, %27 : vector<48x128xf32>
    %c0_20 = arith.constant 0 : index
    %c0_21 = arith.constant 0 : index
    %29 = vector.load %arg10[%c0_20, %c0_21] : memref<16x128xf32, #tpu.memory_space<vmem>>, vector<16x128xf32>
    %c11_i32_22 = arith.constant 11 : i32
    %30 = tpu.dynamic_rotate %29 by %c11_i32_22 dim 1 : vector<16x128xf32>, i32 -> vector<16x128xf32>
    %c0_23 = arith.constant 0 : index
    %c0_24 = arith.constant 0 : index
    %31 = vector.load %arg11[%c0_23, %c0_24] : memref<144x128xf32, #tpu.memory_space<vmem>>, vector<16x128xf32>
    tpu.vector_store %arg11[%c0_23, %c0_24], %30 {strides = array<i32>} : memref<144x128xf32, #tpu.memory_space<vmem>>, vector<16x128xf32>,
    %c10_i32_25 = arith.constant 10 : i32
    %32 = tpu.dynamic_rotate %29 by %c10_i32_25 dim 1 : vector<16x128xf32>, i32 -> vector<16x128xf32>
    %c16_26 = arith.constant 16 : index
    %c0_27 = arith.constant 0 : index
    %33 = vector.load %arg11[%c16_26, %c0_27] : memref<144x128xf32, #tpu.memory_space<vmem>>, vector<16x128xf32>
    tpu.vector_store %arg11[%c16_26, %c0_27], %32 {strides = array<i32>} : memref<144x128xf32, #tpu.memory_space<vmem>>, vector<16x128xf32>,
    %c9_i32_28 = arith.constant 9 : i32
    %34 = tpu.dynamic_rotate %29 by %c9_i32_28 dim 1 : vector<16x128xf32>, i32 -> vector<16x128xf32>
    %c32_29 = arith.constant 32 : index
    %c0_30 = arith.constant 0 : index
    %35 = vector.load %arg11[%c32_29, %c0_30] : memref<144x128xf32, #tpu.memory_space<vmem>>, vector<16x128xf32>
    tpu.vector_store %arg11[%c32_29, %c0_30], %34 {strides = array<i32>} : memref<144x128xf32, #tpu.memory_space<vmem>>, vector<16x128xf32>,
    %c1_i32_31 = arith.constant 1 : i32
    %36 = tpu.dynamic_rotate %29 by %c1_i32_31 dim 1 : vector<16x128xf32>, i32 -> vector<16x128xf32>
    %c48_32 = arith.constant 48 : index
    %c0_33 = arith.constant 0 : index
    %37 = vector.load %arg11[%c48_32, %c0_33] : memref<144x128xf32, #tpu.memory_space<vmem>>, vector<16x128xf32>
    tpu.vector_store %arg11[%c48_32, %c0_33], %36 {strides = array<i32>} : memref<144x128xf32, #tpu.memory_space<vmem>>, vector<16x128xf32>,
    %c64_34 = arith.constant 64 : index
    %c0_35 = arith.constant 0 : index
    %38 = vector.load %arg11[%c64_34, %c0_35] : memref<144x128xf32, #tpu.memory_space<vmem>>, vector<16x128xf32>
    tpu.vector_store %arg11[%c64_34, %c0_35], %29 {strides = array<i32>} : memref<144x128xf32, #tpu.memory_space<vmem>>, vector<16x128xf32>,
    %c127_i32_36 = arith.constant 127 : i32
    %39 = tpu.dynamic_rotate %29 by %c127_i32_36 dim 1 : vector<16x128xf32>, i32 -> vector<16x128xf32>
    %c80_37 = arith.constant 80 : index
    %c0_38 = arith.constant 0 : index
    %40 = vector.load %arg11[%c80_37, %c0_38] : memref<144x128xf32, #tpu.memory_space<vmem>>, vector<16x128xf32>
    tpu.vector_store %arg11[%c80_37, %c0_38], %39 {strides = array<i32>} : memref<144x128xf32, #tpu.memory_space<vmem>>, vector<16x128xf32>,
    %c119_i32_39 = arith.constant 119 : i32
    %41 = tpu.dynamic_rotate %29 by %c119_i32_39 dim 1 : vector<16x128xf32>, i32 -> vector<16x128xf32>
    %c96_40 = arith.constant 96 : index
    %c0_41 = arith.constant 0 : index
    %42 = vector.load %arg11[%c96_40, %c0_41] : memref<144x128xf32, #tpu.memory_space<vmem>>, vector<16x128xf32>
    tpu.vector_store %arg11[%c96_40, %c0_41], %41 {strides = array<i32>} : memref<144x128xf32, #tpu.memory_space<vmem>>, vector<16x128xf32>,
    %c118_i32_42 = arith.constant 118 : i32
    %43 = tpu.dynamic_rotate %29 by %c118_i32_42 dim 1 : vector<16x128xf32>, i32 -> vector<16x128xf32>
    %c112_43 = arith.constant 112 : index
    %c0_44 = arith.constant 0 : index
    %44 = vector.load %arg11[%c112_43, %c0_44] : memref<144x128xf32, #tpu.memory_space<vmem>>, vector<16x128xf32>
    tpu.vector_store %arg11[%c112_43, %c0_44], %43 {strides = array<i32>} : memref<144x128xf32, #tpu.memory_space<vmem>>, vector<16x128xf32>,
    %c117_i32_45 = arith.constant 117 : i32
    %45 = tpu.dynamic_rotate %29 by %c117_i32_45 dim 1 : vector<16x128xf32>, i32 -> vector<16x128xf32>
    %c128_46 = arith.constant 128 : index
    %c0_47 = arith.constant 0 : index
    %46 = vector.load %arg11[%c128_46, %c0_47] : memref<144x128xf32, #tpu.memory_space<vmem>>, vector<16x128xf32>
    tpu.vector_store %arg11[%c128_46, %c0_47], %45 {strides = array<i32>} : memref<144x128xf32, #tpu.memory_space<vmem>>, vector<16x128xf32>,
    %c0_48 = arith.constant 0 : index
    %c0_49 = arith.constant 0 : index
    %47 = vector.load %arg11[%c0_48, %c0_49] : memref<144x128xf32, #tpu.memory_space<vmem>>, vector<144x128xf32>
    %48 = arith.truncf %47 : vector<144x128xf32> to vector<144x128xbf16>
    %49 = vector.extract_strided_slice %28 {offsets = [0, 0], sizes = [32, 128], strides = [1, 1]} : vector<48x128xf32> to vector<32x128xf32>
    %c0_50 = arith.constant 0 : index
    %c0_51 = arith.constant 0 : index
    %50 = vector.load %arg7[%c0_50, %c0_51] : memref<32x144xbf16, #tpu.memory_space<vmem>>, vector<32x144xbf16>
    %cst_52 = arith.constant dense<0.000000e+00> : vector<32x128xf32>
    %51 = tpu.matmul %50, %48, %cst_52 {dimension_numbers = #tpu.dot_dimension_numbers<[1], [0], [0], [1], [0, 0, 1, 1], [], []>} : vector<32x144xbf16>, vector<144x128xbf16>, vector<32x128xf32> -> vector<32x128xf32>
    %52 = arith.addf %49, %51 : vector<32x128xf32>
    %53 = vector.extract_strided_slice %52 {offsets = [0, 0], sizes = [16, 128], strides = [1, 1]} : vector<32x128xf32> to vector<16x128xf32>
    %54 = arith.negf %53 : vector<16x128xf32>
    %55 = math.exp %54 : vector<16x128xf32>
    %cst_53 = arith.constant 1.000000e+00 : f32
    %56 = vector.broadcast %cst_53 : f32 to vector<16x128xf32>
    %57 = arith.addf %56, %55 : vector<16x128xf32>
    %58 = arith.divf %56, %57 : vector<16x128xf32>
    %59 = vector.extract_strided_slice %52 {offsets = [16, 0], sizes = [16, 128], strides = [1, 1]} : vector<32x128xf32> to vector<16x128xf32>
    %60 = arith.negf %59 : vector<16x128xf32>
    %61 = math.exp %60 : vector<16x128xf32>
    %cst_54 = arith.constant 1.000000e+00 : f32
    %62 = vector.broadcast %cst_54 : f32 to vector<16x128xf32>
    %63 = arith.addf %62, %61 : vector<16x128xf32>
    %64 = arith.divf %62, %63 : vector<16x128xf32>
    %65 = arith.mulf %64, %29 : vector<16x128xf32>
    %c11_i32_55 = arith.constant 11 : i32
    %66 = tpu.dynamic_rotate %65 by %c11_i32_55 dim 1 : vector<16x128xf32>, i32 -> vector<16x128xf32>
    %c0_56 = arith.constant 0 : index
    %c0_57 = arith.constant 0 : index
    %67 = vector.load %arg11[%c0_56, %c0_57] : memref<144x128xf32, #tpu.memory_space<vmem>>, vector<16x128xf32>
    tpu.vector_store %arg11[%c0_56, %c0_57], %66 {strides = array<i32>} : memref<144x128xf32, #tpu.memory_space<vmem>>, vector<16x128xf32>,
    %c10_i32_58 = arith.constant 10 : i32
    %68 = tpu.dynamic_rotate %65 by %c10_i32_58 dim 1 : vector<16x128xf32>, i32 -> vector<16x128xf32>
    %c16_59 = arith.constant 16 : index
    %c0_60 = arith.constant 0 : index
    %69 = vector.load %arg11[%c16_59, %c0_60] : memref<144x128xf32, #tpu.memory_space<vmem>>, vector<16x128xf32>
    tpu.vector_store %arg11[%c16_59, %c0_60], %68 {strides = array<i32>} : memref<144x128xf32, #tpu.memory_space<vmem>>, vector<16x128xf32>,
    %c9_i32_61 = arith.constant 9 : i32
    %70 = tpu.dynamic_rotate %65 by %c9_i32_61 dim 1 : vector<16x128xf32>, i32 -> vector<16x128xf32>
    %c32_62 = arith.constant 32 : index
    %c0_63 = arith.constant 0 : index
    %71 = vector.load %arg11[%c32_62, %c0_63] : memref<144x128xf32, #tpu.memory_space<vmem>>, vector<16x128xf32>
    tpu.vector_store %arg11[%c32_62, %c0_63], %70 {strides = array<i32>} : memref<144x128xf32, #tpu.memory_space<vmem>>, vector<16x128xf32>,
    %c1_i32_64 = arith.constant 1 : i32
    %72 = tpu.dynamic_rotate %65 by %c1_i32_64 dim 1 : vector<16x128xf32>, i32 -> vector<16x128xf32>
    %c48_65 = arith.constant 48 : index
    %c0_66 = arith.constant 0 : index
    %73 = vector.load %arg11[%c48_65, %c0_66] : memref<144x128xf32, #tpu.memory_space<vmem>>, vector<16x128xf32>
    tpu.vector_store %arg11[%c48_65, %c0_66], %72 {strides = array<i32>} : memref<144x128xf32, #tpu.memory_space<vmem>>, vector<16x128xf32>,
    %c64_67 = arith.constant 64 : index
    %c0_68 = arith.constant 0 : index
    %74 = vector.load %arg11[%c64_67, %c0_68] : memref<144x128xf32, #tpu.memory_space<vmem>>, vector<16x128xf32>
    tpu.vector_store %arg11[%c64_67, %c0_68], %65 {strides = array<i32>} : memref<144x128xf32, #tpu.memory_space<vmem>>, vector<16x128xf32>,
    %c127_i32_69 = arith.constant 127 : i32
    %75 = tpu.dynamic_rotate %65 by %c127_i32_69 dim 1 : vector<16x128xf32>, i32 -> vector<16x128xf32>
    %c80_70 = arith.constant 80 : index
    %c0_71 = arith.constant 0 : index
    %76 = vector.load %arg11[%c80_70, %c0_71] : memref<144x128xf32, #tpu.memory_space<vmem>>, vector<16x128xf32>
    tpu.vector_store %arg11[%c80_70, %c0_71], %75 {strides = array<i32>} : memref<144x128xf32, #tpu.memory_space<vmem>>, vector<16x128xf32>,
    %c119_i32_72 = arith.constant 119 : i32
    %77 = tpu.dynamic_rotate %65 by %c119_i32_72 dim 1 : vector<16x128xf32>, i32 -> vector<16x128xf32>
    %c96_73 = arith.constant 96 : index
    %c0_74 = arith.constant 0 : index
    %78 = vector.load %arg11[%c96_73, %c0_74] : memref<144x128xf32, #tpu.memory_space<vmem>>, vector<16x128xf32>
    tpu.vector_store %arg11[%c96_73, %c0_74], %77 {strides = array<i32>} : memref<144x128xf32, #tpu.memory_space<vmem>>, vector<16x128xf32>,
    %c118_i32_75 = arith.constant 118 : i32
    %79 = tpu.dynamic_rotate %65 by %c118_i32_75 dim 1 : vector<16x128xf32>, i32 -> vector<16x128xf32>
    %c112_76 = arith.constant 112 : index
    %c0_77 = arith.constant 0 : index
    %80 = vector.load %arg11[%c112_76, %c0_77] : memref<144x128xf32, #tpu.memory_space<vmem>>, vector<16x128xf32>
    tpu.vector_store %arg11[%c112_76, %c0_77], %79 {strides = array<i32>} : memref<144x128xf32, #tpu.memory_space<vmem>>, vector<16x128xf32>,
    %c117_i32_78 = arith.constant 117 : i32
    %81 = tpu.dynamic_rotate %65 by %c117_i32_78 dim 1 : vector<16x128xf32>, i32 -> vector<16x128xf32>
    %c128_79 = arith.constant 128 : index
    %c0_80 = arith.constant 0 : index
    %82 = vector.load %arg11[%c128_79, %c0_80] : memref<144x128xf32, #tpu.memory_space<vmem>>, vector<16x128xf32>
    tpu.vector_store %arg11[%c128_79, %c0_80], %81 {strides = array<i32>} : memref<144x128xf32, #tpu.memory_space<vmem>>, vector<16x128xf32>,
    %c0_81 = arith.constant 0 : index
    %c0_82 = arith.constant 0 : index
    %83 = vector.load %arg11[%c0_81, %c0_82] : memref<144x128xf32, #tpu.memory_space<vmem>>, vector<144x128xf32>
    %84 = arith.truncf %83 : vector<144x128xf32> to vector<144x128xbf16>
    %85 = vector.extract_strided_slice %28 {offsets = [32, 0], sizes = [16, 128], strides = [1, 1]} : vector<48x128xf32> to vector<16x128xf32>
    %c0_83 = arith.constant 0 : index
    %c0_84 = arith.constant 0 : index
    %86 = vector.load %arg8[%c0_83, %c0_84] : memref<16x144xbf16, #tpu.memory_space<vmem>>, vector<16x144xbf16>
    %cst_85 = arith.constant dense<0.000000e+00> : vector<16x128xf32>
    %87 = tpu.matmul %86, %84, %cst_85 {dimension_numbers = #tpu.dot_dimension_numbers<[1], [0], [0], [1], [0, 0, 1, 1], [], []>} : vector<16x144xbf16>, vector<144x128xbf16>, vector<16x128xf32> -> vector<16x128xf32>
    %88 = arith.addf %85, %87 : vector<16x128xf32>
    %89 = math.tanh %88 : vector<16x128xf32>
    %cst_86 = arith.constant 1.000000e+00 : f32
    %90 = vector.broadcast %cst_86 : f32 to vector<16x128xf32>
    %91 = arith.subf %90, %58 : vector<16x128xf32>
    %92 = arith.mulf %91, %29 : vector<16x128xf32>
    %93 = arith.mulf %58, %89 : vector<16x128xf32>
    %94 = arith.addf %92, %93 : vector<16x128xf32>
    %c0_87 = arith.constant 0 : index
    %c0_88 = arith.constant 0 : index
    %95 = vector.load %arg4[%c0_87, %c0_88] : memref<1x128xf32, #tpu.memory_space<vmem>>, vector<1x128xf32>
    %96 = vector.broadcast %95 : vector<1x128xf32> to vector<16x128xf32>
    %97 = arith.mulf %94, %96 : vector<16x128xf32>
    %c0_89 = arith.constant 0 : index
    %c0_90 = arith.constant 0 : index
    %98 = vector.load %arg10[%c0_89, %c0_90] : memref<16x128xf32, #tpu.memory_space<vmem>>, vector<16x128xf32>
    tpu.vector_store %arg10[%c0_89, %c0_90], %97 {strides = array<i32>} : memref<16x128xf32, #tpu.memory_space<vmem>>, vector<16x128xf32>,
    %c0_i32_91 = arith.constant 0 : i32
    %99 = arith.cmpi eq, %arg1, %c0_i32_91 : i32
    %100 = arith.extui %99 : i1 to i32
    %c0_i32_92 = arith.constant 0 : i32
    %101 = arith.cmpi ne, %100, %c0_i32_92 : i32
    scf.if %101 {
      %c0_93 = arith.constant 0 : index
      %c0_94 = arith.constant 0 : index
      %c0_95 = arith.constant 0 : index
      %102 = vector.load %arg9[%c0_93, %c0_94, %c0_95] : memref<1x16x128xf32, #tpu.memory_space<vmem>>, vector<1x16x128xf32>
      %103 = vector.shape_cast %102 : vector<1x16x128xf32> to vector<16x128xf32>
      %104 = vector.shape_cast %97 : vector<16x128xf32> to vector<1x16x128xf32>
      tpu.vector_store %arg9[%c0_93, %c0_94, %c0_95], %104 {strides = array<i32>} : memref<1x16x128xf32, #tpu.memory_space<vmem>>, vector<1x16x128xf32>,
    } else {
    }
    return
  }
  func.func @transform_0(%arg0: i32, %arg1: i32) -> (i32, i32, i32, i32) {
    %c0_i32 = arith.constant 0 : i32
    %c0_i32_0 = arith.constant 0 : i32
    %c0_i32_1 = arith.constant 0 : i32
    return %arg1, %arg0, %c0_i32, %c0_i32_0 : i32, i32, i32, i32
  }
  func.func @transform_1(%arg0: i32, %arg1: i32) -> (i32, i32, i32) {
    %c0_i32 = arith.constant 0 : i32
    %c0_i32_0 = arith.constant 0 : i32
    %c0_i32_1 = arith.constant 0 : i32
    return %arg0, %c0_i32, %c0_i32_0 : i32, i32, i32
  }
  func.func @transform_2(%arg0: i32, %arg1: i32) -> (i32, i32) {
    %c0_i32 = arith.constant 0 : i32
    %c0_i32_0 = arith.constant 0 : i32
    %c0_i32_1 = arith.constant 0 : i32
    return %c0_i32, %c0_i32_0 : i32, i32
  }
  func.func @transform_3(%arg0: i32, %arg1: i32) -> (i32, i32) {
    %c0_i32 = arith.constant 0 : i32
    %c0_i32_0 = arith.constant 0 : i32
    %c0_i32_1 = arith.constant 0 : i32
    return %c0_i32, %c0_i32_0 : i32, i32
  }
  func.func @transform_4(%arg0: i32, %arg1: i32) -> (i32, i32) {
    %c0_i32 = arith.constant 0 : i32
    %c0_i32_0 = arith.constant 0 : i32
    %c0_i32_1 = arith.constant 0 : i32
    return %c0_i32, %c0_i32_0 : i32, i32
  }
  func.func @transform_5(%arg0: i32, %arg1: i32) -> (i32, i32) {
    %c0_i32 = arith.constant 0 : i32
    %c0_i32_0 = arith.constant 0 : i32
    %c0_i32_1 = arith.constant 0 : i32
    return %c0_i32, %c0_i32_0 : i32, i32
  }
  func.func @transform_6(%arg0: i32, %arg1: i32) -> (i32, i32) {
    %c0_i32 = arith.constant 0 : i32
    %c0_i32_0 = arith.constant 0 : i32
    %c0_i32_1 = arith.constant 0 : i32
    return %c0_i32, %c0_i32_0 : i32, i32
  }
  func.func @transform_7(%arg0: i32, %arg1: i32) -> (i32, i32, i32) {
    %c0_i32 = arith.constant 0 : i32
    %c0_i32_0 = arith.constant 0 : i32
    %c0_i32_1 = arith.constant 0 : i32
    return %arg0, %c0_i32, %c0_i32_0 : i32, i32, i32
  }
}

module attributes {stable_mosaic.version = 11 : i64} {
  func.func @_conv_mm_kernel(%arg0: i32, %arg1: memref<16x144xbf16, #tpu.memory_space<vmem>>, %arg2: memref<144x32xbf16, #tpu.memory_space<vmem>>, %arg3: memref<16x1xf32, #tpu.memory_space<vmem>>, %arg4: memref<16x32xf32, #tpu.memory_space<vmem>>) attributes {dimension_semantics = [#tpu.dimension_semantics<parallel>], iteration_bounds = array<i64: 1>, scalar_prefetch = 0 : i64, scratch_operands = 0 : i64, tpu.core_type = #tpu.core_type<tc>, window_params = [{pipeline_mode = #tpu.pipeline_mode<synchronous>, transform_indices = @transform_0, window_bounds = array<i64: 16, 144>}, {transform_indices = @transform_1, window_bounds = array<i64: 144, 32>}, {pipeline_mode = #tpu.pipeline_mode<synchronous>, transform_indices = @transform_2, window_bounds = array<i64: 16, 1>}, {transform_indices = @transform_3, window_bounds = array<i64: 16, 32>}]} {
    %c0 = arith.constant 0 : index
    %c0_0 = arith.constant 0 : index
    %0 = vector.load %arg1[%c0, %c0_0] : memref<16x144xbf16, #tpu.memory_space<vmem>>, vector<16x144xbf16>
    %c0_1 = arith.constant 0 : index
    %c0_2 = arith.constant 0 : index
    %1 = vector.load %arg2[%c0_1, %c0_2] : memref<144x32xbf16, #tpu.memory_space<vmem>>, vector<144x32xbf16>
    %cst = arith.constant dense<0.000000e+00> : vector<16x32xf32>
    %2 = tpu.matmul %0, %1, %cst {dimension_numbers = #tpu.dot_dimension_numbers<[1], [0], [0], [1], [0, 0, 1, 1], [], []>} : vector<16x144xbf16>, vector<144x32xbf16>, vector<16x32xf32> -> vector<16x32xf32>
    %c0_3 = arith.constant 0 : index
    %c0_4 = arith.constant 0 : index
    %3 = vector.load %arg3[%c0_3, %c0_4] : memref<16x1xf32, #tpu.memory_space<vmem>>, vector<16x1xf32>
    %4 = vector.broadcast %3 : vector<16x1xf32> to vector<16x32xf32>
    %5 = arith.addf %2, %4 : vector<16x32xf32>
    %cst_5 = arith.constant 0.000000e+00 : f32
    %6 = vector.broadcast %cst_5 : f32 to vector<16x32xf32>
    %7 = arith.cmpf oge, %5, %6 : vector<16x32xf32>
    %cst_6 = arith.constant 2.000000e-01 : f32
    %8 = vector.broadcast %cst_6 : f32 to vector<16x32xf32>
    %9 = arith.mulf %8, %5 : vector<16x32xf32>
    %10 = arith.select %7, %5, %9 : vector<16x32xi1>, vector<16x32xf32>
    %c0_7 = arith.constant 0 : index
    %c0_8 = arith.constant 0 : index
    %11 = vector.load %arg4[%c0_7, %c0_8] : memref<16x32xf32, #tpu.memory_space<vmem>>, vector<16x32xf32>
    tpu.vector_store %arg4[%c0_7, %c0_8], %10 {strides = array<i32>} : memref<16x32xf32, #tpu.memory_space<vmem>>, vector<16x32xf32>,
    return
  }
  func.func @transform_0(%arg0: i32) -> (i32, i32) {
    %c0_i32 = arith.constant 0 : i32
    %c0_i32_0 = arith.constant 0 : i32
    %c0_i32_1 = arith.constant 0 : i32
    return %c0_i32, %c0_i32_0 : i32, i32
  }
  func.func @transform_1(%arg0: i32) -> (i32, i32) {
    %c0_i32 = arith.constant 0 : i32
    %c0_i32_0 = arith.constant 0 : i32
    return %c0_i32, %arg0 : i32, i32
  }
  func.func @transform_2(%arg0: i32) -> (i32, i32) {
    %c0_i32 = arith.constant 0 : i32
    %c0_i32_0 = arith.constant 0 : i32
    %c0_i32_1 = arith.constant 0 : i32
    return %c0_i32, %c0_i32_0 : i32, i32
  }
  func.func @transform_3(%arg0: i32) -> (i32, i32) {
    %c0_i32 = arith.constant 0 : i32
    %c0_i32_0 = arith.constant 0 : i32
    return %c0_i32, %arg0 : i32, i32
  }
}

module attributes {stable_mosaic.version = 11 : i64} {
  func.func @_gru_seq_kernel(%arg0: i32, %arg1: i32, %arg2: memref<1x1x16x128xf32, #tpu.memory_space<vmem>>, %arg3: memref<1x16x128xf32, #tpu.memory_space<vmem>>, %arg4: memref<1x128xf32, #tpu.memory_space<vmem>>, %arg5: memref<48x144xbf16, #tpu.memory_space<vmem>>, %arg6: memref<48x1xf32, #tpu.memory_space<vmem>>, %arg7: memref<32x144xbf16, #tpu.memory_space<vmem>>, %arg8: memref<16x144xbf16, #tpu.memory_space<vmem>>, %arg9: memref<1x16x128xf32, #tpu.memory_space<vmem>>, %arg10: memref<16x128xf32, #tpu.memory_space<vmem>>, %arg11: memref<144x128xf32, #tpu.memory_space<vmem>>) attributes {dimension_semantics = [#tpu.dimension_semantics<parallel>, #tpu.dimension_semantics<arbitrary>], iteration_bounds = array<i64: 2, 1>, scalar_prefetch = 0 : i64, scratch_operands = 2 : i64, tpu.core_type = #tpu.core_type<tc>, window_params = [{transform_indices = @transform_0, window_bounds = array<i64: 1, 1, 16, 128>}, {transform_indices = @transform_1, window_bounds = array<i64: 1, 16, 128>}, {pipeline_mode = #tpu.pipeline_mode<synchronous>, transform_indices = @transform_2, window_bounds = array<i64: 1, 128>}, {pipeline_mode = #tpu.pipeline_mode<synchronous>, transform_indices = @transform_3, window_bounds = array<i64: 48, 144>}, {pipeline_mode = #tpu.pipeline_mode<synchronous>, transform_indices = @transform_4, window_bounds = array<i64: 48, 1>}, {pipeline_mode = #tpu.pipeline_mode<synchronous>, transform_indices = @transform_5, window_bounds = array<i64: 32, 144>}, {pipeline_mode = #tpu.pipeline_mode<synchronous>, transform_indices = @transform_6, window_bounds = array<i64: 16, 144>}, {transform_indices = @transform_7, window_bounds = array<i64: 1, 16, 128>}]} {
    %c0_i32 = arith.constant 0 : i32
    %0 = arith.cmpi eq, %arg1, %c0_i32 : i32
    %1 = arith.extui %0 : i1 to i32
    %c0_i32_0 = arith.constant 0 : i32
    %2 = arith.cmpi ne, %1, %c0_i32_0 : i32
    scf.if %2 {
      %c0_93 = arith.constant 0 : index
      %c0_94 = arith.constant 0 : index
      %c0_95 = arith.constant 0 : index
      %102 = vector.load %arg3[%c0_93, %c0_94, %c0_95] : memref<1x16x128xf32, #tpu.memory_space<vmem>>, vector<1x16x128xf32>
      %103 = vector.shape_cast %102 : vector<1x16x128xf32> to vector<16x128xf32>
      %c0_96 = arith.constant 0 : index
      %c0_97 = arith.constant 0 : index
      %104 = vector.load %arg10[%c0_96, %c0_97] : memref<16x128xf32, #tpu.memory_space<vmem>>, vector<16x128xf32>
      tpu.vector_store %arg10[%c0_96, %c0_97], %103 {strides = array<i32>} : memref<16x128xf32, #tpu.memory_space<vmem>>, vector<16x128xf32>,
    } else {
    }
    %c0 = arith.constant 0 : index
    %c0_1 = arith.constant 0 : index
    %c0_2 = arith.constant 0 : index
    %c0_3 = arith.constant 0 : index
    %3 = vector.load %arg2[%c0, %c0_1, %c0_2, %c0_3] : memref<1x1x16x128xf32, #tpu.memory_space<vmem>>, vector<1x1x16x128xf32>
    %4 = vector.shape_cast %3 : vector<1x1x16x128xf32> to vector<16x128xf32>
    %c7_i32 = arith.constant 7 : i32
    %5 = tpu.dynamic_rotate %4 by %c7_i32 dim 1 : vector<16x128xf32>, i32 -> vector<16x128xf32>
    %c0_4 = arith.constant 0 : index
    %c0_5 = arith.constant 0 : index
    %6 = vector.load %arg11[%c0_4, %c0_5] : memref<144x128xf32, #tpu.memory_space<vmem>>, vector<16x128xf32>
    tpu.vector_store %arg11[%c0_4, %c0_5], %5 {strides = array<i32>} : memref<144x128xf32, #tpu.memory_space<vmem>>, vector<16x128xf32>,
    %c6_i32 = arith.constant 6 : i32
    %7 = tpu.dynamic_rotate %4 by %c6_i32 dim 1 : vector<16x128xf32>, i32 -> vector<16x128xf32>
    %c16 = arith.constant 16 : index
    %c0_6 = arith.constant 0 : index
    %8 = vector.load %arg11[%c16, %c0_6] : memref<144x128xf32, #tpu.memory_space<vmem>>, vector<16x128xf32>
    tpu.vector_store %arg11[%c16, %c0_6], %7 {strides = array<i32>} : memref<144x128xf32, #tpu.memory_space<vmem>>, vector<16x128xf32>,
    %c5_i32 = arith.constant 5 : i32
    %9 = tpu.dynamic_rotate %4 by %c5_i32 dim 1 : vector<16x128xf32>, i32 -> vector<16x128xf32>
    %c32 = arith.constant 32 : index
    %c0_7 = arith.constant 0 : index
    %10 = vector.load %arg11[%c32, %c0_7] : memref<144x128xf32, #tpu.memory_space<vmem>>, vector<16x128xf32>
    tpu.vector_store %arg11[%c32, %c0_7], %9 {strides = array<i32>} : memref<144x128xf32, #tpu.memory_space<vmem>>, vector<16x128xf32>,
    %c1_i32 = arith.constant 1 : i32
    %11 = tpu.dynamic_rotate %4 by %c1_i32 dim 1 : vector<16x128xf32>, i32 -> vector<16x128xf32>
    %c48 = arith.constant 48 : index
    %c0_8 = arith.constant 0 : index
    %12 = vector.load %arg11[%c48, %c0_8] : memref<144x128xf32, #tpu.memory_space<vmem>>, vector<16x128xf32>
    tpu.vector_store %arg11[%c48, %c0_8], %11 {strides = array<i32>} : memref<144x128xf32, #tpu.memory_space<vmem>>, vector<16x128xf32>,
    %c64 = arith.constant 64 : index
    %c0_9 = arith.constant 0 : index
    %13 = vector.load %arg11[%c64, %c0_9] : memref<144x128xf32, #tpu.memory_space<vmem>>, vector<16x128xf32>
    tpu.vector_store %arg11[%c64, %c0_9], %4 {strides = array<i32>} : memref<144x128xf32, #tpu.memory_space<vmem>>, vector<16x128xf32>,
    %c127_i32 = arith.constant 127 : i32
    %14 = tpu.dynamic_rotate %4 by %c127_i32 dim 1 : vector<16x128xf32>, i32 -> vector<16x128xf32>
    %c80 = arith.constant 80 : index
    %c0_10 = arith.constant 0 : index
    %15 = vector.load %arg11[%c80, %c0_10] : memref<144x128xf32, #tpu.memory_space<vmem>>, vector<16x128xf32>
    tpu.vector_store %arg11[%c80, %c0_10], %14 {strides = array<i32>} : memref<144x128xf32, #tpu.memory_space<vmem>>, vector<16x128xf32>,
    %c123_i32 = arith.constant 123 : i32
    %16 = tpu.dynamic_rotate %4 by %c123_i32 dim 1 : vector<16x128xf32>, i32 -> vector<16x128xf32>
    %c96 = arith.constant 96 : index
    %c0_11 = arith.constant 0 : index
    %17 = vector.load %arg11[%c96, %c0_11] : memref<144x128xf32, #tpu.memory_space<vmem>>, vector<16x128xf32>
    tpu.vector_store %arg11[%c96, %c0_11], %16 {strides = array<i32>} : memref<144x128xf32, #tpu.memory_space<vmem>>, vector<16x128xf32>,
    %c122_i32 = arith.constant 122 : i32
    %18 = tpu.dynamic_rotate %4 by %c122_i32 dim 1 : vector<16x128xf32>, i32 -> vector<16x128xf32>
    %c112 = arith.constant 112 : index
    %c0_12 = arith.constant 0 : index
    %19 = vector.load %arg11[%c112, %c0_12] : memref<144x128xf32, #tpu.memory_space<vmem>>, vector<16x128xf32>
    tpu.vector_store %arg11[%c112, %c0_12], %18 {strides = array<i32>} : memref<144x128xf32, #tpu.memory_space<vmem>>, vector<16x128xf32>,
    %c121_i32 = arith.constant 121 : i32
    %20 = tpu.dynamic_rotate %4 by %c121_i32 dim 1 : vector<16x128xf32>, i32 -> vector<16x128xf32>
    %c128 = arith.constant 128 : index
    %c0_13 = arith.constant 0 : index
    %21 = vector.load %arg11[%c128, %c0_13] : memref<144x128xf32, #tpu.memory_space<vmem>>, vector<16x128xf32>
    tpu.vector_store %arg11[%c128, %c0_13], %20 {strides = array<i32>} : memref<144x128xf32, #tpu.memory_space<vmem>>, vector<16x128xf32>,
    %c0_14 = arith.constant 0 : index
    %c0_15 = arith.constant 0 : index
    %22 = vector.load %arg11[%c0_14, %c0_15] : memref<144x128xf32, #tpu.memory_space<vmem>>, vector<144x128xf32>
    %23 = arith.truncf %22 : vector<144x128xf32> to vector<144x128xbf16>
    %c0_16 = arith.constant 0 : index
    %c0_17 = arith.constant 0 : index
    %24 = vector.load %arg5[%c0_16, %c0_17] : memref<48x144xbf16, #tpu.memory_space<vmem>>, vector<48x144xbf16>
    %cst = arith.constant dense<0.000000e+00> : vector<48x128xf32>
    %25 = tpu.matmul %24, %23, %cst {dimension_numbers = #tpu.dot_dimension_numbers<[1], [0], [0], [1], [0, 0, 1, 1], [], []>} : vector<48x144xbf16>, vector<144x128xbf16>, vector<48x128xf32> -> vector<48x128xf32>
    %c0_18 = arith.constant 0 : index
    %c0_19 = arith.constant 0 : index
    %26 = vector.load %arg6[%c0_18, %c0_19] : memref<48x1xf32, #tpu.memory_space<vmem>>, vector<48x1xf32>
    %27 = vector.broadcast %26 : vector<48x1xf32> to vector<48x128xf32>
    %28 = arith.addf %25, %27 : vector<48x128xf32>
    %c0_20 = arith.constant 0 : index
    %c0_21 = arith.constant 0 : index
    %29 = vector.load %arg10[%c0_20, %c0_21] : memref<16x128xf32, #tpu.memory_space<vmem>>, vector<16x128xf32>
    %c7_i32_22 = arith.constant 7 : i32
    %30 = tpu.dynamic_rotate %29 by %c7_i32_22 dim 1 : vector<16x128xf32>, i32 -> vector<16x128xf32>
    %c0_23 = arith.constant 0 : index
    %c0_24 = arith.constant 0 : index
    %31 = vector.load %arg11[%c0_23, %c0_24] : memref<144x128xf32, #tpu.memory_space<vmem>>, vector<16x128xf32>
    tpu.vector_store %arg11[%c0_23, %c0_24], %30 {strides = array<i32>} : memref<144x128xf32, #tpu.memory_space<vmem>>, vector<16x128xf32>,
    %c6_i32_25 = arith.constant 6 : i32
    %32 = tpu.dynamic_rotate %29 by %c6_i32_25 dim 1 : vector<16x128xf32>, i32 -> vector<16x128xf32>
    %c16_26 = arith.constant 16 : index
    %c0_27 = arith.constant 0 : index
    %33 = vector.load %arg11[%c16_26, %c0_27] : memref<144x128xf32, #tpu.memory_space<vmem>>, vector<16x128xf32>
    tpu.vector_store %arg11[%c16_26, %c0_27], %32 {strides = array<i32>} : memref<144x128xf32, #tpu.memory_space<vmem>>, vector<16x128xf32>,
    %c5_i32_28 = arith.constant 5 : i32
    %34 = tpu.dynamic_rotate %29 by %c5_i32_28 dim 1 : vector<16x128xf32>, i32 -> vector<16x128xf32>
    %c32_29 = arith.constant 32 : index
    %c0_30 = arith.constant 0 : index
    %35 = vector.load %arg11[%c32_29, %c0_30] : memref<144x128xf32, #tpu.memory_space<vmem>>, vector<16x128xf32>
    tpu.vector_store %arg11[%c32_29, %c0_30], %34 {strides = array<i32>} : memref<144x128xf32, #tpu.memory_space<vmem>>, vector<16x128xf32>,
    %c1_i32_31 = arith.constant 1 : i32
    %36 = tpu.dynamic_rotate %29 by %c1_i32_31 dim 1 : vector<16x128xf32>, i32 -> vector<16x128xf32>
    %c48_32 = arith.constant 48 : index
    %c0_33 = arith.constant 0 : index
    %37 = vector.load %arg11[%c48_32, %c0_33] : memref<144x128xf32, #tpu.memory_space<vmem>>, vector<16x128xf32>
    tpu.vector_store %arg11[%c48_32, %c0_33], %36 {strides = array<i32>} : memref<144x128xf32, #tpu.memory_space<vmem>>, vector<16x128xf32>,
    %c64_34 = arith.constant 64 : index
    %c0_35 = arith.constant 0 : index
    %38 = vector.load %arg11[%c64_34, %c0_35] : memref<144x128xf32, #tpu.memory_space<vmem>>, vector<16x128xf32>
    tpu.vector_store %arg11[%c64_34, %c0_35], %29 {strides = array<i32>} : memref<144x128xf32, #tpu.memory_space<vmem>>, vector<16x128xf32>,
    %c127_i32_36 = arith.constant 127 : i32
    %39 = tpu.dynamic_rotate %29 by %c127_i32_36 dim 1 : vector<16x128xf32>, i32 -> vector<16x128xf32>
    %c80_37 = arith.constant 80 : index
    %c0_38 = arith.constant 0 : index
    %40 = vector.load %arg11[%c80_37, %c0_38] : memref<144x128xf32, #tpu.memory_space<vmem>>, vector<16x128xf32>
    tpu.vector_store %arg11[%c80_37, %c0_38], %39 {strides = array<i32>} : memref<144x128xf32, #tpu.memory_space<vmem>>, vector<16x128xf32>,
    %c123_i32_39 = arith.constant 123 : i32
    %41 = tpu.dynamic_rotate %29 by %c123_i32_39 dim 1 : vector<16x128xf32>, i32 -> vector<16x128xf32>
    %c96_40 = arith.constant 96 : index
    %c0_41 = arith.constant 0 : index
    %42 = vector.load %arg11[%c96_40, %c0_41] : memref<144x128xf32, #tpu.memory_space<vmem>>, vector<16x128xf32>
    tpu.vector_store %arg11[%c96_40, %c0_41], %41 {strides = array<i32>} : memref<144x128xf32, #tpu.memory_space<vmem>>, vector<16x128xf32>,
    %c122_i32_42 = arith.constant 122 : i32
    %43 = tpu.dynamic_rotate %29 by %c122_i32_42 dim 1 : vector<16x128xf32>, i32 -> vector<16x128xf32>
    %c112_43 = arith.constant 112 : index
    %c0_44 = arith.constant 0 : index
    %44 = vector.load %arg11[%c112_43, %c0_44] : memref<144x128xf32, #tpu.memory_space<vmem>>, vector<16x128xf32>
    tpu.vector_store %arg11[%c112_43, %c0_44], %43 {strides = array<i32>} : memref<144x128xf32, #tpu.memory_space<vmem>>, vector<16x128xf32>,
    %c121_i32_45 = arith.constant 121 : i32
    %45 = tpu.dynamic_rotate %29 by %c121_i32_45 dim 1 : vector<16x128xf32>, i32 -> vector<16x128xf32>
    %c128_46 = arith.constant 128 : index
    %c0_47 = arith.constant 0 : index
    %46 = vector.load %arg11[%c128_46, %c0_47] : memref<144x128xf32, #tpu.memory_space<vmem>>, vector<16x128xf32>
    tpu.vector_store %arg11[%c128_46, %c0_47], %45 {strides = array<i32>} : memref<144x128xf32, #tpu.memory_space<vmem>>, vector<16x128xf32>,
    %c0_48 = arith.constant 0 : index
    %c0_49 = arith.constant 0 : index
    %47 = vector.load %arg11[%c0_48, %c0_49] : memref<144x128xf32, #tpu.memory_space<vmem>>, vector<144x128xf32>
    %48 = arith.truncf %47 : vector<144x128xf32> to vector<144x128xbf16>
    %49 = vector.extract_strided_slice %28 {offsets = [0, 0], sizes = [32, 128], strides = [1, 1]} : vector<48x128xf32> to vector<32x128xf32>
    %c0_50 = arith.constant 0 : index
    %c0_51 = arith.constant 0 : index
    %50 = vector.load %arg7[%c0_50, %c0_51] : memref<32x144xbf16, #tpu.memory_space<vmem>>, vector<32x144xbf16>
    %cst_52 = arith.constant dense<0.000000e+00> : vector<32x128xf32>
    %51 = tpu.matmul %50, %48, %cst_52 {dimension_numbers = #tpu.dot_dimension_numbers<[1], [0], [0], [1], [0, 0, 1, 1], [], []>} : vector<32x144xbf16>, vector<144x128xbf16>, vector<32x128xf32> -> vector<32x128xf32>
    %52 = arith.addf %49, %51 : vector<32x128xf32>
    %53 = vector.extract_strided_slice %52 {offsets = [0, 0], sizes = [16, 128], strides = [1, 1]} : vector<32x128xf32> to vector<16x128xf32>
    %54 = arith.negf %53 : vector<16x128xf32>
    %55 = math.exp %54 : vector<16x128xf32>
    %cst_53 = arith.constant 1.000000e+00 : f32
    %56 = vector.broadcast %cst_53 : f32 to vector<16x128xf32>
    %57 = arith.addf %56, %55 : vector<16x128xf32>
    %58 = arith.divf %56, %57 : vector<16x128xf32>
    %59 = vector.extract_strided_slice %52 {offsets = [16, 0], sizes = [16, 128], strides = [1, 1]} : vector<32x128xf32> to vector<16x128xf32>
    %60 = arith.negf %59 : vector<16x128xf32>
    %61 = math.exp %60 : vector<16x128xf32>
    %cst_54 = arith.constant 1.000000e+00 : f32
    %62 = vector.broadcast %cst_54 : f32 to vector<16x128xf32>
    %63 = arith.addf %62, %61 : vector<16x128xf32>
    %64 = arith.divf %62, %63 : vector<16x128xf32>
    %65 = arith.mulf %64, %29 : vector<16x128xf32>
    %c7_i32_55 = arith.constant 7 : i32
    %66 = tpu.dynamic_rotate %65 by %c7_i32_55 dim 1 : vector<16x128xf32>, i32 -> vector<16x128xf32>
    %c0_56 = arith.constant 0 : index
    %c0_57 = arith.constant 0 : index
    %67 = vector.load %arg11[%c0_56, %c0_57] : memref<144x128xf32, #tpu.memory_space<vmem>>, vector<16x128xf32>
    tpu.vector_store %arg11[%c0_56, %c0_57], %66 {strides = array<i32>} : memref<144x128xf32, #tpu.memory_space<vmem>>, vector<16x128xf32>,
    %c6_i32_58 = arith.constant 6 : i32
    %68 = tpu.dynamic_rotate %65 by %c6_i32_58 dim 1 : vector<16x128xf32>, i32 -> vector<16x128xf32>
    %c16_59 = arith.constant 16 : index
    %c0_60 = arith.constant 0 : index
    %69 = vector.load %arg11[%c16_59, %c0_60] : memref<144x128xf32, #tpu.memory_space<vmem>>, vector<16x128xf32>
    tpu.vector_store %arg11[%c16_59, %c0_60], %68 {strides = array<i32>} : memref<144x128xf32, #tpu.memory_space<vmem>>, vector<16x128xf32>,
    %c5_i32_61 = arith.constant 5 : i32
    %70 = tpu.dynamic_rotate %65 by %c5_i32_61 dim 1 : vector<16x128xf32>, i32 -> vector<16x128xf32>
    %c32_62 = arith.constant 32 : index
    %c0_63 = arith.constant 0 : index
    %71 = vector.load %arg11[%c32_62, %c0_63] : memref<144x128xf32, #tpu.memory_space<vmem>>, vector<16x128xf32>
    tpu.vector_store %arg11[%c32_62, %c0_63], %70 {strides = array<i32>} : memref<144x128xf32, #tpu.memory_space<vmem>>, vector<16x128xf32>,
    %c1_i32_64 = arith.constant 1 : i32
    %72 = tpu.dynamic_rotate %65 by %c1_i32_64 dim 1 : vector<16x128xf32>, i32 -> vector<16x128xf32>
    %c48_65 = arith.constant 48 : index
    %c0_66 = arith.constant 0 : index
    %73 = vector.load %arg11[%c48_65, %c0_66] : memref<144x128xf32, #tpu.memory_space<vmem>>, vector<16x128xf32>
    tpu.vector_store %arg11[%c48_65, %c0_66], %72 {strides = array<i32>} : memref<144x128xf32, #tpu.memory_space<vmem>>, vector<16x128xf32>,
    %c64_67 = arith.constant 64 : index
    %c0_68 = arith.constant 0 : index
    %74 = vector.load %arg11[%c64_67, %c0_68] : memref<144x128xf32, #tpu.memory_space<vmem>>, vector<16x128xf32>
    tpu.vector_store %arg11[%c64_67, %c0_68], %65 {strides = array<i32>} : memref<144x128xf32, #tpu.memory_space<vmem>>, vector<16x128xf32>,
    %c127_i32_69 = arith.constant 127 : i32
    %75 = tpu.dynamic_rotate %65 by %c127_i32_69 dim 1 : vector<16x128xf32>, i32 -> vector<16x128xf32>
    %c80_70 = arith.constant 80 : index
    %c0_71 = arith.constant 0 : index
    %76 = vector.load %arg11[%c80_70, %c0_71] : memref<144x128xf32, #tpu.memory_space<vmem>>, vector<16x128xf32>
    tpu.vector_store %arg11[%c80_70, %c0_71], %75 {strides = array<i32>} : memref<144x128xf32, #tpu.memory_space<vmem>>, vector<16x128xf32>,
    %c123_i32_72 = arith.constant 123 : i32
    %77 = tpu.dynamic_rotate %65 by %c123_i32_72 dim 1 : vector<16x128xf32>, i32 -> vector<16x128xf32>
    %c96_73 = arith.constant 96 : index
    %c0_74 = arith.constant 0 : index
    %78 = vector.load %arg11[%c96_73, %c0_74] : memref<144x128xf32, #tpu.memory_space<vmem>>, vector<16x128xf32>
    tpu.vector_store %arg11[%c96_73, %c0_74], %77 {strides = array<i32>} : memref<144x128xf32, #tpu.memory_space<vmem>>, vector<16x128xf32>,
    %c122_i32_75 = arith.constant 122 : i32
    %79 = tpu.dynamic_rotate %65 by %c122_i32_75 dim 1 : vector<16x128xf32>, i32 -> vector<16x128xf32>
    %c112_76 = arith.constant 112 : index
    %c0_77 = arith.constant 0 : index
    %80 = vector.load %arg11[%c112_76, %c0_77] : memref<144x128xf32, #tpu.memory_space<vmem>>, vector<16x128xf32>
    tpu.vector_store %arg11[%c112_76, %c0_77], %79 {strides = array<i32>} : memref<144x128xf32, #tpu.memory_space<vmem>>, vector<16x128xf32>,
    %c121_i32_78 = arith.constant 121 : i32
    %81 = tpu.dynamic_rotate %65 by %c121_i32_78 dim 1 : vector<16x128xf32>, i32 -> vector<16x128xf32>
    %c128_79 = arith.constant 128 : index
    %c0_80 = arith.constant 0 : index
    %82 = vector.load %arg11[%c128_79, %c0_80] : memref<144x128xf32, #tpu.memory_space<vmem>>, vector<16x128xf32>
    tpu.vector_store %arg11[%c128_79, %c0_80], %81 {strides = array<i32>} : memref<144x128xf32, #tpu.memory_space<vmem>>, vector<16x128xf32>,
    %c0_81 = arith.constant 0 : index
    %c0_82 = arith.constant 0 : index
    %83 = vector.load %arg11[%c0_81, %c0_82] : memref<144x128xf32, #tpu.memory_space<vmem>>, vector<144x128xf32>
    %84 = arith.truncf %83 : vector<144x128xf32> to vector<144x128xbf16>
    %85 = vector.extract_strided_slice %28 {offsets = [32, 0], sizes = [16, 128], strides = [1, 1]} : vector<48x128xf32> to vector<16x128xf32>
    %c0_83 = arith.constant 0 : index
    %c0_84 = arith.constant 0 : index
    %86 = vector.load %arg8[%c0_83, %c0_84] : memref<16x144xbf16, #tpu.memory_space<vmem>>, vector<16x144xbf16>
    %cst_85 = arith.constant dense<0.000000e+00> : vector<16x128xf32>
    %87 = tpu.matmul %86, %84, %cst_85 {dimension_numbers = #tpu.dot_dimension_numbers<[1], [0], [0], [1], [0, 0, 1, 1], [], []>} : vector<16x144xbf16>, vector<144x128xbf16>, vector<16x128xf32> -> vector<16x128xf32>
    %88 = arith.addf %85, %87 : vector<16x128xf32>
    %89 = math.tanh %88 : vector<16x128xf32>
    %cst_86 = arith.constant 1.000000e+00 : f32
    %90 = vector.broadcast %cst_86 : f32 to vector<16x128xf32>
    %91 = arith.subf %90, %58 : vector<16x128xf32>
    %92 = arith.mulf %91, %29 : vector<16x128xf32>
    %93 = arith.mulf %58, %89 : vector<16x128xf32>
    %94 = arith.addf %92, %93 : vector<16x128xf32>
    %c0_87 = arith.constant 0 : index
    %c0_88 = arith.constant 0 : index
    %95 = vector.load %arg4[%c0_87, %c0_88] : memref<1x128xf32, #tpu.memory_space<vmem>>, vector<1x128xf32>
    %96 = vector.broadcast %95 : vector<1x128xf32> to vector<16x128xf32>
    %97 = arith.mulf %94, %96 : vector<16x128xf32>
    %c0_89 = arith.constant 0 : index
    %c0_90 = arith.constant 0 : index
    %98 = vector.load %arg10[%c0_89, %c0_90] : memref<16x128xf32, #tpu.memory_space<vmem>>, vector<16x128xf32>
    tpu.vector_store %arg10[%c0_89, %c0_90], %97 {strides = array<i32>} : memref<16x128xf32, #tpu.memory_space<vmem>>, vector<16x128xf32>,
    %c0_i32_91 = arith.constant 0 : i32
    %99 = arith.cmpi eq, %arg1, %c0_i32_91 : i32
    %100 = arith.extui %99 : i1 to i32
    %c0_i32_92 = arith.constant 0 : i32
    %101 = arith.cmpi ne, %100, %c0_i32_92 : i32
    scf.if %101 {
      %c0_93 = arith.constant 0 : index
      %c0_94 = arith.constant 0 : index
      %c0_95 = arith.constant 0 : index
      %102 = vector.load %arg9[%c0_93, %c0_94, %c0_95] : memref<1x16x128xf32, #tpu.memory_space<vmem>>, vector<1x16x128xf32>
      %103 = vector.shape_cast %102 : vector<1x16x128xf32> to vector<16x128xf32>
      %104 = vector.shape_cast %97 : vector<16x128xf32> to vector<1x16x128xf32>
      tpu.vector_store %arg9[%c0_93, %c0_94, %c0_95], %104 {strides = array<i32>} : memref<1x16x128xf32, #tpu.memory_space<vmem>>, vector<1x16x128xf32>,
    } else {
    }
    return
  }
  func.func @transform_0(%arg0: i32, %arg1: i32) -> (i32, i32, i32, i32) {
    %c0_i32 = arith.constant 0 : i32
    %c0_i32_0 = arith.constant 0 : i32
    %c0_i32_1 = arith.constant 0 : i32
    return %arg1, %arg0, %c0_i32, %c0_i32_0 : i32, i32, i32, i32
  }
  func.func @transform_1(%arg0: i32, %arg1: i32) -> (i32, i32, i32) {
    %c0_i32 = arith.constant 0 : i32
    %c0_i32_0 = arith.constant 0 : i32
    %c0_i32_1 = arith.constant 0 : i32
    return %arg0, %c0_i32, %c0_i32_0 : i32, i32, i32
  }
  func.func @transform_2(%arg0: i32, %arg1: i32) -> (i32, i32) {
    %c0_i32 = arith.constant 0 : i32
    %c0_i32_0 = arith.constant 0 : i32
    %c0_i32_1 = arith.constant 0 : i32
    return %c0_i32, %c0_i32_0 : i32, i32
  }
  func.func @transform_3(%arg0: i32, %arg1: i32) -> (i32, i32) {
    %c0_i32 = arith.constant 0 : i32
    %c0_i32_0 = arith.constant 0 : i32
    %c0_i32_1 = arith.constant 0 : i32
    return %c0_i32, %c0_i32_0 : i32, i32
  }
  func.func @transform_4(%arg0: i32, %arg1: i32) -> (i32, i32) {
    %c0_i32 = arith.constant 0 : i32
    %c0_i32_0 = arith.constant 0 : i32
    %c0_i32_1 = arith.constant 0 : i32
    return %c0_i32, %c0_i32_0 : i32, i32
  }
  func.func @transform_5(%arg0: i32, %arg1: i32) -> (i32, i32) {
    %c0_i32 = arith.constant 0 : i32
    %c0_i32_0 = arith.constant 0 : i32
    %c0_i32_1 = arith.constant 0 : i32
    return %c0_i32, %c0_i32_0 : i32, i32
  }
  func.func @transform_6(%arg0: i32, %arg1: i32) -> (i32, i32) {
    %c0_i32 = arith.constant 0 : i32
    %c0_i32_0 = arith.constant 0 : i32
    %c0_i32_1 = arith.constant 0 : i32
    return %c0_i32, %c0_i32_0 : i32, i32
  }
  func.func @transform_7(%arg0: i32, %arg1: i32) -> (i32, i32, i32) {
    %c0_i32 = arith.constant 0 : i32
    %c0_i32_0 = arith.constant 0 : i32
    %c0_i32_1 = arith.constant 0 : i32
    return %arg0, %c0_i32, %c0_i32_0 : i32, i32, i32
  }
}

</mosaic_0001>

<bundles_post_ra>
// kernel: _lambda_.6
= control target key start
LH: loop header
LB: loop body
LE: loop exit
PB: predicated region body
PF: predicated region fallthrough
CT: control target
= control target key end

     0   :  { %s959_s12 = smov 0   ;;  %s961_s13 = smov 0   ;;  %s1197_s0 = inlined_call_operand.vmem [shape: bf16[8,18], index: 0, kind: input, shape index: {}]   ;;  %s1198_s1 = inlined_call_operand.vmem [shape: bf16[18,4096], index: 1, kind: input, shape index: {}]   ;;  %s1199_s2 = inlined_call_operand.vmem [shape: f32[8,1], index: 2, kind: input, shape index: {}]   ;;  %s1200_s3 = inlined_call_operand.vmem [shape: f32[8,4096], index: 3, kind: output, shape index: {}]  }
   0x1   :  { %s963_s14 = smov 0  }
   0x2 LB: > { %s778_s15 = sadd.s32 4294967295, %s936_s14   ;;  %s976_s16 = sadd.s32 1, %s936_s14   ;;  %s936_s14 = sphi %s963_s14, %s1203_s14   ;;  %s932_s13 = sphi %s961_s13, %s1202_s13   ;;  %s928_s12 = sphi %s959_s12, %s1201_s12  }
   0x3   : > { %s38_s17 = ssub.s32 %s936_s14, %s976_s16  ;;  %s41_s18 = sadd.s32 1, %s932_s13 }
   0x4   : > { %p39_p0 = scmp.eq.s32.totalorder %s38_s17, 0  ;;  %p48_p1 = scmp.ne.s32.totalorder %s932_s13, %s928_s12 }
   0x5   : > { %p49_p2 = scmp.eq.s32.totalorder %s936_s14, 0  ;;  %p781_p4 = scmp.ge.s32.totalorder %s936_s14, 2 }
   0x6   : > { %s985_s19 = scalar_select %p39_p0, %s932_s13, %s41_s18  }
   0x7   : > { %p50_p3 = por %p49_p2, %p48_p1  ;;  %127 = sbr.rel (%p781_p4) target bundleno = 40 (0x28), region = 24 }
   0xc   : > { %130 = sbr.rel (!%p50_p3) target bundleno = 40 (0x28), region = 28  ;;  %s132_s20 = sand.u32 (%p50_p3), 1, %s932_s13  }
   0xd   : > { %s869_s21 = sshll.u32 (%p50_p3), %s936_s14, 6  ;;  %s886_s22 = smul.u32 (%p50_p3), 192, %s132_s20 }
   0xe   : > { %s993_s25 = scalar_lea.vmem (%p50_p3), %s1198_s1, %s869_s21 }
   0xf   : > { %v150_v0 = vld [vmem:[%s993_s25] sm:$0xff] (%p50_p3)  ;;  %v152_v1 = vld [vmem:[%s993_s25 + $0x8] sm:$0xff] (%p50_p3)  ;;  %v154_v2 = vld [vmem:[%s993_s25 + $0x10] sm:$0xff] (%p50_p3)  ;;  %s998_s26 = scalar_lea.vmem (%p50_p3), [#allocation2], %s886_s22 }
  0x10   : > { %151 = vst [vmem:[%s998_s26] sm:$0xff] (%p50_p3), %v150_v0  ;;  %v156_v3 = vld [vmem:[%s993_s25 + $0x18] sm:$0xff] (%p50_p3)  ;;  %v158_v4 = vld [vmem:[%s993_s25 + $0x20] sm:$0xff] (%p50_p3)  ;;  %v160_v5 = vld [vmem:[%s993_s25 + $0x28] sm:$0xff] (%p50_p3) }
  0x11   : > { %153 = vst [vmem:[%s998_s26 + $0x8] sm:$0xff] %v152_v1  ;;  %v162_v6 = vld [vmem:[%s993_s25 + $0x30] sm:$0xff]  ;;  %v164_v7 = vld [vmem:[%s993_s25 + $0x38] sm:$0xff]  ;;  %v166_v8 = vld [vmem:[%s993_s25 + $0x80] sm:$0xff] }
  0x12   : > { %155 = vst [vmem:[%s998_s26 + $0x10] sm:$0xff] %v154_v2  ;;  %v168_v9 = vld [vmem:[%s993_s25 + $0x88] sm:$0xff]  ;;  %v170_v10 = vld [vmem:[%s993_s25 + $0x90] sm:$0xff]  ;;  %v172_v11 = vld [vmem:[%s993_s25 + $0x98] sm:$0xff] }
  0x13   : > { %157 = vst [vmem:[%s998_s26 + $0x18] sm:$0xff] %v156_v3  ;;  %v174_v12 = vld [vmem:[%s993_s25 + $0xa0] sm:$0xff]  ;;  %v176_v13 = vld [vmem:[%s993_s25 + $0xa8] sm:$0xff]  ;;  %v178_v14 = vld [vmem:[%s993_s25 + $0xb0] sm:$0xff] }
  0x14   : > { %159 = vst [vmem:[%s998_s26 + $0x20] sm:$0xff] %v158_v4  ;;  %v180_v15 = vld [vmem:[%s993_s25 + $0xb8] sm:$0xff]  ;;  %v182_v16 = vld [vmem:[%s993_s25 + $0x100] sm:$0xff]  ;;  %v184_v17 = vld [vmem:[%s993_s25 + $0x108] sm:$0xff] }
  0x15   : > { %161 = vst [vmem:[%s998_s26 + $0x28] sm:$0xff] %v160_v5  ;;  %v186_v18 = vld [vmem:[%s993_s25 + $0x110] sm:$0xff]  ;;  %v188_v19 = vld [vmem:[%s993_s25 + $0x118] sm:$0xff]  ;;  %v190_v20 = vld [vmem:[%s993_s25 + $0x120] sm:$0xff] }
  0x16   : > { %163 = vst [vmem:[%s998_s26 + $0x30] sm:$0xff] %v162_v6  ;;  %v192_v21 = vld [vmem:[%s993_s25 + $0x128] sm:$0xff]  ;;  %v194_v22 = vld [vmem:[%s993_s25 + $0x130] sm:$0xff]  ;;  %v196_v23 = vld [vmem:[%s993_s25 + $0x138] sm:$0xff] }
  0x17   : > { %165 = vst [vmem:[%s998_s26 + $0x38] sm:$0xff] %v164_v7 }
  0x18   : > { %167 = vst [vmem:[%s998_s26 + $0x40] sm:$0xff] %v166_v8 }
  0x19   : > { %169 = vst [vmem:[%s998_s26 + $0x48] sm:$0xff] %v168_v9 }
  0x1a   : > { %171 = vst [vmem:[%s998_s26 + $0x50] sm:$0xff] %v170_v10 }
  0x1b   : > { %173 = vst [vmem:[%s998_s26 + $0x58] sm:$0xff] %v172_v11 }
  0x1c   : > { %175 = vst [vmem:[%s998_s26 + $0x60] sm:$0xff] %v174_v12 }
  0x1d   : > { %177 = vst [vmem:[%s998_s26 + $0x68] sm:$0xff] %v176_v13 }
  0x1e   : > { %179 = vst [vmem:[%s998_s26 + $0x70] sm:$0xff] %v178_v14 }
  0x1f   : > { %181 = vst [vmem:[%s998_s26 + $0x78] sm:$0xff] %v180_v15 }
  0x20   : > { %183 = vst [vmem:[%s998_s26 + $0x80] sm:$0xff] %v182_v16 }
  0x21   : > { %185 = vst [vmem:[%s998_s26 + $0x88] sm:$0xff] %v184_v17 }
  0x22   : > { %187 = vst [vmem:[%s998_s26 + $0x90] sm:$0xff] %v186_v18 }
  0x23   : > { %189 = vst [vmem:[%s998_s26 + $0x98] sm:$0xff] %v188_v19 }
  0x24   : > { %191 = vst [vmem:[%s998_s26 + $0xa0] sm:$0xff] %v190_v20 }
  0x25   : > { %193 = vst [vmem:[%s998_s26 + $0xa8] sm:$0xff] %v192_v21 }
  0x26   : > { %195 = vst [vmem:[%s998_s26 + $0xb0] sm:$0xff] %v194_v22 }
  0x27   : > { %197 = vst [vmem:[%s998_s26 + $0xb8] sm:$0xff] %v196_v23 }
  0x28 PF: > { %p784_p5 = scmp.ge.s32.totalorder %s936_s14, 1  ;;  %p202_p6 = scmp.lt.s32.totalorder %s936_s14, 3 }
  0x2a   : > { %p203_p7 = pnand %p784_p5, %p202_p6 }
  0x2b   : > { %s209_s27 = sand.u32 (!%p203_p7), 1, %s928_s12   ;;  %s785_s7 = sshll.u32 (!%p203_p7), %s778_s15, 4 }
  0x2c   : > { %206 = sbr.rel (%p203_p7) target bundleno = 250 (0xfa), region = 51  ;;  %p234_p8 = scmp.lt.s32.totalorder (!%p203_p7), %s785_s7, 31 }
  0x2d   : > { %s887_s28 = smul.u32 (!%p203_p7), 192, %s209_s27 }
  0x2f   : > { %s1051_s4 = scalar_lea.vmem (!%p203_p7), [#allocation2], %s887_s28 }
  0x31   : > { %v938_v24 = vmov 0   ;;  %v265_v25 = vld [vmem:[%s1199_s2] sm:$0xff]  ;;  %v258_v27 = vld [vmem:[%s1051_s4 + $0x88] sm:$0x11]  ;;  %vm395_vm0 = vcmask 1040384   ;;  %vm391_vm1 = vcmask 146432  }
  0x32   : > { %913 = vset.pattern.permute.xlu0 %v938_v24  ;;  %v257_v26 = vld [vmem:[%s1051_s4 + $0x80] sm:$0x11]  ;;  %v329_v31 = vunpack.c.l.b16 %v258_v27  ;;  %v330_v32 = vunpack.c.h.b16 %v258_v27  ;;  %v797_v40 = vld [vmem:[%s1051_s4 + $0x8] sm:$0xf]  ;;  %v260_v41 = vld [vmem:[%s1051_s4 + $0x98] sm:$0x11] }
  0x33   : > { %268 = vperm.xlu0 %913, %v265_v25   ;;  %v789_v28 = vld [vmem:[%s1051_s4] sm:$0xf]  ;;  %v327_v29 = vunpack.c.l.b16 %v257_v26  ;;  %v328_v30 = vunpack.c.h.b16 %v257_v26  ;;  %v870_v34 = vld [vmem:[%s1051_s4 + $0x4] sm:$0xf]  ;;  %v259_v42 = vld [vmem:[%s1051_s4 + $0x90] sm:$0x11]  ;;  %v333_v48 = vunpack.c.l.b16 %v260_v41  ;;  %v334_v49 = vunpack.c.h.b16 %v260_v41 }
  0x34   : > { %v878_v33 = vld [vmem:[%s1051_s4 + $0x3c] sm:$0xf0]  ;;  %v791_v35 = vld [vmem:[%s1051_s4 + $0x40] sm:$0xf0]  ;;  %v361_v38 = vpack.c.b16 %v329_v31, %v329_v31  ;;  %v362_v39 = vpack.c.b16 %v330_v32, %v330_v32  ;;  %v879_v45 = vld [vmem:[%s1051_s4 + $0x44] sm:$0xf0]  ;;  %v331_v56 = vunpack.c.l.b16 %v259_v42  ;;  %v332_v57 = vunpack.c.h.b16 %v259_v42 }
  0x35   : > { %v359_v36 = vpack.c.b16 %v327_v29, %v327_v29  ;;  %v360_v37 = vpack.c.b16 %v328_v30, %v328_v30  ;;  %v790_v43 = vor.u32 %v878_v33, %v789_v28  ;;  %v794_v44 = vor.u32 %v870_v34, %v791_v35  ;;  %v871_v46 = vld [vmem:[%s1051_s4 + $0xc] sm:$0xf]  ;;  %v261_v61 = vld [vmem:[%s1051_s4 + $0xa0] sm:$0x11]  ;;  %v813_v1 = vld [vmem:[%s1051_s4 + $0x18] sm:$0xf] }
  0x36   : > { %v799_v47 = vld [vmem:[%s1051_s4 + $0x48] sm:$0xf0]  ;;  %v403_v52 = vsel %vm395_vm0, %v361_v38, 0  ;;  %v406_v53 = vsel %vm395_vm0, %v362_v39, 0  ;;  %v365_v54 = vpack.c.b16 %v333_v48, %v333_v48  ;;  %v366_v55 = vpack.c.b16 %v334_v49, %v334_v49  ;;  %v881_v2 = vld [vmem:[%s1051_s4 + $0x54] sm:$0xf0] }
  0x37   : > { %v397_v50 = vsel %vm395_vm0, %v359_v36, 0  ;;  %v400_v51 = vsel %vm395_vm0, %v360_v37, 0  ;;  %476 = vmatpush.bf16.msra.mxu2 %v403_v52  ;;  %489 = vmatpush.bf16.msra.mxu3 %v406_v53  ;;  %v798_v58 = vor.u32 %v879_v45, %v797_v40  ;;  %v802_v59 = vor.u32 %v871_v46, %v799_v47  ;;  %v262_v60 = vld [vmem:[%s1051_s4 + $0xa8] sm:$0x11]  ;;  %v873_v4 = vld [vmem:[%s1051_s4 + $0x1c] sm:$0xf] }
  0x38   : > { %450 = vmatpush.bf16.msra.mxu0 %v397_v50  ;;  %463 = vmatpush.bf16.msra.mxu1 %v400_v51  ;;  %v415_v62 = vsel %vm395_vm0, %v365_v54, 0  ;;  %v363_v63 = vpack.c.b16 %v331_v56, %v331_v56  ;;  %v364_v0 = vpack.c.b16 %v332_v57, %v332_v57  ;;  %v418_v3 = vsel %vm395_vm0, %v366_v55, 0  ;;  %v815_v5 = vld [vmem:[%s1051_s4 + $0x58] sm:$0xf0]  ;;  %v1080_v9 = vld [vmem:[%s1197_s0] sm:$0xf] }
  0x39   : > { %v337_v6 = vunpack.c.l.b16 %v262_v60  ;;  %v338_v7 = vunpack.c.h.b16 %v262_v60  ;;  %v335_v8 = vunpack.c.l.b16 %v261_v61  ;;  %v336_v10 = vunpack.c.h.b16 %v261_v61  ;;  %v805_v11 = vld [vmem:[%s1051_s4 + $0x10] sm:$0xf]  ;;  %v872_v19 = vld [vmem:[%s1051_s4 + $0x14] sm:$0xf]  ;;  %v829_v23 = vld [vmem:[%s1051_s4 + $0x28] sm:$0xf] }
  0x3a   : > { %v880_v12 = vld [vmem:[%s1051_s4 + $0x4c] sm:$0xf0]  ;;  %v409_v15 = vsel %vm395_vm0, %v363_v63, 0  ;;  %v412_v16 = vsel %vm395_vm0, %v364_v0, 0  ;;  %v814_v17 = vor.u32 %v881_v2, %v813_v1  ;;  %v818_v18 = vor.u32 %v873_v4, %v815_v5  ;;  %v807_v20 = vld [vmem:[%s1051_s4 + $0x50] sm:$0xf0] }
  0x3b   : > { %477 = vmatpush.bf16.msra.mxu2 %v798_v58  ;;  %490 = vmatpush.bf16.msra.mxu3 %v802_v59  ;;  %v369_v13 = vpack.c.b16 %v337_v6, %v337_v6  ;;  %v370_v14 = vpack.c.b16 %v338_v7, %v338_v7  ;;  %v367_v21 = vpack.c.b16 %v335_v8, %v335_v8  ;;  %v883_v24 = vld [vmem:[%s1051_s4 + $0x64] sm:$0xf0]  ;;  %v875_v27 = vld [vmem:[%s1051_s4 + $0x2c] sm:$0xf]  ;;  %v821_v31 = vld [vmem:[%s1051_s4 + $0x20] sm:$0xf] }
  0x3c   : > { %451 = vmatpush.bf16.msra.mxu0 %v790_v43  ;;  %464 = vmatpush.bf16.msra.mxu1 %v794_v44  ;;  %v368_v22 = vpack.c.b16 %v336_v10, %v336_v10  ;;  %v831_v28 = vld [vmem:[%s1051_s4 + $0x68] sm:$0xf0]  ;;  %v806_v29 = vor.u32 %v880_v12, %v805_v11  ;;  %v810_v30 = vor.u32 %v872_v19, %v807_v20  ;;  %v882_v32 = vld [vmem:[%s1051_s4 + $0x5c] sm:$0xf0]  ;;  %v874_v33 = vld [vmem:[%s1051_s4 + $0x24] sm:$0xf] }
  0x3d   : > { %v427_v25 = vsel %vm395_vm0, %v369_v13, 0  ;;  %v430_v26 = vsel %vm395_vm0, %v370_v14, 0  ;;  %v421_v34 = vsel %vm395_vm0, %v367_v21, 0  ;;  %v830_v36 = vor.u32 %v883_v24, %v829_v23  ;;  %v823_v38 = vld [vmem:[%s1051_s4 + $0x60] sm:$0xf0]  ;;  %s1205_s7 = smov (!%p234_p8, %s785_s7), 31 }
  0x3e   : > { %853 = vmatmul.msk.bf16.vlgmr.msra.gmra.mxu2 %vm391_vm1, %v1080_v9  ;;  %854 = vmatmul.msk.bf16.vlgmr.msra.gmra.mxu3 %vm391_vm1, %v1080_v9  ;;  %v424_v35 = vsel %vm395_vm0, %v368_v22, 0  ;;  %v834_v37 = vor.u32 %v875_v27, %v831_v28  ;;  %v264_v39 = vld [vmem:[%s1051_s4 + $0xb8] sm:$0x11]  ;;  %v263_v40 = vld [vmem:[%s1051_s4 + $0xb0] sm:$0x11]  ;;  %v822_v41 = vor.u32 %v882_v32, %v821_v31  ;;  %v826_v42 = vor.u32 %v874_v33, %v823_v38  ;;  %s786_s8 = sshll.u32 %s1205_s7, 3 }
  0x3f   : > { %528 = vmatpush.bf16.msrb.mxu2 %v415_v62  ;;  %541 = vmatpush.bf16.msrb.mxu3 %v418_v3  ;;  %v341_v43 = vunpack.c.l.b16 %v264_v39  ;;  %v342_v44 = vunpack.c.h.b16 %v264_v39  ;;  %v339_v45 = vunpack.c.l.b16 %v263_v40  ;;  %v340_v46 = vunpack.c.h.b16 %v263_v40  ;;  %v845_v51 = vld [vmem:[%s1051_s4 + $0x38] sm:$0xf]  ;;  %v877_v53 = vld [vmem:[%s1051_s4 + $0x3c] sm:$0xf]  ;;  %v837_v57 = vld [vmem:[%s1051_s4 + $0x30] sm:$0xf]  ;;  %s1155_s11 = scalar_lea.vmem %s1200_s3, %s786_s8 }
  0x40   : > { %851 = vmatmul.msk.bf16.vlgmr.msra.gmra.mxu0 %vm391_vm1, %v1080_v9  ;;  %852 = vmatmul.msk.bf16.vlgmr.msra.gmra.mxu1 %vm391_vm1, %v1080_v9  ;;  %v885_v52 = vld [vmem:[%s1051_s4 + $0x74] sm:$0xf0]  ;;  %v847_v54 = vld [vmem:[%s1051_s4 + $0x78] sm:$0xf0]  ;;  %v884_v58 = vld [vmem:[%s1051_s4 + $0x6c] sm:$0xf0] }
  0x41   : > { %502 = vmatpush.bf16.msrb.mxu0 %v409_v15  ;;  %515 = vmatpush.bf16.msrb.mxu1 %v412_v16  ;;  %v373_v47 = vpack.c.b16 %v341_v43, %v341_v43  ;;  %v374_v48 = vpack.c.b16 %v342_v44, %v342_v44  ;;  %v371_v49 = vpack.c.b16 %v339_v45, %v339_v45  ;;  %v876_v61 = vld [vmem:[%s1051_s4 + $0x34] sm:$0xf] }
  0x42   : > { %v372_v50 = vpack.c.b16 %v340_v46, %v340_v46  ;;  %v839_v62 = vld [vmem:[%s1051_s4 + $0x70] sm:$0xf0]  ;;  %v846_v63 = vor.u32 %v885_v52, %v845_v51  ;;  %v850_v0 = vor.u32 %v877_v53, %v847_v54  ;;  %v838_v1 = vor.u32 %v884_v58, %v837_v57 }
  0x43   : > { %529 = vmatpush.bf16.msrb.mxu2 %v814_v17  ;;  %542 = vmatpush.bf16.msrb.mxu3 %v818_v18  ;;  %v439_v55 = vsel %vm395_vm0, %v373_v47, 0  ;;  %v442_v56 = vsel %vm395_vm0, %v374_v48, 0  ;;  %v433_v59 = vsel %vm395_vm0, %v371_v49, 0  ;;  %v842_v2 = vor.u32 %v876_v61, %v839_v62 }
  0x44   : > { %v436_v60 = vsel %vm395_vm0, %v372_v50, 0 }
  0x45   : > { %503 = vmatpush.bf16.msrb.mxu0 %v806_v29  ;;  %516 = vmatpush.bf16.msrb.mxu1 %v810_v30 }
  0x47   : > { %580 = vmatpush.bf16.msra.mxu2 %v427_v25  ;;  %593 = vmatpush.bf16.msra.mxu3 %v430_v26 }
  0x49   : > { %554 = vmatpush.bf16.msra.mxu0 %v421_v34  ;;  %567 = vmatpush.bf16.msra.mxu1 %v424_v35 }
  0x4b   : > { %581 = vmatpush.bf16.msra.mxu2 %v830_v36  ;;  %594 = vmatpush.bf16.msra.mxu3 %v834_v37 }
  0x4d   : > { %555 = vmatpush.bf16.msra.mxu0 %v822_v41  ;;  %568 = vmatpush.bf16.msra.mxu1 %v826_v42 }
  0x4e   : > { %857 = vmatmul.msk.bf16.vlgmr.msrb.gmra.mxu2 %vm391_vm1, %v1080_v9  ;;  %858 = vmatmul.msk.bf16.vlgmr.msrb.gmra.mxu3 %vm391_vm1, %v1080_v9 }
  0x4f   : > { %632 = vmatpush.bf16.msrb.mxu2 %v439_v55  ;;  %645 = vmatpush.bf16.msrb.mxu3 %v442_v56 }
  0x50   : > { %855 = vmatmul.msk.bf16.vlgmr.msrb.gmra.mxu0 %vm391_vm1, %v1080_v9  ;;  %856 = vmatmul.msk.bf16.vlgmr.msrb.gmra.mxu1 %vm391_vm1, %v1080_v9 }
  0x51   : > { %606 = vmatpush.bf16.msrb.mxu0 %v433_v59  ;;  %619 = vmatpush.bf16.msrb.mxu1 %v436_v60 }
  0x53   : > { %633 = vmatpush.bf16.msrb.mxu2 %v846_v63  ;;  %646 = vmatpush.bf16.msrb.mxu3 %v850_v0 }
  0x55   : > { %607 = vmatpush.bf16.msrb.mxu0 %v838_v1  ;;  %620 = vmatpush.bf16.msrb.mxu1 %v842_v2 }
  0x5e   : > { %861 = vmatmul.msk.bf16.vlgmr.msra.gmra.mxu2 %vm391_vm1, %v1080_v9  ;;  %862 = vmatmul.msk.bf16.vlgmr.msra.gmra.mxu3 %vm391_vm1, %v1080_v9 }
  0x60   : > { %859 = vmatmul.msk.bf16.vlgmr.msra.gmra.mxu0 %vm391_vm1, %v1080_v9  ;;  %860 = vmatmul.msk.bf16.vlgmr.msra.gmra.mxu1 %vm391_vm1, %v1080_v9 }
  0x6e   : > { %865 = vmatmul.msk.bf16.vlgmr.msrb.gmra.mxu2 %vm391_vm1, %v1080_v9  ;;  %866 = vmatmul.msk.bf16.vlgmr.msrb.gmra.mxu3 %vm391_vm1, %v1080_v9 }
  0x70   : > { %863 = vmatmul.msk.bf16.vlgmr.msrb.gmra.mxu0 %vm391_vm1, %v1080_v9  ;;  %864 = vmatmul.msk.bf16.vlgmr.msrb.gmra.mxu1 %vm391_vm1, %v1080_v9 }
  0xa5   : > { %v1148_v3 = vpop.permute.xlu0 %268 }
  0xbd   : > { %v453_v4 = vpop.f32.mrf.mxu0  ;;  %v466_v5 = vpop.f32.mrf.mxu1 }
  0xbe   : > { %v454_v6 = vadd.f32 %v453_v4, %v1148_v3  ;;  %v467_v7 = vadd.f32 %v466_v5, %v1148_v3 }
  0xc0   : > { %vm652_vm2 = vcmp.ge.f32.partialorder %v454_v6, 0.0  ;;  %vm653_vm3 = vcmp.ge.f32.partialorder %v467_v7, 0.0  ;;  %v668_v8 = vmul.f32 0.2, %v454_v6  ;;  %v669_v9 = vmul.f32 0.2, %v467_v7 }
  0xc1   : > { %v479_v12 = vpop.f32.mrf.mxu2  ;;  %v492_v13 = vpop.f32.mrf.mxu3 }
  0xc2   : > { %v684_v10 = vsel %vm652_vm2, %v454_v6, %v668_v8  ;;  %v685_v11 = vsel %vm653_vm3, %v467_v7, %v669_v9  ;;  %v480_v14 = vadd.f32 %v479_v12, %v1148_v3  ;;  %v493_v15 = vadd.f32 %v492_v13, %v1148_v3 }
  0xc3   : > { %700 = vst [vmem:[%s1155_s11] sm:$0xff] %v684_v10 }
  0xc4   : > { %701 = vst [vmem:[%s1155_s11 + $0x8] sm:$0xff] %v685_v11  ;;  %vm654_vm4 = vcmp.ge.f32.partialorder %v480_v14, 0.0  ;;  %v670_v18 = vmul.f32 0.2, %v480_v14  ;;  %vm655_vm5 = vcmp.ge.f32.partialorder %v493_v15, 0.0 }
  0xc5   : > { %v455_v16 = vpop.f32.mrf.mxu0  ;;  %v468_v17 = vpop.f32.mrf.mxu1  ;;  %v671_v19 = vmul.f32 0.2, %v493_v15 }
  0xc6   : > { %v686_v20 = vsel %vm654_vm4, %v480_v14, %v670_v18 }
  0xc7   : > { %v687_v21 = vsel %vm655_vm5, %v493_v15, %v671_v19  ;;  %702 = vst [vmem:[%s1155_s11 + $0x10] sm:$0xff] %v686_v20 }
  0xc8   : > { %703 = vst [vmem:[%s1155_s11 + $0x18] sm:$0xff] %v687_v21 }
  0xc9   : > { %v481_v22 = vpop.f32.mrf.mxu2  ;;  %v494_v23 = vpop.f32.mrf.mxu3 }
  0xcd   : > { %v505_v24 = vpop.f32.mrf.mxu0  ;;  %v518_v25 = vpop.f32.mrf.mxu1 }
  0xce   : > { %v506_v26 = vadd.f32 %v505_v24, %v1148_v3  ;;  %v519_v27 = vadd.f32 %v518_v25, %v1148_v3 }
  0xd0   : > { %vm656_vm6 = vcmp.ge.f32.partialorder %v506_v26, 0.0  ;;  %v672_v28 = vmul.f32 0.2, %v506_v26  ;;  %vm657_vm7 = vcmp.ge.f32.partialorder %v519_v27, 0.0  ;;  %v673_v29 = vmul.f32 0.2, %v519_v27 }
  0xd1   : > { %v531_v32 = vpop.f32.mrf.mxu2  ;;  %v544_v33 = vpop.f32.mrf.mxu3 }
  0xd2   : > { %v688_v30 = vsel %vm656_vm6, %v506_v26, %v672_v28  ;;  %v689_v31 = vsel %vm657_vm7, %v519_v27, %v673_v29  ;;  %v532_v34 = vadd.f32 %v531_v32, %v1148_v3  ;;  %v545_v35 = vadd.f32 %v544_v33, %v1148_v3 }
  0xd3   : > { %704 = vst [vmem:[%s1155_s11 + $0x20] sm:$0xff] %v688_v30 }
  0xd4   : > { %705 = vst [vmem:[%s1155_s11 + $0x28] sm:$0xff] %v689_v31  ;;  %vm658_vm8 = vcmp.ge.f32.partialorder %v532_v34, 0.0  ;;  %v674_v38 = vmul.f32 0.2, %v532_v34  ;;  %vm659_vm9 = vcmp.ge.f32.partialorder %v545_v35, 0.0 }
  0xd5   : > { %v507_v36 = vpop.f32.mrf.mxu0  ;;  %v520_v37 = vpop.f32.mrf.mxu1  ;;  %v675_v39 = vmul.f32 0.2, %v545_v35 }
  0xd6   : > { %v690_v40 = vsel %vm658_vm8, %v532_v34, %v674_v38 }
  0xd7   : > { %v691_v41 = vsel %vm659_vm9, %v545_v35, %v675_v39  ;;  %706 = vst [vmem:[%s1155_s11 + $0x30] sm:$0xff] %v690_v40 }
  0xd8   : > { %707 = vst [vmem:[%s1155_s11 + $0x38] sm:$0xff] %v691_v41 }
  0xd9   : > { %v533_v42 = vpop.f32.mrf.mxu2  ;;  %v546_v43 = vpop.f32.mrf.mxu3 }
  0xdd   : > { %v557_v44 = vpop.f32.mrf.mxu0  ;;  %v570_v45 = vpop.f32.mrf.mxu1 }
  0xde   : > { %v558_v46 = vadd.f32 %v557_v44, %v1148_v3  ;;  %v571_v47 = vadd.f32 %v570_v45, %v1148_v3 }
  0xe0   : > { %vm660_vm10 = vcmp.ge.f32.partialorder %v558_v46, 0.0  ;;  %v676_v48 = vmul.f32 0.2, %v558_v46  ;;  %vm661_vm11 = vcmp.ge.f32.partialorder %v571_v47, 0.0  ;;  %v677_v49 = vmul.f32 0.2, %v571_v47 }
  0xe1   : > { %v583_v52 = vpop.f32.mrf.mxu2  ;;  %v596_v53 = vpop.f32.mrf.mxu3 }
  0xe2   : > { %v692_v50 = vsel %vm660_vm10, %v558_v46, %v676_v48  ;;  %v693_v51 = vsel %vm661_vm11, %v571_v47, %v677_v49  ;;  %v584_v54 = vadd.f32 %v583_v52, %v1148_v3  ;;  %v597_v55 = vadd.f32 %v596_v53, %v1148_v3 }
  0xe3   : > { %708 = vst [vmem:[%s1155_s11 + $0x40] sm:$0xff] %v692_v50 }
  0xe4   : > { %709 = vst [vmem:[%s1155_s11 + $0x48] sm:$0xff] %v693_v51  ;;  %vm662_vm12 = vcmp.ge.f32.partialorder %v584_v54, 0.0  ;;  %v678_v58 = vmul.f32 0.2, %v584_v54  ;;  %vm663_vm13 = vcmp.ge.f32.partialorder %v597_v55, 0.0 }
  0xe5   : > { %v559_v56 = vpop.f32.mrf.mxu0  ;;  %v572_v57 = vpop.f32.mrf.mxu1  ;;  %v679_v59 = vmul.f32 0.2, %v597_v55 }
  0xe6   : > { %v694_v60 = vsel %vm662_vm12, %v584_v54, %v678_v58 }
  0xe7   : > { %v695_v61 = vsel %vm663_vm13, %v597_v55, %v679_v59  ;;  %710 = vst [vmem:[%s1155_s11 + $0x50] sm:$0xff] %v694_v60 }
  0xe8   : > { %711 = vst [vmem:[%s1155_s11 + $0x58] sm:$0xff] %v695_v61 }
  0xe9   : > { %v585_v62 = vpop.f32.mrf.mxu2  ;;  %v598_v63 = vpop.f32.mrf.mxu3 }
  0xed   : > { %v609_v0 = vpop.f32.mrf.mxu0  ;;  %v622_v1 = vpop.f32.mrf.mxu1 }
  0xee   : > { %v610_v2 = vadd.f32 %v609_v0, %v1148_v3  ;;  %v623_v4 = vadd.f32 %v622_v1, %v1148_v3 }
  0xf0   : > { %vm664_vm14 = vcmp.ge.f32.partialorder %v610_v2, 0.0  ;;  %v680_v5 = vmul.f32 0.2, %v610_v2  ;;  %vm665_vm15 = vcmp.ge.f32.partialorder %v623_v4, 0.0  ;;  %v681_v6 = vmul.f32 0.2, %v623_v4 }
  0xf1   : > { %v635_v9 = vpop.f32.mrf.mxu2  ;;  %v648_v10 = vpop.f32.mrf.mxu3 }
  0xf2   : > { %v696_v7 = vsel %vm664_vm14, %v610_v2, %v680_v5  ;;  %v697_v8 = vsel %vm665_vm15, %v623_v4, %v681_v6  ;;  %v636_v11 = vadd.f32 %v635_v9, %v1148_v3  ;;  %v649_v12 = vadd.f32 %v648_v10, %v1148_v3 }
  0xf3   : > { %712 = vst [vmem:[%s1155_s11 + $0x60] sm:$0xff] %v696_v7 }
  0xf4   : > { %713 = vst [vmem:[%s1155_s11 + $0x68] sm:$0xff] %v697_v8  ;;  %vm666_vm0 = vcmp.ge.f32.partialorder %v636_v11, 0.0  ;;  %v682_v15 = vmul.f32 0.2, %v636_v11  ;;  %vm667_vm1 = vcmp.ge.f32.partialorder %v649_v12, 0.0 }
  0xf5   : > { %v611_v13 = vpop.f32.mrf.mxu0  ;;  %v624_v14 = vpop.f32.mrf.mxu1  ;;  %v683_v16 = vmul.f32 0.2, %v649_v12 }
  0xf6   : > { %v698_v17 = vsel %vm666_vm0, %v636_v11, %v682_v15 }
  0xf7   : > { %v699_v18 = vsel %vm667_vm1, %v649_v12, %v683_v16  ;;  %714 = vst [vmem:[%s1155_s11 + $0x70] sm:$0xff] %v698_v17 }
  0xf8   : > { %715 = vst [vmem:[%s1155_s11 + $0x78] sm:$0xff] %v699_v18 }
  0xf9   : > { %v637_v19 = vpop.f32.mrf.mxu2  ;;  %v650_v20 = vpop.f32.mrf.mxu3 }
  0xfa PF: > { %p10_p9 = scmp.ge.s32.totalorder %s976_s16, 4   ;;  %s1201_s12 = smov %s932_s13 }
  0xfb   : > { %s1202_s13 = smov %s985_s19  ;;  %s1203_s14 = smov %s976_s16 }
  0xfc   :  { %12 = sbr.rel (!%p10_p9) target bundleno = 2 (0x2), region = 90 }

// kernel: _lambda_.7
= control target key start
LH: loop header
LB: loop body
LE: loop exit
PB: predicated region body
PF: predicated region fallthrough
CT: control target
= control target key end

     0   :  { %s1613_s24 = smov 0   ;;  %s1615_s25 = smov 0   ;;  %s2211_s0 = inlined_call_operand.vmem [shape: f32[8,2,8,384], index: 0, kind: input, shape index: {}]   ;;  %s2212_s1 = inlined_call_operand.vmem [shape: f32[2,8,384], index: 1, kind: input, shape index: {}]   ;;  %s2213_s2 = inlined_call_operand.vmem [shape: f32[1,384], index: 2, kind: input, shape index: {}]   ;;  %s2214_s3 = inlined_call_operand.vmem [shape: bf16[24,72], index: 3, kind: input, shape index: {}]   ;;  %s2215_s4 = inlined_call_operand.vmem [shape: f32[24,1], index: 4, kind: input, shape index: {}]   ;;  %s2216_s5 = inlined_call_operand.vmem [shape: bf16[16,72], index: 5, kind: input, shape index: {}]   ;;  %s2217_s6 = inlined_call_operand.vmem [shape: bf16[8,72], index: 6, kind: input, shape index: {}]   ;;  %s2218_s7 = inlined_call_operand.vmem [shape: f32[2,8,384], index: 7, kind: output, shape index: {}]  }
   0x1   :  { %s1617_s26 = smov 0   ;;  %s1619_s27 = smov 0  }
   0x2   :  { %s1621_s28 = smov 0  }
   0x3 LB: > { %s26_s29 = sadd.s32 1, %s1554_s26  ;;  %s29_s30 = sadd.s32 1, %s1558_s27  ;;  %s1562_s28 = sphi %s1621_s28, %s17_s28   ;;  %s1558_s27 = sphi %s1619_s27, %s2238_s27   ;;  %s1554_s26 = sphi %s1617_s26, %s2237_s26   ;;  %s1550_s25 = sphi %s1615_s25, %s2236_s25   ;;  %s1546_s24 = sphi %s1613_s24, %s2235_s24  }
   0x4   : > { %p27_p0 = scmp.ge.s32.totalorder %s26_s29, 8  ;;  %p1241_p1 = scmp.ge.s32.totalorder %s1562_s28, 1 }
   0x5   : > { %p265_p2 = scmp.lt.s32.totalorder %s1562_s28, 17 }
   0x6   : > { %s2240_s29 = smov (%p27_p0, %s26_s29), 0  ;;  %s2242_s30 = smov (!%p27_p0, %s29_s30), %s1558_s27 }
   0x7   : > { %p266_p3 = pnand %p1241_p1, %p265_p2  ;;  %p31_p4 = scmp.ge.s32.totalorder %s2242_s30, 2 }
   0x8   : > { %p306_p5 = scmp.lt.s32.totalorder (!%p266_p3), %s1546_s24, 7  ;;  %p308_p6 = scmp.lt.s32.totalorder (!%p266_p3), %s1550_s25, 1 }
   0x9   : > { %s2244_s30 = smov (%p31_p4, %s2242_s30), 0  ;;  %269 = sbr.rel (%p266_p3) target bundleno = 705 (0x2c1), region = 48 }
   0xa   : > { %p1245_p7 = scmp.ne.s32.totalorder (!%p266_p3), %s1546_s24, 0 }
   0xe   : > { %s307_s8 = scalar_select %p306_p5, %s1546_s24, 7 }
   0xf   : > { %s2246_s25 = smov (!%p308_p6, %s1550_s25), 1 }
  0x10   : > { %s1278_s9 = smul.u32 6, %s307_s8 }
  0x11   : > { %s1277_s10 = smul.u32 3, %s2246_s25 }
  0x12   : > { %s1279_s11 = smul.u32 24, %s2246_s25 }
  0x13   : > { %s312_s12 = sadd.s32 %s1278_s9, %s1277_s10  ;;  %329 = sbr.rel (%p1245_p7) target bundleno = 28 (0x1c), region = 52 }
  0x14   : > { %s1242_s13 = sshll.u32 %s312_s12, 3  ;;  %s319_s16 = scalar_lea.vmem %s2212_s1, %s1279_s11 }
  0x15   : > { %s314_s19 = scalar_lea.vmem %s2211_s0, %s1242_s13  ;;  %s1656_s22 = scalar_lea.vmem %s2218_s7, %s1279_s11 }
  0x18   : > { %v330_v0 = vld [vmem:[%s319_s16] sm:$0xff]  ;;  %v331_v1 = vld [vmem:[%s319_s16 + $0x8] sm:$0xff]  ;;  %v332_v2 = vld [vmem:[%s319_s16 + $0x10] sm:$0xff] }
  0x19   : > { %333 = vst [vmem:[#allocation2 + $0x10] sm:$0xff] %v330_v0 }
  0x1a   : > { %334 = vst [vmem:[#allocation2] sm:$0xff] %v331_v1 }
  0x1b   : > { %335 = vst [vmem:[#allocation2 + $0x8] sm:$0xff] %v332_v2 }
  0x1c PF: > { %v1663_v5 = vld [vmem:[%s314_s19] sm:$0xff]  ;;  %v1667_v7 = vld [vmem:[%s314_s19 + $0x8] sm:$0xff]  ;;  %s1564_s23 = smov 109   ;;  %s1565_s25 = smov 110   ;;  %v1674_v9 = vld [vmem:[%s314_s19 + $0x10] sm:$0xff]  ;;  %v345_v15 = vlaneseq  ;;  %vm526_vm1 = vcmask 1043456  }
  0x1d   : > { %v1339_v8 = vpack.i.bf16 %v1667_v7, %v1663_v5  ;;  %v1354_v10 = vpack.i.bf16 %v1674_v9, %v1663_v5  ;;  %s1566_s8 = smov 17   ;;  %s1567_s9 = smov 127   ;;  %vm2221_vm9 = vcmask 588800  }
  0x1e   : > { %s1568_s10 = smov 111   ;;  %s1569_s11 = smov 1   ;;  %v1707_v16 = vand.u32 127, %v345_v15 }
  0x1f   : > { %1340 = vrot.lane.b32.xlu1 %v1339_v8, %s1565_s25  ;;  %1330 = vrot.lane.b32.xlu0 %v1339_v8, %s1564_s23  ;;  %s1570_s12 = smov 18   ;;  %s1571_s13 = smov 19  }
  0x20   : > { %v1659_v3 = vld [vmem:[#allocation2 + $0x10] sm:$0xff]  ;;  %vm441_vm0 = vcmp.lt.s32.totalorder %v1707_v16, 109  ;;  %vm428_vm2 = vcmp.lt.s32.totalorder %v1707_v16, 110  ;;  %vm415_vm3 = vcmp.lt.s32.totalorder %v1707_v16, 111  ;;  %vm402_vm4 = vcmp.lt.s32.totalorder %v1707_v16, 127  ;;  %p1272_p8 = scmp.ne.s32.totalorder %s1546_s24, 7 }
  0x21   : > { %v1661_v4 = vld [vmem:[#allocation2] sm:$0xff]  ;;  %vm373_vm5 = vcmp.lt.s32.totalorder %v1707_v16, 17  ;;  %vm386_vm6 = vcmp.lt.s32.totalorder %v1707_v16, 1  ;;  %vm347_vm7 = vcmp.lt.s32.totalorder %v1707_v16, 19  ;;  %vm2222_vm8 = vcmp.lt.s32.totalorder %v1707_v16, 18 }
  0x22   : > { %v1349_v6 = vpack.i.bf16 %v1661_v4, %v1659_v3  ;;  %v1687_v11 = vld [vmem:[#allocation2 + $0x8] sm:$0xff]  ;;  %v1429_v14 = vpack.i.bf16 %v1661_v4, %v1667_v7 }
  0x23   : > { %v1399_v12 = vpack.i.bf16 %v1687_v11, %v1674_v9  ;;  %v1394_v13 = vpack.i.bf16 %v1687_v11, %v1659_v3 }
  0x24   : > { %1350 = vrot.lane.b32.xlu2 %v1349_v6, %s1564_s23 }
  0x27   : > { %1345 = vrot.lane.b32.xlu1 %v1339_v8, %s1567_s9  ;;  %1335 = vrot.lane.b32.xlu0 %v1339_v8, %s1568_s10 }
  0x2c   : > { %1355 = vrot.lane.b32.xlu2 %v1354_v10, %s1566_s8 }
  0x2f   : > { %1365 = vrot.lane.b32.xlu1 %v1349_v6, %s1568_s10  ;;  %1360 = vrot.lane.b32.xlu0 %v1354_v10, %s1569_s11 }
  0x34   : > { %1370 = vrot.lane.b32.xlu2 %v1349_v6, %s1565_s25 }
  0x37   : > { %1380 = vrot.lane.b32.xlu1 %v1354_v10, %s1570_s12  ;;  %1375 = vrot.lane.b32.xlu0 %v1354_v10, %s1571_s13 }
  0x3c   : > { %1385 = vrot.lane.b32.xlu2 %v1349_v6, %s1567_s9 }
  0x3f   : > { %1395 = vrot.lane.b32.xlu1 %v1394_v13, %s1569_s11  ;;  %1390 = vrot.lane.b32.xlu0 %v1394_v13, %s1566_s8 }
  0x44   : > { %1400 = vrot.lane.b32.xlu2 %v1399_v12, %s1564_s23 }
  0x47   : > { %1410 = vrot.lane.b32.xlu1 %v1394_v13, %s1570_s12  ;;  %1405 = vrot.lane.b32.xlu0 %v1394_v13, %s1571_s13 }
  0x4c   : > { %1415 = vrot.lane.b32.xlu2 %v1399_v12, %s1568_s10 }
  0x4f   : > { %1425 = vrot.lane.b32.xlu1 %v1399_v12, %s1567_s9  ;;  %1420 = vrot.lane.b32.xlu0 %v1399_v12, %s1565_s25 }
  0x54   : > { %1430 = vrot.lane.b32.xlu2 %v1429_v14, %s1566_s8 }
  0x57   : > { %1440 = vrot.lane.b32.xlu1 %v1429_v14, %s1571_s13  ;;  %1435 = vrot.lane.b32.xlu0 %v1429_v14, %s1569_s11 }
  0x5c   : > { %1445 = vrot.lane.b32.xlu2 %v1429_v14, %s1570_s12 }
  0x7e   : > { %v1709_v17 = vpop.permute.xlu2 %1350 }
  0x7f   : > { %v1353_v18 = vunpack.i.h.bf16 %v1709_v17  ;;  %v1352_v19 = vunpack.i.l.bf16 %v1709_v17 }
  0x81   : > { %v687_v20 = vsel %vm441_vm0, %v1352_v19, %v1353_v18 }
  0x82   : > { %v731_v21 = vpack.c.bf16 %v687_v20, %v687_v20 }
  0x84   : > { %v745_v22 = vsel %vm526_vm1, %v731_v21, 0 }
  0x85   : > { %756 = vmatpush.bf16.msra.mxu3 %v745_v22 }
  0x86   : > { %v1721_v23 = vpop.permute.xlu2 %1355 }
  0x87   : > { %v1358_v55 = vunpack.i.h.bf16 %v1721_v23  ;;  %v1357_v56 = vunpack.i.l.bf16 %v1721_v23 }
  0x8e   : > { %v1723_v24 = vpop.permute.xlu2 %1370 }
  0x8f   : > { %v1373_v50 = vunpack.i.h.bf16 %v1723_v24  ;;  %v1372_v51 = vunpack.i.l.bf16 %v1723_v24 }
  0x91   : > { %v1727_v26 = vpop.permute.xlu1 %1340  ;;  %v1331_v27 = vpop.permute.xlu0 %1330  ;;  %v675_v62 = vsel %vm428_vm2, %v1372_v51, %v1373_v50 }
  0x92   : > { %v1333_v28 = vunpack.i.h.bf16 %v1331_v27  ;;  %v1332_v29 = vunpack.i.l.bf16 %v1331_v27  ;;  %v1343_v32 = vunpack.i.h.bf16 %v1727_v26  ;;  %v1342_v33 = vunpack.i.l.bf16 %v1727_v26 }
  0x94   : > { %v443_v30 = vsel %vm441_vm0, %v1332_v29, %v1333_v28  ;;  %v430_v43 = vsel %vm428_vm2, %v1342_v33, %v1343_v32 }
  0x95   : > { %v487_v31 = vpack.c.bf16 %v443_v30, %v443_v30 }
  0x96   : > { %v1725_v25 = vpop.permute.xlu2 %1385 }
  0x97   : > { %v528_v34 = vsel %vm526_vm1, %v487_v31, 0  ;;  %v1388_v58 = vunpack.i.h.bf16 %v1725_v25  ;;  %v1387_v59 = vunpack.i.l.bf16 %v1725_v25 }
  0x98   : > { %539 = vmatpush.bf16.msra.mxu0 %v528_v34 }
  0x99   : > { %v1738_v37 = vpop.permute.xlu1 %1345  ;;  %v1740_v38 = vpop.permute.xlu0 %1335  ;;  %v651_v12 = vsel %vm402_vm4, %v1387_v59, %v1388_v58 }
  0x9a   : > { %v1348_v39 = vunpack.i.h.bf16 %v1738_v37  ;;  %v1347_v40 = vunpack.i.l.bf16 %v1738_v37  ;;  %v1338_v41 = vunpack.i.h.bf16 %v1740_v38  ;;  %v1337_v42 = vunpack.i.l.bf16 %v1740_v38 }
  0x9b   : > { %v725_v15 = vpack.c.bf16 %v651_v12, %v1659_v3 }
  0x9c   : > { %v417_v46 = vsel %vm415_vm3, %v1337_v42, %v1338_v41  ;;  %v404_v49 = vsel %vm402_vm4, %v1347_v40, %v1348_v39 }
  0x9d   : > { %v484_v52 = vpack.c.bf16 %v430_v43, %v417_v46  ;;  %v481_v57 = vpack.c.bf16 %v404_v49, %v1663_v5  ;;  %v376_v5 = vsel %vm373_vm5, %v1358_v55, %v1357_v56 }
  0x9e   : > { %v1734_v35 = vpop.permute.xlu2 %1400 }
  0x9f   : > { %v1402_v36 = vunpack.i.l.bf16 %v1734_v35  ;;  %540 = vmatpush.bf16.msra.mxu0 %v484_v52  ;;  %v1403_v6 = vunpack.i.h.bf16 %v1734_v35 }
  0xa1   : > { %v442_v44 = vsel %vm441_vm0, %v1333_v28, %v1402_v36  ;;  %v444_v45 = vsel %vm441_vm0, %v1402_v36, %v1332_v29  ;;  %v1780_v60 = vpop.permute.xlu1 %1365  ;;  %v1782_v61 = vpop.permute.xlu0 %1360  ;;  %v688_v20 = vsel %vm441_vm0, %v1403_v6, %v1352_v19  ;;  %v1850_v36 = vld [vmem:[%s2214_s3] sm:$0xff] }
  0xa2   : > { %v488_v47 = vpack.c.bf16 %v442_v44, %v442_v44  ;;  %v489_v48 = vpack.c.bf16 %v444_v45, %v444_v45  ;;  %v1368_v63 = vunpack.i.h.bf16 %v1780_v60  ;;  %v1367_v0 = vunpack.i.l.bf16 %v1780_v60 }
  0xa3   : > { %v1363_v1 = vunpack.i.h.bf16 %v1782_v61  ;;  %v1362_v2 = vunpack.i.l.bf16 %v1782_v61  ;;  %541 = vmatpush.bf16.msra.mxu0 %v481_v57  ;;  %v733_v31 = vpack.c.bf16 %v688_v20, %v688_v20 }
  0xa4   : > { %v531_v53 = vsel %vm526_vm1, %v488_v47, 0  ;;  %v534_v54 = vsel %vm526_vm1, %v489_v48, 0  ;;  %v663_v10 = vsel %vm415_vm3, %v1367_v0, %v1368_v63 }
  0xa5   : > { %557 = vmatpush.bf16.msra.mxu1 %v531_v53  ;;  %575 = vmatpush.bf16.msra.mxu2 %v534_v54  ;;  %v389_v8 = vsel %vm386_vm6, %v1363_v1, %v1362_v2  ;;  %v728_v14 = vpack.c.bf16 %v675_v62, %v663_v10  ;;  %v751_v43 = vsel %vm526_vm1, %v733_v31, 0  ;;  %v492_v62 = vld [vmem:[%s2214_s3 + $0x8] sm:$0xf]  ;;  %v1572_v10 = vmov 0  }
  0xa6   : > { %v478_v13 = vpack.c.bf16 %v389_v8, %v376_v5  ;;  %v1416_v52 = vpop.permute.xlu2 %1415  ;;  %v494_v5 = vld [vmem:[%s2215_s4 + $0x8] sm:$0xff]  ;;  %v686_v8 = vsel %vm441_vm0, %v1353_v18, %v1403_v6  ;;  %1449 = vset.pattern.permute.xlu0 %v1572_v10  ;;  %1490 = vset.pattern.permute.xlu1 %v1572_v10 }
  0xa7   : > { %757 = vmatpush.bf16.msra.mxu3 %v728_v14  ;;  %v516_v14 = vunpack.c.l.b16 %v492_v62  ;;  %503 = vperm.xlu0 %1449, %v494_v5  }
  0xa8   : > { %542 = vmatpush.bf16.msra.mxu0 %v478_v13 }
  0xa9   : > { %v1825_v21 = vpop.permute.xlu1 %1380  ;;  %v1827_v22 = vpop.permute.xlu0 %1375 }
  0xaa   : > { %v1383_v27 = vunpack.i.h.bf16 %v1825_v21  ;;  %v1382_v28 = vunpack.i.l.bf16 %v1825_v21  ;;  %v1378_v29 = vunpack.i.h.bf16 %v1827_v22  ;;  %v1377_v30 = vunpack.i.l.bf16 %v1827_v22 }
  0xab   : > { %758 = vmatpush.bf16.msra.mxu3 %v725_v15 }
  0xac   : > { %v350_v19 = vsel %vm347_vm7, %v1378_v29, %v1377_v30  ;;  %v363_v34 = vsel %vm2222_vm8, %v1383_v27, %v1382_v28 }
  0xad   : > { %v475_v35 = vpack.c.bf16 %v363_v34, %v350_v19  ;;  %v732_v19 = vpack.c.bf16 %v686_v8, %v686_v8  ;;  %v1417_v34 = vunpack.i.l.bf16 %v1416_v52 }
  0xaf   : > { %543 = vmatpush.bf16.msra.mxu0 %v475_v35  ;;  %v748_v62 = vsel %vm526_vm1, %v732_v19, 0  ;;  %v416_v10 = vsel %vm415_vm3, %v1338_v41, %v1417_v34 }
  0xb1   : > { %v1853_v44 = vpop.permute.xlu1 %1395  ;;  %v1855_v45 = vpop.permute.xlu0 %1390 }
  0xb2   : > { %v1398_v46 = vunpack.i.h.bf16 %v1853_v44  ;;  %v1397_v47 = vunpack.i.l.bf16 %v1853_v44  ;;  %v1393_v48 = vunpack.i.h.bf16 %v1855_v45  ;;  %v1392_v49 = vunpack.i.l.bf16 %v1855_v45  ;;  %1250 = vmatmul.msk.bf16.vlgmr.msra.gmra.mxu0 %vm2221_vm9, %v1850_v36 }
  0xb3   : > { %784 = vmatpush.bf16.msrb.mxu0 %v751_v43  ;;  %v1431_v43 = vpop.permute.xlu2 %1430 }
  0xb4   : > { %v625_v53 = vsel %vm373_vm5, %v1393_v48, %v1392_v49  ;;  %v637_v54 = vsel %vm386_vm6, %v1398_v46, %v1397_v47 }
  0xb5   : > { %v722_v57 = vpack.c.bf16 %v637_v54, %v625_v53  ;;  %v1908_v53 = vld [vmem:[%s2216_s5] sm:$0xff]  ;;  %v1910_v54 = vpack.c.b16 %v516_v14, %v516_v14  ;;  %v418_v14 = vsel %vm415_vm3, %v1417_v34, %v1337_v42 }
  0xb7   : > { %759 = vmatpush.bf16.msra.mxu3 %v722_v57  ;;  %v1418_v57 = vunpack.i.h.bf16 %v1416_v52  ;;  %v1432_v52 = vunpack.i.l.bf16 %v1431_v43 }
  0xb9   : > { %v1885_v12 = vpop.permute.xlu1 %1410  ;;  %v1887_v13 = vpop.permute.xlu0 %1405  ;;  %v662_v41 = vsel %vm415_vm3, %v1368_v63, %v1418_v57  ;;  %v664_v19 = vsel %vm415_vm3, %v1418_v57, %v1367_v0  ;;  %v375_v37 = vsel %vm373_vm5, %v1357_v56, %v1432_v52  ;;  %v374_v25 = vsel %vm373_vm5, %v1432_v52, %v1358_v55 }
  0xba   : > { %v2219_v15 = vunpack.i.h.bf16 %v1885_v12  ;;  %v2220_v20 = vunpack.i.l.bf16 %v1885_v12  ;;  %v1408_v31 = vunpack.i.h.bf16 %v1887_v13  ;;  %v1407_v17 = vunpack.i.l.bf16 %v1887_v13 }
  0xbc   : > { %v601_v18 = vsel %vm347_vm7, %v1408_v31, %v1407_v17  ;;  %v613_v6 = vsel %vm2222_vm8, %v2219_v15, %v2220_v20 }
  0xbd   : > { %v719_v35 = vpack.c.bf16 %v613_v6, %v601_v18 }
  0xbf   : > { %760 = vmatpush.bf16.msra.mxu3 %v719_v35 }
  0xc1   : > { %v1426_v5 = vpop.permute.xlu1 %1425  ;;  %v1421_v8 = vpop.permute.xlu0 %1420 }
  0xc2   : > { %v1428_v18 = vunpack.i.h.bf16 %v1426_v5  ;;  %v1427_v6 = vunpack.i.l.bf16 %v1426_v5  ;;  %v1423_v15 = vunpack.i.h.bf16 %v1421_v8  ;;  %v1422_v20 = vunpack.i.l.bf16 %v1421_v8  ;;  %1260 = vmatmul.msk.bf16.vlgmr.msra.gmra.mxu3 %vm2221_vm9, %v1908_v53  ;;  %1251 = vmatmul.msk.bf16.gmra.mxu0 %vm2221_vm9, %v1910_v54 }
  0xc3   : > { %770 = vmatpush.bf16.msrb.mxu3 %v748_v62 }
  0xc4   : > { %v429_v35 = vsel %vm428_vm2, %v1343_v32, %v1422_v20  ;;  %v431_v38 = vsel %vm428_vm2, %v1422_v20, %v1342_v33  ;;  %v674_v42 = vsel %vm428_vm2, %v1373_v50, %v1423_v15  ;;  %v676_v60 = vsel %vm428_vm2, %v1423_v15, %v1372_v51  ;;  %v1446_v51 = vpop.permute.xlu2 %1445 }
  0xc5   : > { %v485_v63 = vpack.c.bf16 %v429_v35, %v416_v10  ;;  %v486_v0 = vpack.c.bf16 %v431_v38, %v418_v14  ;;  %v729_v34 = vpack.c.bf16 %v674_v42, %v662_v41  ;;  %v730_v57 = vpack.c.bf16 %v676_v60, %v664_v19 }
  0xc6   : > { %v403_v26 = vsel %vm402_vm4, %v1348_v39, %v1427_v6  ;;  %v405_v32 = vsel %vm402_vm4, %v1427_v6, %v1347_v40  ;;  %v650_v24 = vsel %vm402_vm4, %v1388_v58, %v1428_v18  ;;  %v1433_v33 = vunpack.i.h.bf16 %v1431_v43 }
  0xc7   : > { %558 = vmatpush.bf16.msra.mxu1 %v485_v63  ;;  %576 = vmatpush.bf16.msra.mxu2 %v486_v0  ;;  %v652_v50 = vsel %vm402_vm4, %v1428_v18, %v1387_v59  ;;  %v482_v58 = vpack.c.bf16 %v403_v26, %v1667_v7  ;;  %v483_v15 = vpack.c.bf16 %v405_v32, %v1674_v9  ;;  %v1448_v8 = vunpack.i.h.bf16 %v1446_v51 }
  0xc8   : > { %771 = vmatpush.bf16.msrb.mxu3 %v729_v34  ;;  %785 = vmatpush.bf16.msrb.mxu0 %v730_v57  ;;  %v726_v20 = vpack.c.bf16 %v650_v24, %v1661_v4  ;;  %v727_v5 = vpack.c.bf16 %v652_v50, %v1687_v11  ;;  %v624_v7 = vsel %vm373_vm5, %v1392_v49, %v1433_v33  ;;  %v1447_v23 = vunpack.i.l.bf16 %v1446_v51 }
  0xc9   : > { %v1441_v39 = vpop.permute.xlu1 %1440  ;;  %v1436_v40 = vpop.permute.xlu0 %1435  ;;  %v623_v9 = vsel %vm373_vm5, %v1433_v33, %v1393_v48  ;;  %v2224_v14 = vunpack.i.h.bf16 %v1885_v12 }
  0xca   : > { %v1442_v59 = vunpack.i.l.bf16 %v1441_v39  ;;  %v1438_v43 = vunpack.i.h.bf16 %v1436_v40  ;;  %v1437_v62 = vunpack.i.l.bf16 %v1436_v40  ;;  %v1443_v56 = vunpack.i.h.bf16 %v1441_v39 }
  0xcb   : > { %559 = vmatpush.bf16.msra.mxu1 %v482_v58  ;;  %577 = vmatpush.bf16.msra.mxu2 %v483_v15  ;;  %v362_v44 = vsel %vm2222_vm8, %v1382_v28, %v1447_v23  ;;  %v361_v22 = vsel %vm2222_vm8, %v1447_v23, %v1383_v27  ;;  %v611_v21 = vsel %vm2222_vm8, %v1448_v8, %v2224_v14 }
  0xcc   : > { %772 = vmatpush.bf16.msrb.mxu3 %v726_v20  ;;  %786 = vmatpush.bf16.msrb.mxu0 %v727_v5  ;;  %v388_v55 = vsel %vm386_vm6, %v1362_v2, %v1437_v62  ;;  %v387_v10 = vsel %vm386_vm6, %v1437_v62, %v1363_v1  ;;  %v636_v45 = vsel %vm386_vm6, %v1397_v47, %v1438_v43  ;;  %v2223_v47 = vunpack.i.l.bf16 %v1885_v12 }
  0xcd   : > { %v479_v49 = vpack.c.bf16 %v388_v55, %v375_v37  ;;  %v480_v48 = vpack.c.bf16 %v387_v10, %v374_v25  ;;  %v723_v18 = vpack.c.bf16 %v636_v45, %v624_v7  ;;  %v635_v6 = vsel %vm386_vm6, %v1438_v43, %v1398_v46 }
  0xce   : > { %v724_v52 = vpack.c.bf16 %v635_v6, %v623_v9  ;;  %v349_v61 = vsel %vm347_vm7, %v1377_v30, %v1442_v59  ;;  %v348_v1 = vsel %vm347_vm7, %v1442_v59, %v1378_v29  ;;  %v600_v2 = vsel %vm347_vm7, %v1407_v17, %v1443_v56 }
  0xcf   : > { %560 = vmatpush.bf16.msra.mxu1 %v479_v49  ;;  %578 = vmatpush.bf16.msra.mxu2 %v480_v48  ;;  %v599_v29 = vsel %vm347_vm7, %v1443_v56, %v1408_v31  ;;  %v476_v30 = vpack.c.bf16 %v362_v44, %v349_v61  ;;  %v477_v46 = vpack.c.bf16 %v361_v22, %v348_v1 }
  0xd0   : > { %773 = vmatpush.bf16.msrb.mxu3 %v723_v18  ;;  %787 = vmatpush.bf16.msrb.mxu0 %v724_v52  ;;  %v612_v17 = vsel %vm2222_vm8, %v2223_v47, %v1448_v8  ;;  %v721_v41 = vpack.c.bf16 %v611_v21, %v599_v29 }
  0xd1   : > { %v720_v28 = vpack.c.bf16 %v612_v17, %v600_v2 }
  0xd3   : > { %561 = vmatpush.bf16.msra.mxu1 %v476_v30  ;;  %579 = vmatpush.bf16.msra.mxu2 %v477_v46 }
  0xd4   : > { %774 = vmatpush.bf16.msrb.mxu3 %v720_v28  ;;  %788 = vmatpush.bf16.msrb.mxu0 %v721_v41 }
  0xd6   : > { %1252 = vmatmul.msk.bf16.vlgmr.msra.gmra.mxu1 %vm2221_vm9, %v1850_v36  ;;  %1254 = vmatmul.msk.bf16.vlgmr.msra.gmra.mxu2 %vm2221_vm9, %v1850_v36 }
  0xd7   : > { %1261 = vmatmul.msk.bf16.vlgmr.msrb.gmra.mxu3 %vm2221_vm9, %v1908_v53  ;;  %1262 = vmatmul.msk.bf16.vlgmr.msrb.gmra.mxu0 %vm2221_vm9, %v1908_v53 }
  0xe6   : > { %1255 = vmatmul.msk.bf16.gmra.mxu2 %vm2221_vm9, %v1910_v54  ;;  %1253 = vmatmul.msk.bf16.gmra.mxu1 %vm2221_vm9, %v1910_v54 }
 0x119   : > { %v504_v36 = vpop.permute.xlu0 %503 }
 0x12f   : > { %v2045_v27 = vpop.f32.mrf.mxu0 }
 0x137   : > { %v547_v12 = vpop.f32.mrf.mxu0 }
 0x138   : > { %v548_v35 = vadd.f32 %v547_v12, %v504_v36 }
 0x13f   : > { %v2047_v13 = vpop.f32.mrf.mxu0 }
 0x145   : > { %v2049_v31 = vpop.f32.mrf.mxu3 }
 0x147   : > { %v552_v19 = vpop.f32.mrf.mxu0 }
 0x148   : > { %v495_v19 = vld [vmem:[%s2215_s4 + $0x10] sm:$0xff] }
 0x14d   : > { %v764_v38 = vpop.f32.mrf.mxu3 }
 0x14e   : > { %v798_v42 = vadd.f32 %v764_v38, %v548_v35 }
 0x150   : > { %v1266_v60 = vmul.f32 -1.442695, %v798_v42 }
 0x152   : > { %1491 = vpow2.f32 %v1266_v60 }
 0x153   : > { %v2051_v53 = vpop.f32.mrf.mxu1 }
 0x154   : > { %v2053_v63 = vpop.f32.mrf.mxu0 }
 0x158   : > { %v1492_v34 = vpop.eup %1491 }
 0x159   : > { %v2055_v0 = vpop.f32.mrf.mxu2  ;;  %v867_v57 = vadd.f32 1.0, %v1492_v34 }
 0x15a   : > { %v2057_v54 = vpop.f32.mrf.mxu3 }
 0x15b   : > { %v565_v26 = vpop.f32.mrf.mxu1  ;;  %1493 = vrcp.f32 %v867_v57  ;;  %v881_v23 = vand.u32 2147483648, %v867_v57  ;;  %vm875_vm11 = vweird.f32 %v867_v57  ;;  %v879_v55 = vand.u32 2147483647, %v867_v57 }
 0x15c   : > { %v566_v32 = vadd.f32 %v565_v26, %v504_v36  ;;  %v792_v33 = vpop.f32.mrf.mxu0 }
 0x15d   : > { %v882_v52 = vor.u32 1.1754944e-38, %v881_v23  ;;  %vm880_vm14 = vcmp.eq.f32.partialorder %v879_v55, 8.507059e+37 }
 0x161   : > { %v583_v24 = vpop.f32.mrf.mxu2  ;;  %v1494_v15 = vpop.eup %1493 }
 0x162   : > { %v584_v50 = vadd.f32 %v583_v24, %v504_v36  ;;  %v778_v51 = vpop.f32.mrf.mxu3  ;;  %v871_v20 = vmul.f32 %v1494_v15, %v867_v57  ;;  %vm876_vm10 = vweird.f32 %v1494_v15 }
 0x163   : > { %v799_v37 = vadd.f32 %v778_v51, %v566_v32  ;;  %vm877_vm12 = vmor %vm875_vm11, %vm876_vm10 }
 0x164   : > { %v800_v39 = vadd.f32 %v792_v33, %v584_v50  ;;  %v872_v62 = vsub.f32 1.0, %v871_v20 }
 0x165   : > { %v1267_v40 = vmul.f32 -1.442695, %v799_v37 }
 0x166   : > { %v1268_v58 = vmul.f32 -1.442695, %v800_v39  ;;  %v873_v8 = vmul.f32 %v1494_v15, %v872_v62 }
 0x167   : > { %1495 = vpow2.f32 %v1267_v40 }
 0x168   : > { %1497 = vpow2.f32 %v1268_v58  ;;  %v874_v7 = vadd.f32 %v1494_v15, %v873_v8 }
 0x16a   : > { %v878_v48 = vsel %vm877_vm12, %v1494_v15, %v874_v7 }
 0x16b   : > { %v883_v2 = vsel %vm880_vm14, %v882_v52, %v878_v48 }
 0x16c   : > { %v2060_v30 = vmul.f32 %v883_v2, %v1659_v3 }
 0x16d   : > { %v1496_v25 = vpop.eup %1495 }
 0x16e   : > { %v1498_v59 = vpop.eup %1497  ;;  %v868_v43 = vadd.f32 1.0, %v1496_v25 }
 0x16f   : > { %v869_v5 = vadd.f32 1.0, %v1498_v59 }
 0x170   : > { %1499 = vrcp.f32 %v868_v43  ;;  %v896_v49 = vand.u32 2147483648, %v868_v43  ;;  %v894_v6 = vand.u32 2147483647, %v868_v43  ;;  %vm890_vm15 = vweird.f32 %v868_v43 }
 0x171   : > { %1501 = vrcp.f32 %v869_v5  ;;  %v911_v28 = vand.u32 2147483648, %v869_v5  ;;  %v909_v3 = vand.u32 2147483647, %v869_v5 }
 0x172   : > { %v897_v44 = vor.u32 1.1754944e-38, %v896_v49  ;;  %vm895_vm8 = vcmp.eq.f32.partialorder %v894_v6, 8.507059e+37 }
 0x173   : > { %vm910_vm11 = vcmp.eq.f32.partialorder %v909_v3, 8.507059e+37 }
 0x176   : > { %v1500_v56 = vpop.eup %1499 }
 0x177   : > { %v886_v9 = vmul.f32 %v1500_v56, %v868_v43  ;;  %v1502_v45 = vpop.eup %1501  ;;  %vm891_vm13 = vweird.f32 %v1500_v56 }
 0x178   : > { %v901_v1 = vmul.f32 %v1502_v45, %v869_v5  ;;  %vm892_vm9 = vmor %vm890_vm15, %vm891_vm13 }
 0x179   : > { %v887_v10 = vsub.f32 1.0, %v886_v9 }
 0x17a   : > { %v902_v47 = vsub.f32 1.0, %v901_v1 }
 0x17b   : > { %v888_v18 = vmul.f32 %v1500_v56, %v887_v10 }
 0x17c   : > { %v903_v14 = vmul.f32 %v1502_v45, %v902_v47 }
 0x17d   : > { %v889_v61 = vadd.f32 %v1500_v56, %v888_v18 }
 0x17e   : > { %v904_v21 = vadd.f32 %v1502_v45, %v903_v14 }
 0x17f   : > { %v893_v22 = vsel %vm892_vm9, %v1500_v56, %v889_v61  ;;  %vm906_vm9 = vweird.f32 %v1502_v45 }
 0x180   : > { %v898_v29 = vsel %vm895_vm8, %v897_v44, %v893_v22  ;;  %vm905_vm8 = vweird.f32 %v869_v5  ;;  %v2126_v44 = vpop.f32.mrf.mxu1  ;;  %v2128_v22 = vpop.f32.mrf.mxu2 }
 0x181   : > { %v2063_v46 = vmul.f32 %v898_v29, %v1661_v4  ;;  %vm907_vm10 = vmor %vm905_vm8, %vm906_vm9  ;;  %v912_v4 = vor.u32 1.1754944e-38, %v911_v28 }
 0x182   : > { %v908_v41 = vsel %vm907_vm10, %v1502_v45, %v904_v21 }
 0x183   : > { %v1465_v17 = vpack.i.bf16 %v2063_v46, %v2060_v30  ;;  %v913_v12 = vsel %vm910_vm11, %v912_v4, %v908_v41 }
 0x184   : > { %v2074_v36 = vmul.f32 %v913_v12, %v1687_v11  ;;  %v493_v11 = vld [vmem:[%s2215_s4] sm:$0xff] }
 0x185   : > { %1466 = vrot.lane.b32.xlu2 %v1465_v17, %s1567_s9  ;;  %1461 = vrot.lane.b32.xlu0 %v1465_v17, %s1565_s25 }
 0x186   : > { %1451 = vrot.lane.b32.xlu1 %v1465_v17, %s1564_s23 }
 0x18d   : > { %1481 = vrot.lane.b32.xlu2 %v1465_v17, %s1571_s13  ;;  %1476 = vrot.lane.b32.xlu0 %v1465_v17, %s1569_s11 }
 0x18e   : > { %1456 = vrot.lane.b32.xlu1 %v1465_v17, %s1568_s10 }
 0x195   : > { %1009 = vrot.lane.b32.xlu2 %v2074_v36, %s1564_s23  ;;  %973 = vrot.lane.b32.xlu0 %v2074_v36, %s1567_s9 }
 0x196   : > { %1471 = vrot.lane.b32.xlu1 %v1465_v17, %s1566_s8 }
 0x19d   : > { %985 = vrot.lane.b32.xlu2 %v2074_v36, %s1568_s10  ;;  %922 = vrot.lane.b32.xlu0 %v2074_v36, %s1571_s13 }
 0x19e   : > { %997 = vrot.lane.b32.xlu1 %v2074_v36, %s1565_s25 }
 0x1a5   : > { %946 = vrot.lane.b32.xlu2 %v2074_v36, %s1566_s8  ;;  %498 = vperm.xlu0 %1449, %v493_v11  }
 0x1a6   : > { %958 = vrot.lane.b32.xlu1 %v2074_v36, %s1569_s11 }
 0x1ad   : > { %934 = vrot.lane.b32.xlu2 %v2074_v36, %s1570_s12 }
 0x1ae   : > { %1486 = vrot.lane.b32.xlu1 %v1465_v17, %s1570_s12 }
 0x1b6   : > { %508 = vperm.xlu1 %1490, %v495_v19  }
 0x1df   : > { %v1467_v35 = vpop.permute.xlu2 %1466 }
 0x1e0   : > { %v1469_v59 = vunpack.i.h.bf16 %v1467_v35  ;;  %v1468_v43 = vunpack.i.l.bf16 %v1467_v35 }
 0x1e2   : > { %v976_v9 = vsel %vm402_vm4, %v1468_v43, %v1469_v59 }
 0x1e3   : > { %v1050_v10 = vpack.c.bf16 %v976_v9, %v2060_v30 }
 0x1e7   : > { %v2100_v38 = vpop.permute.xlu2 %1481 }
 0x1ef   : > { %v1010_v57 = vpop.permute.xlu2 %1009 }
 0x1f7   : > { %v1462_v33 = vpop.permute.xlu0 %1461  ;;  %v986_v45 = vpop.permute.xlu2 %985 }
 0x1f8   : > { %v1452_v42 = vpop.permute.xlu1 %1451  ;;  %v1464_v15 = vunpack.i.h.bf16 %v1462_v33  ;;  %v1463_v20 = vunpack.i.l.bf16 %v1462_v33 }
 0x1f9   : > { %v1454_v60 = vunpack.i.h.bf16 %v1452_v42  ;;  %v1453_v34 = vunpack.i.l.bf16 %v1452_v42 }
 0x1fa   : > { %v1000_v56 = vsel %vm428_vm2, %v1463_v20, %v1464_v15 }
 0x1fb   : > { %v1012_v26 = vsel %vm441_vm0, %v1453_v34, %v1454_v60  ;;  %v1011_v32 = vsel %vm441_vm0, %v1454_v60, %v1010_v57  ;;  %v1013_v24 = vsel %vm441_vm0, %v1010_v57, %v1453_v34  ;;  %v570_v34 = vpop.f32.mrf.mxu1  ;;  %v588_v57 = vpop.f32.mrf.mxu2  ;;  %vm2225_vm0 = vcmp.lt.s32.totalorder %v1707_v16, 18 }
 0x1fc   : > { %v1056_v50 = vpack.c.bf16 %v1012_v26, %v1012_v26  ;;  %v1057_v51 = vpack.c.bf16 %v1011_v32, %v1011_v32  ;;  %v1058_v37 = vpack.c.bf16 %v1013_v24, %v1013_v24  ;;  %v1484_v32 = vunpack.i.h.bf16 %v2100_v38 }
 0x1fd   : > { %v1483_v24 = vunpack.i.l.bf16 %v2100_v38 }
 0x1fe   : > { %v1064_v39 = vsel %vm526_vm1, %v1056_v50, 0  ;;  %v1067_v40 = vsel %vm526_vm1, %v1057_v51, 0  ;;  %v1070_v58 = vsel %vm526_vm1, %v1058_v37, 0  ;;  %vm2226_vm1 = vmmov %vm2225_vm0 }
 0x1ff   : > { %1075 = vmatpush.bf16.msrb.mxu1 %v1064_v39  ;;  %1088 = vmatpush.bf16.msrb.mxu2 %v1067_v40  ;;  %v1477_v23 = vpop.permute.xlu0 %1476  ;;  %v947_v4 = vpop.permute.xlu2 %946 }
 0x200   : > { %1101 = vmatpush.bf16.msra.mxu3 %v1070_v58  ;;  %v1457_v25 = vpop.permute.xlu1 %1456  ;;  %v1479_v14 = vunpack.i.h.bf16 %v1477_v23  ;;  %v1478_v21 = vunpack.i.l.bf16 %v1477_v23  ;;  %v925_v58 = vsel %vm347_vm7, %v1483_v24, %v1484_v32 }
 0x201   : > { %v1459_v62 = vunpack.i.h.bf16 %v1457_v25  ;;  %v1458_v5 = vunpack.i.l.bf16 %v1457_v25 }
 0x203   : > { %v988_v8 = vsel %vm415_vm3, %v1458_v5, %v1459_v62  ;;  %v989_v18 = vsel %vm415_vm3, %v986_v45, %v1458_v5  ;;  %v987_v61 = vsel %vm415_vm3, %v1459_v62, %v986_v45  ;;  %v1059_v5 = vld [vmem:[%s2217_s6] sm:$0xf]  ;;  %vm2228_vm3 = vcmask 588800  }
 0x204   : > { %v1053_v7 = vpack.c.bf16 %v1000_v56, %v988_v8 }
 0x206   : > { %1076 = vmatpush.bf16.msrb.mxu1 %v1053_v7 }
 0x207   : > { %v974_v49 = vpop.permute.xlu0 %973  ;;  %v935_v39 = vpop.permute.xlu2 %934 }
 0x208   : > { %v1472_v55 = vpop.permute.xlu1 %1471  ;;  %v975_v29 = vsel %vm402_vm4, %v1469_v59, %v974_v49  ;;  %v977_v30 = vsel %vm402_vm4, %v974_v49, %v1468_v43  ;;  %vm2229_vm4 = vmmov %vm2228_vm3 }
 0x209   : > { %v1474_v47 = vunpack.i.h.bf16 %v1472_v55  ;;  %v1473_v17 = vunpack.i.l.bf16 %v1472_v55  ;;  %v1052_v28 = vpack.c.bf16 %v977_v30, %v2074_v36  ;;  %v1051_v3 = vpack.c.bf16 %v975_v29, %v2063_v46 }
 0x20a   : > { %1077 = vmatpush.bf16.msrb.mxu1 %v1050_v10  ;;  %v961_v36 = vsel %vm386_vm6, %v1478_v21, %v1479_v14 }
 0x20b   : > { %v949_v41 = vsel %vm373_vm5, %v1473_v17, %v1474_v47  ;;  %v948_v11 = vsel %vm373_vm5, %v1474_v47, %v947_v4  ;;  %v950_v42 = vsel %vm373_vm5, %v947_v4, %v1473_v17  ;;  %vm2230_vm5 = vmmov %vm2228_vm3 }
 0x20c   : > { %v1048_v60 = vpack.c.bf16 %v961_v36, %v949_v41 }
 0x20f   : > { %v923_v33 = vpop.permute.xlu0 %922 }
 0x210   : > { %v998_v48 = vpop.permute.xlu1 %997  ;;  %v924_v40 = vsel %vm347_vm7, %v1484_v32, %v923_v33 }
 0x211   : > { %v999_v6 = vsel %vm428_vm2, %v1464_v15, %v998_v48  ;;  %v1001_v52 = vsel %vm428_vm2, %v998_v48, %v1463_v20  ;;  %v926_v15 = vsel %vm347_vm7, %v923_v33, %v1483_v24  ;;  %vm2227_vm2 = vmmov %vm2225_vm0 }
 0x212   : > { %v1055_v1 = vpack.c.bf16 %v1001_v52, %v989_v18  ;;  %v1054_v2 = vpack.c.bf16 %v999_v6, %v987_v61 }
 0x214   : > { %1089 = vmatpush.bf16.msrb.mxu2 %v1054_v2  ;;  %1102 = vmatpush.bf16.msra.mxu3 %v1055_v1 }
 0x217   : > { %v499_v8 = vpop.permute.xlu0 %498 }
 0x218   : > { %v959_v12 = vpop.permute.xlu1 %958  ;;  %1090 = vmatpush.bf16.msrb.mxu2 %v1051_v3  ;;  %1103 = vmatpush.bf16.msra.mxu3 %v1052_v28  ;;  %v546_v16 = vadd.f32 %v2045_v27, %v499_v8  ;;  %v564_v7 = vadd.f32 %v2051_v53, %v499_v8  ;;  %v582_v9 = vadd.f32 %v2055_v0, %v499_v8 }
 0x219   : > { %v960_v19 = vsel %vm386_vm6, %v1479_v14, %v959_v12  ;;  %v962_v35 = vsel %vm386_vm6, %v959_v12, %v1478_v21 }
 0x21a   : > { %v1049_v46 = vpack.c.bf16 %v960_v19, %v948_v11  ;;  %v1047_v26 = vpack.c.bf16 %v962_v35, %v950_v42  ;;  %v795_v56 = vadd.f32 %v2049_v31, %v546_v16  ;;  %v796_v55 = vadd.f32 %v2057_v54, %v564_v7 }
 0x21b   : > { %v797_v10 = vadd.f32 %v2053_v63, %v582_v9 }
 0x21c   : > { %1091 = vmatpush.bf16.msrb.mxu2 %v1048_v60  ;;  %1104 = vmatpush.bf16.msra.mxu3 %v1049_v46  ;;  %v1263_v23 = vmul.f32 -1.442695, %v795_v56  ;;  %v1264_v45 = vmul.f32 -1.442695, %v796_v55 }
 0x21d   : > { %1078 = vmatpush.bf16.msrb.mxu1 %v1047_v26  ;;  %v1265_v49 = vmul.f32 -1.442695, %v797_v10 }
 0x21e   : > { %1503 = vpow2.f32 %v1263_v23 }
 0x21f   : > { %1505 = vpow2.f32 %v1264_v45 }
 0x220   : > { %v1487_v50 = vpop.permute.xlu1 %1486  ;;  %1507 = vpow2.f32 %v1265_v49 }
 0x221   : > { %v1489_v51 = vunpack.i.h.bf16 %v1487_v50  ;;  %v1488_v37 = vunpack.i.l.bf16 %v1487_v50 }
 0x223   : > { %v938_v20 = vsel %vm2225_vm0, %v935_v39, %v1488_v37  ;;  %v937_v38 = vsel %vm2226_vm1, %v1488_v37, %v1489_v51  ;;  %v936_v25 = vsel %vm2227_vm2, %v1489_v51, %v935_v39 }
 0x224   : > { %v1044_v59 = vpack.c.bf16 %v938_v20, %v926_v15  ;;  %v1045_v43 = vpack.c.bf16 %v937_v38, %v925_v58  ;;  %v1046_v62 = vpack.c.bf16 %v936_v25, %v924_v40  ;;  %v1504_v48 = vpop.eup %1503  ;;  %v1129_v40 = vld [vmem:[%s2213_s2] sm:$0x7] }
 0x225   : > { %v810_v18 = vadd.f32 1.0, %v1504_v48  ;;  %v1506_v6 = vpop.eup %1505  ;;  %v1131_v16 = vperm.slane %v1129_v40, 0  ;;  %v1522_v48 = vld [vmem:[#allocation2] sm:$0xff] }
 0x226   : > { %1079 = vmatpush.bf16.msrb.mxu1 %v1044_v59  ;;  %1092 = vmatpush.bf16.msrb.mxu2 %v1045_v43  ;;  %v1508_v27 = vpop.eup %1507  ;;  %v811_v31 = vadd.f32 1.0, %v1506_v6 }
 0x227   : > { %1105 = vmatpush.bf16.msra.mxu3 %v1046_v62  ;;  %1509 = vrcp.f32 %v810_v18  ;;  %v812_v52 = vadd.f32 1.0, %v1508_v27  ;;  %v824_v21 = vand.u32 2147483648, %v810_v18  ;;  %vm818_vm7 = vweird.f32 %v810_v18  ;;  %v1521_v62 = vld [vmem:[#allocation2 + $0x10] sm:$0xff] }
 0x228   : > { %1511 = vrcp.f32 %v811_v31  ;;  %v509_v17 = vpop.permute.xlu1 %508  ;;  %v822_v28 = vand.u32 2147483647, %v810_v18  ;;  %vm833_vm13 = vweird.f32 %v811_v31  ;;  %v839_v60 = vand.u32 2147483648, %v811_v31 }
 0x229   : > { %1269 = vmatmul.msk.bf16.vlgmr.msrb.gmra.mxu1 %vm2228_vm3, %v1059_v5  ;;  %1270 = vmatmul.msk.bf16.vlgmr.msrb.gmra.mxu2 %vm2229_vm4, %v1059_v5  ;;  %1513 = vrcp.f32 %v812_v52  ;;  %v551_v4 = vadd.f32 %v2047_v13, %v509_v17  ;;  %v825_v19 = vor.u32 1.1754944e-38, %v824_v21  ;;  %v854_v34 = vand.u32 2147483648, %v812_v52 }
 0x22a   : > { %1271 = vmatmul.msk.bf16.vlgmr.msra.gmra.mxu3 %vm2230_vm5, %v1059_v5  ;;  %vm823_vm15 = vcmp.eq.f32.partialorder %v822_v28, 8.507059e+37  ;;  %v837_v13 = vand.u32 2147483647, %v811_v31  ;;  %vm848_vm10 = vweird.f32 %v812_v52  ;;  %v852_v26 = vand.u32 2147483647, %v812_v52 }
 0x22b   : > { %v569_v32 = vadd.f32 %v2126_v44, %v509_v17  ;;  %v587_v33 = vadd.f32 %v2128_v22, %v509_v17  ;;  %v840_v58 = vor.u32 1.1754944e-38, %v839_v60  ;;  %v855_v15 = vor.u32 1.1754944e-38, %v854_v34 }
 0x22c   : > { %vm838_vm0 = vcmp.eq.f32.partialorder %v837_v13, 8.507059e+37  ;;  %vm853_vm1 = vcmp.eq.f32.partialorder %v852_v26, 8.507059e+37  ;;  %v1132_v27 = vperm.slane %v1129_v40, 1 }
 0x22d   : > { %v1510_v53 = vpop.eup %1509 }
 0x22e   : > { %v814_v0 = vmul.f32 %v1510_v53, %v810_v18  ;;  %v1512_v61 = vpop.eup %1511  ;;  %vm819_vm6 = vweird.f32 %v1510_v53 }
 0x22f   : > { %v1514_v54 = vpop.eup %1513  ;;  %v829_v63 = vmul.f32 %v1512_v61, %v811_v31  ;;  %vm820_vm12 = vmor %vm818_vm7, %vm819_vm6  ;;  %vm834_vm14 = vweird.f32 %v1512_v61  ;;  %v1523_v31 = vld [vmem:[#allocation2 + $0x8] sm:$0xff] }
 0x230   : > { %v815_v1 = vsub.f32 1.0, %v814_v0  ;;  %v844_v2 = vmul.f32 %v1514_v54, %v812_v52  ;;  %vm849_vm9 = vweird.f32 %v1514_v54  ;;  %vm2175_vm8 = vmor %vm833_vm13, %vm834_vm14  ;;  %v1133_v0 = vperm.slane %v1129_v40, 2 }
 0x231   : > { %v830_v30 = vsub.f32 1.0, %v829_v63  ;;  %vm2180_vm11 = vmor %vm848_vm10, %vm849_vm9 }
 0x232   : > { %v816_v29 = vmul.f32 %v1510_v53, %v815_v1  ;;  %v845_v47 = vsub.f32 1.0, %v844_v2 }
 0x233   : > { %v831_v3 = vmul.f32 %v1512_v61, %v830_v30 }
 0x234   : > { %v817_v14 = vadd.f32 %v1510_v53, %v816_v29  ;;  %v846_v41 = vmul.f32 %v1514_v54, %v845_v47 }
 0x235   : > { %v832_v36 = vadd.f32 %v1512_v61, %v831_v3 }
 0x236   : > { %v821_v12 = vsel %vm820_vm12, %v1510_v53, %v817_v14  ;;  %v847_v46 = vadd.f32 %v1514_v54, %v846_v41 }
 0x237   : > { %v826_v42 = vsel %vm823_vm15, %v825_v19, %v821_v12  ;;  %v836_v51 = vsel %vm2175_vm8, %v1512_v61, %v832_v36 }
 0x238   : > { %v1117_v50 = vsub.f32 1.0, %v826_v42  ;;  %v851_v39 = vsel %vm2180_vm11, %v1514_v54, %v847_v46  ;;  %v841_v59 = vsel %vm838_vm0, %v840_v58, %v836_v51 }
 0x239   : > { %v856_v43 = vsel %vm853_vm1, %v855_v15, %v851_v39  ;;  %v1118_v7 = vsub.f32 1.0, %v841_v59 }
 0x23a   : > { %v1120_v5 = vmul.f32 %v1521_v62, %v1117_v50  ;;  %v1119_v9 = vsub.f32 1.0, %v856_v43 }
 0x23b   : > { %v1121_v18 = vmul.f32 %v1522_v48, %v1118_v7 }
 0x23c   : > { %v1122_v52 = vmul.f32 %v1523_v31, %v1119_v9 }
 0x2a6   : > { %v1081_v11 = vpop.f32.mrf.mxu1 }
 0x2a7   : > { %v1111_v35 = vadd.f32 %v1081_v11, %v551_v4 }
 0x2a9   : > { %1515 = vtanh.f32 %v1111_v35 }
 0x2ac   : > { %v1094_v37 = vpop.f32.mrf.mxu2 }
 0x2ad   : > { %v1112_v44 = vadd.f32 %v1094_v37, %v569_v32  ;;  %v1107_v20 = vpop.f32.mrf.mxu3 }
 0x2ae   : > { %v1113_v38 = vadd.f32 %v1107_v20, %v587_v33  ;;  %v1083_v22 = vpop.f32.mrf.mxu1 }
 0x2af   : > { %v1516_v25 = vpop.eup %1515  ;;  %1517 = vtanh.f32 %v1112_v44 }
 0x2b0   : > { %v1123_v8 = vmul.f32 %v1516_v25, %v826_v42  ;;  %1519 = vtanh.f32 %v1113_v38 }
 0x2b2   : > { %v1126_v56 = vadd.f32 %v1123_v8, %v1120_v5 }
 0x2b4   : > { %v1137_v23 = vmul.f32 %v1131_v16, %v1126_v56  ;;  %v1096_v55 = vpop.f32.mrf.mxu2 }
 0x2b5   : > { %v1518_v10 = vpop.eup %1517  ;;  %v1109_v45 = vpop.f32.mrf.mxu3 }
 0x2b6   : > { %v1520_v49 = vpop.eup %1519  ;;  %1140 = vst [vmem:[#allocation2 + $0x10] sm:$0xff] %v1137_v23  ;;  %v1124_v6 = vmul.f32 %v1518_v10, %v841_v59 }
 0x2b7   : > { %v1125_v53 = vmul.f32 %v1520_v49, %v856_v43 }
 0x2b8   : > { %v1127_v61 = vadd.f32 %v1124_v6, %v1121_v18 }
 0x2b9   : > { %v1128_v54 = vadd.f32 %v1125_v53, %v1122_v52  ;;  %1146 = sbr.rel (%p1272_p8) target bundleno = 705 (0x2c1), region = 56 }
 0x2ba   : > { %v1138_v1 = vmul.f32 %v1132_v27, %v1127_v61 }
 0x2bb   : > { %v1139_v63 = vmul.f32 %v1133_v0, %v1128_v54 }
 0x2bc   : > { %1141 = vst [vmem:[#allocation2] sm:$0xff] %v1138_v1 }
 0x2bd   : > { %1142 = vst [vmem:[#allocation2 + $0x8] sm:$0xff] %v1139_v63 }
 0x2be   : > { %1147 = vst [vmem:[%s1656_s22] sm:$0xff] %v1137_v23 }
 0x2bf   : > { %1148 = vst [vmem:[%s1656_s22 + $0x8] sm:$0xff] %v1138_v1 }
 0x2c0   : > { %1149 = vst [vmem:[%s1656_s22 + $0x10] sm:$0xff] %v1139_v63 }
 0x2c1 PF: > { %s17_s28 = sadd.s32 1, %s1562_s28   ;;  %s2235_s24 = smov %s1554_s26 }
 0x2c2   : > { %p14_p9 = scmp.ge.s32.totalorder %s17_s28, 18   ;;  %s2236_s25 = smov %s1558_s27 }
 0x2c3   : > { %s2237_s26 = smov %s2240_s29  ;;  %s2238_s27 = smov %s2244_s30 }
 0x2c4   :  { %16 = sbr.rel (!%p14_p9) target bundleno = 3 (0x3), region = 89 }

// kernel: _lambda_.8
= control target key start
LH: loop header
LB: loop body
LE: loop exit
PB: predicated region body
PF: predicated region fallthrough
CT: control target
= control target key end

     0   :  { %v132_v1 = vmov 0   ;;  %vm74_vm0 = vcmask 1043456   ;;  %vm70_vm1 = vcmask 588800   ;;  %s183_s1 = inlined_call_operand.vmem [shape: bf16[72,128], index: 1, kind: input, shape index: {}]   ;;  %s184_s2 = inlined_call_operand.vmem [shape: f32[16,1], index: 2, kind: input, shape index: {}]   ;;  %s185_s0 = inlined_call_operand.vmem [shape: bf16[16,72], index: 0, kind: input, shape index: {}]   ;;  %s186_s3 = inlined_call_operand.vmem [shape: f32[16,128], index: 3, kind: output, shape index: {}]  }
   0x1   :  { %v25_v0 = vld [vmem:[%s183_s1 + $0x20] sm:$0xf]  ;;  %131 = vset.pattern.permute.xlu0 %v132_v1  ;;  %v129_v6 = vld [vmem:[%s183_s1 + $0x18] sm:$0xff]  ;;  %v27_v7 = vld [vmem:[%s184_s2 + $0x8] sm:$0xff] }
   0x2   :  { %v60_v2 = vunpack.c.l.b16 %v25_v0  ;;  %v26_v3 = vld [vmem:[%s184_s2] sm:$0xff]  ;;  %v128_v8 = vld [vmem:[%s183_s1 + $0x10] sm:$0xff]  ;;  %v127_v9 = vld [vmem:[%s183_s1 + $0x8] sm:$0xff] }
   0x3   :  { %30 = vperm.xlu0 %131, %v26_v3   ;;  %v126_v10 = vld [vmem:[%s183_s1] sm:$0xff] }
   0x4   :  { %v65_v4 = vpack.c.b16 %v60_v2, %v60_v2  ;;  %v125_v11 = vld [vmem:[%s185_s0] sm:$0xff] }
   0x6   :  { %v76_v5 = vsel %vm74_vm0, %v65_v4, 0 }
   0x7   :  { %81 = vmatpush.bf16.msra.mxu0 %v76_v5 }
   0xb   :  { %82 = vmatpush.bf16.msra.mxu0 %v129_v6  ;;  %35 = vperm.xlu0 %131, %v27_v7  }
   0xf   :  { %83 = vmatpush.bf16.msra.mxu0 %v128_v8 }
  0x13   :  { %84 = vmatpush.bf16.msra.mxu0 %v127_v9 }
  0x17   :  { %85 = vmatpush.bf16.msra.mxu0 %v126_v10 }
  0x1a   :  { %124 = vmatmul.msk.bf16.vlgmr.msra.gmra.mxu0 %vm70_vm1, %v125_v11 }
  0x75   :  { %v31_v12 = vpop.permute.xlu0 %30 }
  0x7d   :  { %v36_v17 = vpop.permute.xlu0 %35 }
  0x97   :  { %v87_v13 = vpop.f32.mrf.mxu0 }
  0x98   :  { %v88_v14 = vadd.f32 %v87_v13, %v31_v12 }
  0x9a   :  { %vm92_vm2 = vcmp.ge.f32.partialorder %v88_v14, 0.0  ;;  %v94_v15 = vmul.f32 0.2, %v88_v14 }
  0x9c   :  { %v96_v16 = vsel %vm92_vm2, %v88_v14, %v94_v15 }
  0x9d   :  { %98 = vst [vmem:[%s186_s3] sm:$0xff] %v96_v16 }
  0x9f   :  { %v89_v18 = vpop.f32.mrf.mxu0 }
  0xa0   :  { %v90_v19 = vadd.f32 %v89_v18, %v36_v17 }
  0xa2   :  { %vm93_vm3 = vcmp.ge.f32.partialorder %v90_v19, 0.0  ;;  %v95_v20 = vmul.f32 0.2, %v90_v19 }
  0xa4   :  { %v97_v21 = vsel %vm93_vm3, %v90_v19, %v95_v20 }
  0xa5   :  { %99 = vst [vmem:[%s186_s3 + $0x8] sm:$0xff] %v97_v21 }

// kernel: _lambda_.9
= control target key start
LH: loop header
LB: loop body
LE: loop exit
PB: predicated region body
PF: predicated region fallthrough
CT: control target
= control target key end

     0   :  { %s1331_s24 = smov 0   ;;  %s1333_s25 = smov 0   ;;  %s1533_s0 = inlined_call_operand.vmem [shape: f32[1,2,16,128], index: 0, kind: input, shape index: {}]   ;;  %s1534_s1 = inlined_call_operand.vmem [shape: f32[2,16,128], index: 1, kind: input, shape index: {}]   ;;  %s1535_s2 = inlined_call_operand.vmem [shape: f32[1,128], index: 2, kind: input, shape index: {}]   ;;  %s1536_s3 = inlined_call_operand.vmem [shape: bf16[48,144], index: 3, kind: input, shape index: {}]   ;;  %s1537_s4 = inlined_call_operand.vmem [shape: f32[48,1], index: 4, kind: input, shape index: {}]   ;;  %s1538_s5 = inlined_call_operand.vmem [shape: bf16[32,144], index: 5, kind: input, shape index: {}]   ;;  %s1539_s6 = inlined_call_operand.vmem [shape: bf16[16,144], index: 6, kind: input, shape index: {}]   ;;  %s1540_s7 = inlined_call_operand.vmem [shape: f32[2,16,128], index: 7, kind: output, shape index: {}]  }
   0x1   :  { %s1335_s26 = smov 0  }
   0x2 LB: > { %s29_s27 = sadd.s32 1, %s1276_s25  ;;  %p999_p0 = scmp.ge.s32.totalorder %s1280_s26, 1  ;;  %s1280_s26 = sphi %s1335_s26, %s17_s26   ;;  %s1276_s25 = sphi %s1333_s25, %s1542_s25   ;;  %s1272_s24 = sphi %s1331_s24, %s1541_s24  }
   0x3   : > { %p31_p1 = scmp.ge.s32.totalorder %s29_s27, 2  ;;  %p265_p2 = scmp.lt.s32.totalorder %s1280_s26, 3 }
   0x5   : > { %s1544_s27 = smov (%p31_p1, %s29_s27), 0  ;;  %p266_p3 = pnand %p999_p0, %p265_p2 }
   0x6   : > { %p308_p4 = scmp.lt.s32.totalorder (!%p266_p3), %s1272_s24, 1  ;;  %s1282_s12 = smov (!%p266_p3), 119  }
   0x7   : > { %269 = sbr.rel (%p266_p3) target bundleno = 675 (0x2a3), region = 48  ;;  %s1283_s13 = smov (!%p266_p3), 118  }
   0x8   : > { %s1284_s14 = smov (!%p266_p3), 127   ;;  %s1285_s15 = smov (!%p266_p3), 1  }
   0x9   : > { %s1286_s16 = smov (!%p266_p3), 9   ;;  %s1287_s17 = smov (!%p266_p3), 10  }
   0xa   : > { %s1288_s18 = smov (!%p266_p3), 117   ;;  %s1289_s19 = smov (!%p266_p3), 11  }
   0xc   : > { %s1546_s24 = smov (!%p308_p4, %s1272_s24), 1  ;;  %v421_v60 = vld [vmem:[%s1537_s4 + $0x10] sm:$0xff]  ;;  %v422_v61 = vld [vmem:[%s1537_s4 + $0x18] sm:$0xff]  ;;  %vm482_vm0 = vcmask 130048  }
   0xd   : > { %s1349_s28 = sshll.u32 %s1546_s24, 4 }
   0xe   : > { %s319_s8 = scalar_lea.vmem %s1534_s1, %s1349_s28  ;;  %s314_s11 = scalar_lea.vmem %s1533_s0, %s1349_s28 }
   0xf   : > { %v1355_v0 = vld [vmem:[%s319_s8] sm:$0xff]  ;;  %v1357_v1 = vld [vmem:[%s319_s8 + $0x8] sm:$0xff]  ;;  %s324_s21 = scalar_lea.vmem %s1540_s7, %s1349_s28 }
  0x10   : > { %v1124_v2 = vpack.i.bf16 %v1357_v1, %v1355_v0  ;;  %v1367_v3 = vld [vmem:[%s314_s11] sm:$0xff]  ;;  %v1369_v4 = vld [vmem:[%s314_s11 + $0x8] sm:$0xff]  ;;  %v614_v27 = vpack.c.bf16 %v1357_v1, %v1355_v0 }
  0x11   : > { %v1129_v5 = vpack.i.bf16 %v1369_v4, %v1367_v3  ;;  %v408_v40 = vpack.c.bf16 %v1369_v4, %v1367_v3  ;;  %v1035_v4 = vld [vmem:[%s1538_s5] sm:$0xf] }
  0x12   : > { %1125 = vrot.lane.b32.xlu1 %v1124_v2, %s1282_s12  ;;  %1115 = vrot.lane.b32.xlu0 %v1124_v2, %s1283_s13 }
  0x13   : > { %1135 = vrot.lane.b32.xlu2 %v1124_v2, %s1284_s14 }
  0x1a   : > { %1130 = vrot.lane.b32.xlu1 %v1129_v5, %s1282_s12  ;;  %1120 = vrot.lane.b32.xlu0 %v1129_v5, %s1283_s13 }
  0x1b   : > { %1140 = vrot.lane.b32.xlu2 %v1129_v5, %s1284_s14 }
  0x22   : > { %1150 = vrot.lane.b32.xlu1 %v1129_v5, %s1285_s15  ;;  %1145 = vrot.lane.b32.xlu0 %v1124_v2, %s1285_s15 }
  0x23   : > { %1155 = vrot.lane.b32.xlu2 %v1124_v2, %s1286_s16 }
  0x2a   : > { %1165 = vrot.lane.b32.xlu1 %v1124_v2, %s1287_s17  ;;  %1160 = vrot.lane.b32.xlu0 %v1129_v5, %s1286_s16 }
  0x2b   : > { %1170 = vrot.lane.b32.xlu2 %v1129_v5, %s1287_s17 }
  0x32   : > { %1180 = vrot.lane.b32.xlu1 %v1124_v2, %s1288_s18  ;;  %1175 = vrot.lane.b32.xlu0 %v1124_v2, %s1289_s19 }
  0x33   : > { %1185 = vrot.lane.b32.xlu2 %v1129_v5, %s1289_s19 }
  0x3a   : > { %1190 = vrot.lane.b32.xlu0 %v1129_v5, %s1288_s18  ;;  %v1076_v5 = vld [vmem:[%s1538_s5 + $0x4] sm:$0xf0] }
  0x6d   : > { %v1136_v6 = vpop.permute.xlu2 %1135 }
  0x6e   : > { %v1138_v15 = vunpack.i.h.bf16 %v1136_v6  ;;  %v1137_v16 = vunpack.i.l.bf16 %v1136_v6  ;;  %v1290_v6 = vmov 0  }
  0x6f   : > { %1194 = vset.pattern.permute.xlu1 %v1290_v6  ;;  %1195 = vset.pattern.permute.xlu2 %v1290_v6 }
  0x70   : > { %v615_v26 = vpack.c.bf16 %v1138_v15, %v1137_v16  ;;  %437 = vperm.xlu1 %1194, %v421_v60   ;;  %442 = vperm.xlu2 %1195, %v422_v61   ;;  %v1008_v15 = vld [vmem:[%s1536_s3] sm:$0xf]  ;;  %v1070_v16 = vld [vmem:[%s1536_s3 + $0x4] sm:$0xf0] }
  0x71   : > { %1236 = vset.pattern.permute.xlu0 %v1290_v6 }
  0x75   : > { %v1141_v7 = vpop.permute.xlu2 %1140 }
  0x76   : > { %v1143_v28 = vunpack.i.h.bf16 %v1141_v7  ;;  %v1142_v29 = vunpack.i.l.bf16 %v1141_v7  ;;  %v1075_v7 = vld [vmem:[%s1538_s5 + $0x4] sm:$0xf] }
  0x78   : > { %v409_v37 = vpack.c.bf16 %v1143_v28, %v1142_v29  ;;  %v1045_v28 = vld [vmem:[%s1538_s5 + $0x18] sm:$0xf0] }
  0x7d   : > { %v1156_v22 = vpop.permute.xlu2 %1155 }
  0x7e   : > { %v1158_v35 = vunpack.i.h.bf16 %v1156_v22  ;;  %v1157_v36 = vunpack.i.l.bf16 %v1156_v22  ;;  %v1010_v22 = vld [vmem:[%s1536_s3 + $0x8] sm:$0xf0] }
  0x80   : > { %v612_v41 = vpack.c.bf16 %v1158_v35, %v1157_v36  ;;  %v1018_v35 = vld [vmem:[%s1536_s3 + $0x18] sm:$0xf0] }
  0x84   : > { %v1126_v8 = vpop.permute.xlu1 %1125  ;;  %v1116_v9 = vpop.permute.xlu0 %1115 }
  0x85   : > { %v1118_v10 = vunpack.i.h.bf16 %v1116_v9  ;;  %v1117_v11 = vunpack.i.l.bf16 %v1116_v9  ;;  %v1128_v12 = vunpack.i.h.bf16 %v1126_v8  ;;  %v1127_v13 = vunpack.i.l.bf16 %v1126_v8  ;;  %v1171_v39 = vpop.permute.xlu2 %1170  ;;  %v1037_v8 = vld [vmem:[%s1538_s5 + $0x8] sm:$0xf0] }
  0x86   : > { %v1173_v53 = vunpack.i.h.bf16 %v1171_v39  ;;  %v1172_v54 = vunpack.i.l.bf16 %v1171_v39 }
  0x87   : > { %v617_v14 = vpack.c.bf16 %v1118_v10, %v1117_v11  ;;  %v616_v17 = vpack.c.bf16 %v1128_v12, %v1127_v13  ;;  %v1036_v12 = vor.u32 %v1076_v5, %v1035_v4  ;;  %v1040_v13 = vor.u32 %v1075_v7, %v1037_v8 }
  0x88   : > { %v405_v9 = vpack.c.bf16 %v1173_v53, %v1172_v54 }
  0x89   : > { %647 = vmatpush.bf16.msra.mxu2 %v617_v14 }
  0x8c   : > { %v1131_v18 = vpop.permute.xlu1 %1130  ;;  %v1121_v19 = vpop.permute.xlu0 %1120 }
  0x8d   : > { %v1123_v20 = vunpack.i.h.bf16 %v1121_v19  ;;  %v1122_v21 = vunpack.i.l.bf16 %v1121_v19  ;;  %648 = vmatpush.bf16.msra.mxu2 %v616_v17  ;;  %v1133_v23 = vunpack.i.h.bf16 %v1131_v18  ;;  %v1132_v24 = vunpack.i.l.bf16 %v1131_v18  ;;  %v1186_v52 = vpop.permute.xlu2 %1185 }
  0x8e   : > { %v1188_v58 = vunpack.i.h.bf16 %v1186_v52  ;;  %v1187_v59 = vunpack.i.l.bf16 %v1186_v52  ;;  %v1009_v18 = vor.u32 %v1070_v16, %v1008_v15  ;;  %v1026_v52 = vld [vmem:[%s1536_s3 + $0x28] sm:$0xf0] }
  0x8f   : > { %v411_v25 = vpack.c.bf16 %v1123_v20, %v1122_v21  ;;  %v410_v30 = vpack.c.bf16 %v1133_v23, %v1132_v24  ;;  %v1069_v21 = vld [vmem:[%s1536_s3 + $0x4] sm:$0xf] }
  0x90   : > { %v404_v14 = vpack.c.bf16 %v1188_v58, %v1187_v59  ;;  %v1013_v24 = vor.u32 %v1069_v21, %v1010_v22 }
  0x91   : > { %492 = vmatpush.bf16.msra.mxu0 %v411_v25  ;;  %649 = vmatpush.bf16.msra.mxu2 %v615_v26  ;;  %v1043_v25 = vld [vmem:[%s1538_s5 + $0x10] sm:$0xf]  ;;  %v1078_v26 = vld [vmem:[%s1538_s5 + $0x14] sm:$0xf0] }
  0x92   : > { %v1044_v29 = vor.u32 %v1078_v26, %v1043_v25 }
  0x94   : > { %v1151_v31 = vpop.permute.xlu1 %1150  ;;  %v1146_v32 = vpop.permute.xlu0 %1145 }
  0x95   : > { %v1148_v33 = vunpack.i.h.bf16 %v1146_v32  ;;  %v1147_v34 = vunpack.i.l.bf16 %v1146_v32  ;;  %493 = vmatpush.bf16.msra.mxu0 %v410_v30  ;;  %650 = vmatpush.bf16.msra.mxu2 %v614_v27  ;;  %v1153_v42 = vunpack.i.h.bf16 %v1151_v31  ;;  %v1152_v43 = vunpack.i.l.bf16 %v1151_v31  ;;  %v1077_v27 = vld [vmem:[%s1538_s5 + $0x14] sm:$0xf]  ;;  %v1016_v31 = vld [vmem:[%s1536_s3 + $0x10] sm:$0xf]  ;;  %v1072_v32 = vld [vmem:[%s1536_s3 + $0x14] sm:$0xf0] }
  0x96   : > { %v1048_v30 = vor.u32 %v1077_v27, %v1045_v28 }
  0x97   : > { %v613_v38 = vpack.c.bf16 %v1148_v33, %v1147_v34  ;;  %v407_v50 = vpack.c.bf16 %v1153_v42, %v1152_v43  ;;  %v1017_v33 = vor.u32 %v1072_v32, %v1016_v31  ;;  %v1071_v34 = vld [vmem:[%s1536_s3 + $0x14] sm:$0xf] }
  0x98   : > { %v1021_v36 = vor.u32 %v1071_v34, %v1018_v35 }
  0x99   : > { %494 = vmatpush.bf16.msra.mxu0 %v409_v37  ;;  %651 = vmatpush.bf16.msra.mxu2 %v613_v38 }
  0x9c   : > { %v1166_v44 = vpop.permute.xlu1 %1165  ;;  %v1161_v45 = vpop.permute.xlu0 %1160 }
  0x9d   : > { %v1168_v46 = vunpack.i.h.bf16 %v1166_v44  ;;  %v1167_v47 = vunpack.i.l.bf16 %v1166_v44  ;;  %495 = vmatpush.bf16.msra.mxu0 %v408_v40  ;;  %652 = vmatpush.bf16.msra.mxu2 %v612_v41  ;;  %v1163_v48 = vunpack.i.h.bf16 %v1161_v45  ;;  %v1162_v49 = vunpack.i.l.bf16 %v1161_v45 }
  0x9f   : > { %v611_v51 = vpack.c.bf16 %v1168_v46, %v1167_v47  ;;  %v406_v55 = vpack.c.bf16 %v1163_v48, %v1162_v49  ;;  %v1024_v47 = vld [vmem:[%s1536_s3 + $0x20] sm:$0xf]  ;;  %v1074_v48 = vld [vmem:[%s1536_s3 + $0x24] sm:$0xf0] }
  0xa0   : > { %v1025_v49 = vor.u32 %v1074_v48, %v1024_v47  ;;  %v423_v47 = vld [vmem:[%s1537_s4 + $0x20] sm:$0xff]  ;;  %v420_v48 = vld [vmem:[%s1537_s4 + $0x8] sm:$0xff] }
  0xa1   : > { %496 = vmatpush.bf16.msra.mxu0 %v407_v50  ;;  %653 = vmatpush.bf16.msra.mxu2 %v611_v51  ;;  %v1073_v51 = vld [vmem:[%s1536_s3 + $0x24] sm:$0xf] }
  0xa2   : > { %v1029_v53 = vor.u32 %v1073_v51, %v1026_v52 }
  0xa4   : > { %v1181_v56 = vpop.permute.xlu1 %1180  ;;  %v1176_v57 = vpop.permute.xlu0 %1175 }
  0xa5   : > { %v1183_v62 = vunpack.i.h.bf16 %v1181_v56  ;;  %v1182_v63 = vunpack.i.l.bf16 %v1181_v56  ;;  %v1178_v2 = vunpack.i.h.bf16 %v1176_v57  ;;  %v1177_v3 = vunpack.i.l.bf16 %v1176_v57  ;;  %497 = vmatpush.bf16.msra.mxu0 %v406_v55 }
  0xa7   : > { %v610_v10 = vpack.c.bf16 %v1178_v2, %v1177_v3  ;;  %v618_v11 = vpack.c.bf16 %v1183_v62, %v1182_v63 }
  0xa9   : > { %498 = vmatpush.bf16.msra.mxu0 %v405_v9  ;;  %654 = vmatpush.bf16.msra.mxu2 %v610_v10 }
  0xaa   : > { %673 = vmatpush.bf16.msra.mxu3 %v618_v11 }
  0xac   : > { %v1191_v17 = vpop.permute.xlu0 %1190  ;;  %655 = vmatmul.bf16.vlgmr.msra.gmra.mxu2 %v1036_v12 }
  0xad   : > { %1049 = vmatmul.msk.bf16.vlgmr.msra.gmra.mxu3 %vm482_vm0, %v1040_v13  ;;  %v1193_v19 = vunpack.i.h.bf16 %v1191_v17  ;;  %v1192_v20 = vunpack.i.l.bf16 %v1191_v17  ;;  %499 = vmatpush.bf16.msra.mxu0 %v404_v14 }
  0xaf   : > { %v412_v23 = vpack.c.bf16 %v1193_v19, %v1192_v20 }
  0xb0   : > { %500 = vmatmul.bf16.vlgmr.msra.gmra.mxu0 %v1009_v18 }
  0xb1   : > { %523 = vmatpush.bf16.msra.mxu1 %v412_v23 }
  0xb4   : > { %1030 = vmatmul.msk.bf16.vlgmr.msra.gmra.mxu1 %vm482_vm0, %v1013_v24 }
  0xbc   : > { %660 = vmatmul.bf16.gmra.mxu2 %v1044_v29 }
  0xbd   : > { %1050 = vmatmul.msk.bf16.gmra.mxu3 %vm482_vm0, %v1048_v30 }
  0xc0   : > { %505 = vmatmul.bf16.gmra.mxu0 %v1017_v33 }
  0xc4   : > { %1031 = vmatmul.msk.bf16.gmra.mxu1 %vm482_vm0, %v1021_v36 }
  0xca   : > { %v443_v62 = vpop.permute.xlu2 %442 }
  0xd0   : > { %510 = vmatmul.bf16.gmra.mxu0 %v1025_v49 }
  0xd4   : > { %1032 = vmatmul.msk.bf16.gmra.mxu1 %vm482_vm0, %v1029_v53 }
  0xe2   : > { %v438_v50 = vpop.permute.xlu1 %437 }
 0x12d   : > { %v1449_v37 = vpop.f32.mrf.mxu0 }
 0x12f   : > { %v656_v38 = vpop.f32.mrf.mxu2 }
 0x130   : > { %v675_v39 = vpop.f32.mrf.mxu3 }
 0x131   : > { %v1451_v40 = vadd.f32 %v675_v39, %v656_v38  ;;  %v1453_v41 = vpop.f32.mrf.mxu1 }
 0x135   : > { %v1455_v42 = vpop.f32.mrf.mxu0 }
 0x137   : > { %v658_v43 = vpop.f32.mrf.mxu2 }
 0x138   : > { %v677_v44 = vpop.f32.mrf.mxu3 }
 0x139   : > { %v1457_v45 = vadd.f32 %v677_v44, %v658_v43  ;;  %v1459_v46 = vpop.f32.mrf.mxu1  ;;  %v419_v43 = vld [vmem:[%s1537_s4] sm:$0xff]  ;;  %v424_v44 = vld [vmem:[%s1537_s4 + $0x28] sm:$0xff] }
 0x13d   : > { %v506_v54 = vpop.f32.mrf.mxu0 }
 0x13e   : > { %v507_v55 = vadd.f32 %v506_v54, %v438_v50 }
 0x13f   : > { %v661_v56 = vpop.f32.mrf.mxu2 }
 0x140   : > { %v680_v57 = vpop.f32.mrf.mxu3 }
 0x141   : > { %v681_v58 = vadd.f32 %v680_v57, %v661_v56  ;;  %v530_v59 = vpop.f32.mrf.mxu1 }
 0x142   : > { %v531_v60 = vadd.f32 %v530_v59, %v507_v55 }
 0x144   : > { %v687_v61 = vadd.f32 %v681_v58, %v531_v60 }
 0x145   : > { %v508_v63 = vpop.f32.mrf.mxu0 }
 0x146   : > { %v1053_v2 = vmul.f32 -1.442695, %v687_v61  ;;  %v509_v4 = vadd.f32 %v508_v63, %v443_v62 }
 0x147   : > { %v663_v3 = vpop.f32.mrf.mxu2 }
 0x148   : > { %1238 = vpow2.f32 %v1053_v2  ;;  %v682_v5 = vpop.f32.mrf.mxu3 }
 0x149   : > { %v532_v6 = vpop.f32.mrf.mxu1  ;;  %v683_v7 = vadd.f32 %v682_v5, %v663_v3 }
 0x14a   : > { %v533_v8 = vadd.f32 %v532_v6, %v509_v4  ;;  %v1079_v6 = vld [vmem:[%s1539_s6 + $0x4] sm:$0xf] }
 0x14c   : > { %v688_v9 = vadd.f32 %v683_v7, %v533_v8  ;;  %v1059_v7 = vld [vmem:[%s1539_s6 + $0x8] sm:$0xf0] }
 0x14e   : > { %v1239_v10 = vpop.eup %1238  ;;  %v1054_v11 = vmul.f32 -1.442695, %v688_v9 }
 0x14f   : > { %v733_v12 = vadd.f32 1.0, %v1239_v10 }
 0x150   : > { %1240 = vpow2.f32 %v1054_v11 }
 0x151   : > { %1242 = vrcp.f32 %v733_v12  ;;  %v746_v22 = vand.u32 2147483648, %v733_v12  ;;  %vm740_vm2 = vweird.f32 %v733_v12  ;;  %v744_v23 = vand.u32 2147483647, %v733_v12 }
 0x153   : > { %v747_v29 = vor.u32 1.1754944e-38, %v746_v22  ;;  %vm745_vm5 = vcmp.eq.f32.partialorder %v744_v23, 8.507059e+37  ;;  %v1080_v22 = vld [vmem:[%s1539_s6 + $0x4] sm:$0xf0] }
 0x156   : > { %v1241_v13 = vpop.eup %1240 }
 0x157   : > { %v1243_v14 = vpop.eup %1242  ;;  %v734_v15 = vadd.f32 1.0, %v1241_v13 }
 0x158   : > { %v736_v16 = vmul.f32 %v1243_v14, %v733_v12  ;;  %vm741_vm1 = vweird.f32 %v1243_v14  ;;  %v1062_v12 = vor.u32 %v1079_v6, %v1059_v7 }
 0x159   : > { %1244 = vrcp.f32 %v734_v15  ;;  %vm742_vm3 = vmor %vm740_vm2, %vm741_vm1  ;;  %v761_v25 = vand.u32 2147483648, %v734_v15  ;;  %v759_v28 = vand.u32 2147483647, %v734_v15  ;;  %vm755_vm6 = vweird.f32 %v734_v15 }
 0x15a   : > { %v737_v17 = vsub.f32 1.0, %v736_v16 }
 0x15b   : > { %v762_v32 = vor.u32 1.1754944e-38, %v761_v25  ;;  %vm760_vm8 = vcmp.eq.f32.partialorder %v759_v28, 8.507059e+37 }
 0x15c   : > { %v738_v18 = vmul.f32 %v1243_v14, %v737_v17 }
 0x15e   : > { %v739_v20 = vadd.f32 %v1243_v14, %v738_v18 }
 0x15f   : > { %v1245_v19 = vpop.eup %1244 }
 0x160   : > { %v751_v21 = vmul.f32 %v1245_v19, %v734_v15  ;;  %v743_v26 = vsel %vm742_vm3, %v1243_v14, %v739_v20  ;;  %vm756_vm4 = vweird.f32 %v1245_v19 }
 0x161   : > { %v748_v31 = vsel %vm745_vm5, %v747_v29, %v743_v26  ;;  %vm757_vm7 = vmor %vm755_vm6, %vm756_vm4 }
 0x162   : > { %v752_v24 = vsub.f32 1.0, %v751_v21  ;;  %v765_v35 = vmul.f32 %v748_v31, %v1355_v0  ;;  %v1057_v21 = vld [vmem:[%s1539_s6] sm:$0xf] }
 0x164   : > { %v753_v27 = vmul.f32 %v1245_v19, %v752_v24  ;;  %v1058_v24 = vor.u32 %v1080_v22, %v1057_v21 }
 0x166   : > { %v754_v30 = vadd.f32 %v1245_v19, %v753_v27 }
 0x168   : > { %v758_v33 = vsel %vm757_vm7, %v1245_v19, %v754_v30 }
 0x169   : > { %v763_v34 = vsel %vm760_vm8, %v762_v32, %v758_v33 }
 0x16a   : > { %v766_v36 = vmul.f32 %v763_v34, %v1357_v1 }
 0x16c   : > { %v1206_v38 = vpack.i.bf16 %v766_v36, %v765_v35  ;;  %v839_v39 = vpack.c.bf16 %v766_v36, %v765_v35 }
 0x16e   : > { %1207 = vrot.lane.b32.xlu2 %v1206_v38, %s1284_s14  ;;  %1202 = vrot.lane.b32.xlu1 %v1206_v38, %s1282_s12 }
 0x16f   : > { %1197 = vrot.lane.b32.xlu0 %v1206_v38, %s1283_s13 }
 0x176   : > { %1222 = vrot.lane.b32.xlu2 %v1206_v38, %s1287_s17  ;;  %1217 = vrot.lane.b32.xlu1 %v1206_v38, %s1286_s16 }
 0x177   : > { %1212 = vrot.lane.b32.xlu0 %v1206_v38, %s1285_s15 }
 0x17e   : > { %427 = vperm.xlu2 %1195, %v419_v43   ;;  %1232 = vrot.lane.b32.xlu1 %v1206_v38, %s1288_s18 }
 0x17f   : > { %1227 = vrot.lane.b32.xlu0 %v1206_v38, %s1289_s19 }
 0x186   : > { %452 = vperm.xlu2 %1195, %v424_v44   ;;  %447 = vperm.xlu1 %1194, %v423_v47   ;;  %v511_v47 = vpop.f32.mrf.mxu0 }
 0x187   : > { %432 = vperm.xlu0 %1236, %v420_v48  }
 0x1c8   : > { %v1208_v56 = vpop.permute.xlu2 %1207 }
 0x1c9   : > { %v1210_v57 = vunpack.i.h.bf16 %v1208_v56  ;;  %v1209_v58 = vunpack.i.l.bf16 %v1208_v56 }
 0x1cb   : > { %v840_v61 = vpack.c.bf16 %v1210_v57, %v1209_v58  ;;  %v513_v58 = vpop.f32.mrf.mxu0 }
 0x1d0   : > { %v1223_v13 = vpop.permute.xlu2 %1222 }
 0x1d1   : > { %v1225_v14 = vunpack.i.h.bf16 %v1223_v13  ;;  %v1224_v15 = vunpack.i.l.bf16 %v1223_v13 }
 0x1d3   : > { %v836_v20 = vpack.c.bf16 %v1225_v14, %v1224_v15 }
 0x1d8   : > { %v428_v25 = vpop.permute.xlu2 %427 }
 0x1d9   : > { %v502_v26 = vadd.f32 %v1449_v37, %v428_v25  ;;  %v535_v37 = vpop.f32.mrf.mxu1 }
 0x1db   : > { %v526_v27 = vadd.f32 %v1453_v41, %v502_v26 }
 0x1dd   : > { %v685_v29 = vadd.f32 %v1451_v40, %v526_v27 }
 0x1df   : > { %v1051_v31 = vmul.f32 -1.442695, %v685_v29 }
 0x1e0   : > { %v1203_v49 = vpop.permute.xlu1 %1202 }
 0x1e1   : > { %v1198_v50 = vpop.permute.xlu0 %1197  ;;  %v1205_v53 = vunpack.i.h.bf16 %v1203_v49  ;;  %v1204_v54 = vunpack.i.l.bf16 %v1203_v49  ;;  %1246 = vpow2.f32 %v1051_v31  ;;  %v537_v44 = vpop.f32.mrf.mxu1 }
 0x1e2   : > { %v1200_v51 = vunpack.i.h.bf16 %v1198_v50  ;;  %v1199_v52 = vunpack.i.l.bf16 %v1198_v50 }
 0x1e3   : > { %v841_v60 = vpack.c.bf16 %v1205_v53, %v1204_v54 }
 0x1e4   : > { %v842_v55 = vpack.c.bf16 %v1200_v51, %v1199_v52 }
 0x1e6   : > { %858 = vmatpush.bf16.msrb.mxu3 %v842_v55 }
 0x1e7   : > { %v1247_v35 = vpop.eup %1246 }
 0x1e8   : > { %v1218_v59 = vpop.permute.xlu1 %1217  ;;  %v695_v36 = vadd.f32 1.0, %v1247_v35 }
 0x1e9   : > { %v1213_v62 = vpop.permute.xlu0 %1212  ;;  %v1220_v9 = vunpack.i.h.bf16 %v1218_v59  ;;  %v1219_v10 = vunpack.i.l.bf16 %v1218_v59  ;;  %v453_v59 = vpop.permute.xlu2 %452 }
 0x1ea   : > { %859 = vmatpush.bf16.msrb.mxu3 %v841_v60  ;;  %v1215_v63 = vunpack.i.h.bf16 %v1213_v62  ;;  %v1214_v2 = vunpack.i.l.bf16 %v1213_v62  ;;  %v708_v53 = vand.u32 2147483648, %v695_v36  ;;  %vm702_vm10 = vweird.f32 %v695_v36 }
 0x1eb   : > { %v837_v16 = vpack.c.bf16 %v1220_v9, %v1219_v10  ;;  %v706_v55 = vand.u32 2147483647, %v695_v36 }
 0x1ec   : > { %v838_v11 = vpack.c.bf16 %v1215_v63, %v1214_v2  ;;  %v709_v62 = vor.u32 1.1754944e-38, %v708_v53  ;;  %v514_v2 = vadd.f32 %v513_v58, %v453_v59 }
 0x1ed   : > { %vm707_vm12 = vcmp.eq.f32.partialorder %v706_v55, 8.507059e+37 }
 0x1ee   : > { %860 = vmatpush.bf16.msrb.mxu3 %v840_v61  ;;  %v538_v10 = vadd.f32 %v537_v44, %v514_v2 }
 0x1f0   : > { %v1233_v3 = vpop.permute.xlu1 %1232 }
 0x1f1   : > { %v1235_v4 = vunpack.i.h.bf16 %v1233_v3  ;;  %v1234_v5 = vunpack.i.l.bf16 %v1233_v3  ;;  %v1228_v17 = vpop.permute.xlu0 %1227 }
 0x1f2   : > { %861 = vmatpush.bf16.msrb.mxu3 %v839_v39  ;;  %v1230_v18 = vunpack.i.h.bf16 %v1228_v17  ;;  %v1229_v19 = vunpack.i.l.bf16 %v1228_v17 }
 0x1f3   : > { %v843_v8 = vpack.c.bf16 %v1235_v4, %v1234_v5 }
 0x1f4   : > { %v835_v23 = vpack.c.bf16 %v1230_v18, %v1229_v19  ;;  %v1237_v18 = vld [vmem:[%s1535_s2] ss:$0 sm:$0xff] }
 0x1f5   : > { %879 = vmatpush.bf16.msrb.mxu1 %v843_v8 }
 0x1f6   : > { %862 = vmatpush.bf16.msrb.mxu3 %v838_v11 }
 0x1f8   : > { %1063 = vmatmul.msk.bf16.vlgmr.msrb.gmra.mxu1 %vm482_vm0, %v1062_v12  ;;  %v448_v48 = vpop.permute.xlu1 %447 }
 0x1f9   : > { %v433_v28 = vpop.permute.xlu0 %432  ;;  %v512_v50 = vadd.f32 %v511_v47, %v448_v48 }
 0x1fa   : > { %863 = vmatpush.bf16.msrb.mxu3 %v837_v16  ;;  %v504_v30 = vadd.f32 %v1455_v42, %v433_v28 }
 0x1fb   : > { %v536_v56 = vadd.f32 %v535_v37, %v512_v50 }
 0x1fc   : > { %v528_v32 = vadd.f32 %v1459_v46, %v504_v30 }
 0x1fe   : > { %864 = vmatpush.bf16.msrb.mxu3 %v836_v20  ;;  %v686_v33 = vadd.f32 %v1457_v45, %v528_v32 }
 0x200   : > { %v1052_v34 = vmul.f32 -1.442695, %v686_v33 }
 0x202   : > { %865 = vmatpush.bf16.msrb.mxu3 %v835_v23  ;;  %1248 = vpow2.f32 %v1052_v34 }
 0x203   : > { %1250 = vrcp.f32 %v695_v36 }
 0x205   : > { %866 = vmatmul.bf16.vlgmr.msrb.gmra.mxu3 %v1058_v24 }
 0x208   : > { %v1249_v38 = vpop.eup %1248 }
 0x209   : > { %v696_v39 = vadd.f32 1.0, %v1249_v38  ;;  %v1251_v41 = vpop.eup %1250 }
 0x20a   : > { %v698_v43 = vmul.f32 %v1251_v41, %v695_v36  ;;  %vm703_vm9 = vweird.f32 %v1251_v41 }
 0x20b   : > { %1252 = vrcp.f32 %v696_v39  ;;  %vm704_vm11 = vmor %vm702_vm10, %vm703_vm9  ;;  %v723_v5 = vand.u32 2147483648, %v696_v39  ;;  %vm717_vm14 = vweird.f32 %v696_v39  ;;  %v721_v8 = vand.u32 2147483647, %v696_v39 }
 0x20c   : > { %v699_v40 = vsub.f32 1.0, %v698_v43 }
 0x20d   : > { %v724_v14 = vor.u32 1.1754944e-38, %v723_v5  ;;  %vm722_vm0 = vcmp.eq.f32.partialorder %v721_v8, 8.507059e+37 }
 0x20e   : > { %v700_v49 = vmul.f32 %v1251_v41, %v699_v40 }
 0x210   : > { %v701_v51 = vadd.f32 %v1251_v41, %v700_v49 }
 0x211   : > { %v1253_v42 = vpop.eup %1252 }
 0x212   : > { %v713_v46 = vmul.f32 %v1253_v42, %v696_v39  ;;  %v705_v60 = vsel %vm704_vm11, %v1251_v41, %v701_v51  ;;  %vm718_vm13 = vweird.f32 %v1253_v42 }
 0x213   : > { %v710_v3 = vsel %vm707_vm12, %v709_v62, %v705_v60  ;;  %vm719_vm15 = vmor %vm717_vm14, %vm718_vm13 }
 0x214   : > { %v714_v45 = vsub.f32 1.0, %v713_v46  ;;  %v890_v6 = vsub.f32 1.0, %v710_v3 }
 0x216   : > { %v715_v61 = vmul.f32 %v1253_v42, %v714_v45  ;;  %v892_v16 = vmul.f32 %v890_v6, %v1355_v0 }
 0x218   : > { %v716_v4 = vadd.f32 %v1253_v42, %v715_v61 }
 0x21a   : > { %v720_v12 = vsel %vm719_vm15, %v1253_v42, %v716_v4 }
 0x21b   : > { %v725_v19 = vsel %vm722_vm0, %v724_v14, %v720_v12 }
 0x21c   : > { %v891_v22 = vsub.f32 1.0, %v725_v19 }
 0x21e   : > { %v893_v24 = vmul.f32 %v891_v22, %v1357_v1 }
 0x275   : > { %v881_v52 = vpop.f32.mrf.mxu1 }
 0x27d   : > { %v883_v9 = vpop.f32.mrf.mxu1 }
 0x288   : > { %v867_v54 = vpop.f32.mrf.mxu3 }
 0x289   : > { %v882_v57 = vadd.f32 %v881_v52, %v867_v54 }
 0x28b   : > { %v886_v63 = vadd.f32 %v882_v57, %v536_v56 }
 0x28d   : > { %1254 = vtanh.f32 %v886_v63 }
 0x290   : > { %v869_v7 = vpop.f32.mrf.mxu3 }
 0x291   : > { %v884_v11 = vadd.f32 %v883_v9, %v869_v7 }
 0x293   : > { %v1255_v13 = vpop.eup %1254  ;;  %v887_v15 = vadd.f32 %v884_v11, %v538_v10 }
 0x294   : > { %v894_v17 = vmul.f32 %v1255_v13, %v710_v3 }
 0x295   : > { %1256 = vtanh.f32 %v887_v15 }
 0x296   : > { %v896_v20 = vadd.f32 %v894_v17, %v892_v16 }
 0x298   : > { %v902_v21 = vmul.f32 %v1237_v18, %v896_v20 }
 0x29a   : > { %909 = vst [vmem:[%s324_s21] sm:$0xff] %v902_v21 }
 0x29b   : > { %v1257_v23 = vpop.eup %1256 }
 0x29c   : > { %v895_v0 = vmul.f32 %v1257_v23, %v725_v19 }
 0x29e   : > { %v897_v25 = vadd.f32 %v895_v0, %v893_v24 }
 0x2a0   : > { %v903_v26 = vmul.f32 %v1237_v18, %v897_v25 }
 0x2a2   : > { %910 = vst [vmem:[%s324_s21 + $0x8] sm:$0xff] %v903_v26 }
 0x2a3 PF: > { %s17_s26 = sadd.s32 1, %s1280_s26   ;;  %s1541_s24 = smov %s1276_s25 }
 0x2a4   : > { %p14_p5 = scmp.ge.s32.totalorder %s17_s26, 4   ;;  %s1542_s25 = smov %s1544_s27 }
 0x2a6   :  { %16 = sbr.rel (!%p14_p5) target bundleno = 2 (0x2), region = 89 }

// kernel: _lambda_.10
= control target key start
LH: loop header
LB: loop body
LE: loop exit
PB: predicated region body
PF: predicated region fallthrough
CT: control target
= control target key end

     0   :  { %v213_v4 = vmov 0   ;;  %vm110_vm0 = vcmask 130048   ;;  %vm148_vm2 = vcmask 261120   ;;  %s285_s1 = inlined_call_operand.vmem [shape: bf16[144,32], index: 1, kind: input, shape index: {}]   ;;  %s286_s0 = inlined_call_operand.vmem [shape: bf16[16,144], index: 0, kind: input, shape index: {}]   ;;  %s287_s2 = inlined_call_operand.vmem [shape: f32[16,1], index: 2, kind: input, shape index: {}]   ;;  %s288_s3 = inlined_call_operand.vmem [shape: f32[16,32], index: 3, kind: output, shape index: {}]  }
   0x1   :  { %v209_v0 = vld [vmem:[%s285_s1 + $0x38] sm:$0xff]  ;;  %v208_v1 = vld [vmem:[%s285_s1 + $0x30] sm:$0xff]  ;;  %v210_v2 = vld [vmem:[%s285_s1 + $0x40] sm:$0xff]  ;;  %212 = vset.pattern.permute.xlu0 %v213_v4 }
   0x2   :  { %114 = vmatpush.bf16.msra.mxu0 %v209_v0  ;;  %v200_v3 = vld [vmem:[%s286_s0 + $0x4] sm:$0xf]  ;;  %v159_v5 = vld [vmem:[%s286_s0 + $0x8] sm:$0xf0]  ;;  %135 = vmatpush.bf16.msra.mxu1 %v210_v2  ;;  %v205_v11 = vld [vmem:[%s285_s1 + $0x18] sm:$0xff] }
   0x3   :  { %v162_v6 = vor.u32 %v200_v3, %v159_v5  ;;  %v35_v7 = vld [vmem:[%s287_s2] sm:$0xff]  ;;  %v207_v8 = vld [vmem:[%s285_s1 + $0x28] sm:$0xff]  ;;  %v204_v12 = vld [vmem:[%s285_s1 + $0x10] sm:$0xff] }
   0x4   :  { %39 = vperm.xlu0 %212, %v35_v7   ;;  %v206_v9 = vld [vmem:[%s285_s1 + $0x20] sm:$0xff]  ;;  %v36_v10 = vld [vmem:[%s287_s2 + $0x8] sm:$0xff] }
   0x5   :  { %199 = vmatmul.msk.bf16.vlgmr.msra.gmra.mxu1 %vm110_vm0, %v162_v6  ;;  %v203_v13 = vld [vmem:[%s285_s1 + $0x8] sm:$0xff]  ;;  %v202_v14 = vld [vmem:[%s285_s1] sm:$0xff] }
   0x6   :  { %115 = vmatpush.bf16.msra.mxu0 %v208_v1  ;;  %v157_v15 = vld [vmem:[%s286_s0] sm:$0xf]  ;;  %v201_v16 = vld [vmem:[%s286_s0 + $0x4] sm:$0xf0] }
   0x7   :  { %v158_v17 = vor.u32 %v201_v16, %v157_v15 }
   0xa   :  { %116 = vmatpush.bf16.msra.mxu0 %v207_v8 }
   0xc   :  { %44 = vperm.xlu0 %212, %v36_v10  }
   0xe   :  { %117 = vmatpush.bf16.msra.mxu0 %v206_v9 }
  0x12   :  { %118 = vmatpush.bf16.msra.mxu0 %v205_v11 }
  0x16   :  { %119 = vmatpush.bf16.msra.mxu0 %v204_v12 }
  0x1a   :  { %120 = vmatpush.bf16.msra.mxu0 %v203_v13 }
  0x1e   :  { %121 = vmatpush.bf16.msra.mxu0 %v202_v14 }
  0x21   :  { %122 = vmatmul.bf16.vlgmr.msra.gmra.mxu0 %v158_v17 }
  0x76   :  { %v40_v18 = vpop.permute.xlu0 %39 }
  0x7e   :  { %v45_v25 = vpop.permute.xlu0 %44 }
  0x82   :  { %v137_v19 = vpop.f32.mrf.mxu1 }
  0x8a   :  { %v139_v28 = vpop.f32.mrf.mxu1 }
  0x9e   :  { %v123_v20 = vpop.f32.mrf.mxu0 }
  0x9f   :  { %v124_v21 = vadd.f32 %v123_v20, %v40_v18 }
  0xa1   :  { %v138_v22 = vadd.f32 %v137_v19, %v124_v21 }
  0xa3   :  { %vm142_vm1 = vcmp.ge.f32.partialorder %v138_v22, 0.0  ;;  %v144_v23 = vmul.f32 0.2, %v138_v22 }
  0xa5   :  { %v146_v24 = vsel %vm142_vm1, %v138_v22, %v144_v23 }
  0xa6   :  { %149 = vst.msk [vmem:[%s288_s3] sm:$0xff] %vm148_vm2, %v146_v24  ;;  %v125_v26 = vpop.f32.mrf.mxu0 }
  0xa7   :  { %v126_v27 = vadd.f32 %v125_v26, %v45_v25 }
  0xa9   :  { %v140_v29 = vadd.f32 %v139_v28, %v126_v27 }
  0xab   :  { %vm143_vm3 = vcmp.ge.f32.partialorder %v140_v29, 0.0  ;;  %v145_v30 = vmul.f32 0.2, %v140_v29 }
  0xad   :  { %v147_v31 = vsel %vm143_vm3, %v140_v29, %v145_v30 }
  0xae   :  { %150 = vst.msk [vmem:[%s288_s3 + $0x8] sm:$0xff] %vm148_vm2, %v147_v31 }

// kernel: _lambda_.11
= control target key start
LH: loop header
LB: loop body
LE: loop exit
PB: predicated region body
PF: predicated region fallthrough
CT: control target
= control target key end

     0   :  { %s1331_s24 = smov 0   ;;  %s1333_s25 = smov 0   ;;  %s1533_s0 = inlined_call_operand.vmem [shape: f32[1,2,16,128], index: 0, kind: input, shape index: {}]   ;;  %s1534_s1 = inlined_call_operand.vmem [shape: f32[2,16,128], index: 1, kind: input, shape index: {}]   ;;  %s1535_s2 = inlined_call_operand.vmem [shape: f32[1,128], index: 2, kind: input, shape index: {}]   ;;  %s1536_s3 = inlined_call_operand.vmem [shape: bf16[48,144], index: 3, kind: input, shape index: {}]   ;;  %s1537_s4 = inlined_call_operand.vmem [shape: f32[48,1], index: 4, kind: input, shape index: {}]   ;;  %s1538_s5 = inlined_call_operand.vmem [shape: bf16[32,144], index: 5, kind: input, shape index: {}]   ;;  %s1539_s6 = inlined_call_operand.vmem [shape: bf16[16,144], index: 6, kind: input, shape index: {}]   ;;  %s1540_s7 = inlined_call_operand.vmem [shape: f32[2,16,128], index: 7, kind: output, shape index: {}]  }
   0x1   :  { %s1335_s26 = smov 0  }
   0x2 LB: > { %s29_s27 = sadd.s32 1, %s1276_s25  ;;  %p999_p0 = scmp.ge.s32.totalorder %s1280_s26, 1  ;;  %s1280_s26 = sphi %s1335_s26, %s17_s26   ;;  %s1276_s25 = sphi %s1333_s25, %s1542_s25   ;;  %s1272_s24 = sphi %s1331_s24, %s1541_s24  }
   0x3   : > { %p31_p1 = scmp.ge.s32.totalorder %s29_s27, 2  ;;  %p265_p2 = scmp.lt.s32.totalorder %s1280_s26, 3 }
   0x5   : > { %s1544_s27 = smov (%p31_p1, %s29_s27), 0  ;;  %p266_p3 = pnand %p999_p0, %p265_p2 }
   0x6   : > { %p308_p4 = scmp.lt.s32.totalorder (!%p266_p3), %s1272_s24, 1  ;;  %s1282_s12 = smov (!%p266_p3), 123  }
   0x7   : > { %269 = sbr.rel (%p266_p3) target bundleno = 675 (0x2a3), region = 48  ;;  %s1283_s13 = smov (!%p266_p3), 122  }
   0x8   : > { %s1284_s14 = smov (!%p266_p3), 127   ;;  %s1285_s15 = smov (!%p266_p3), 1  }
   0x9   : > { %s1286_s16 = smov (!%p266_p3), 5   ;;  %s1287_s17 = smov (!%p266_p3), 6  }
   0xa   : > { %s1288_s18 = smov (!%p266_p3), 121   ;;  %s1289_s19 = smov (!%p266_p3), 7  }
   0xc   : > { %s1546_s24 = smov (!%p308_p4, %s1272_s24), 1  ;;  %v421_v60 = vld [vmem:[%s1537_s4 + $0x10] sm:$0xff]  ;;  %v422_v61 = vld [vmem:[%s1537_s4 + $0x18] sm:$0xff]  ;;  %vm482_vm0 = vcmask 130048  }
   0xd   : > { %s1349_s28 = sshll.u32 %s1546_s24, 4 }
   0xe   : > { %s319_s8 = scalar_lea.vmem %s1534_s1, %s1349_s28  ;;  %s314_s11 = scalar_lea.vmem %s1533_s0, %s1349_s28 }
   0xf   : > { %v1355_v0 = vld [vmem:[%s319_s8] sm:$0xff]  ;;  %v1357_v1 = vld [vmem:[%s319_s8 + $0x8] sm:$0xff]  ;;  %s324_s21 = scalar_lea.vmem %s1540_s7, %s1349_s28 }
  0x10   : > { %v1124_v2 = vpack.i.bf16 %v1357_v1, %v1355_v0  ;;  %v1367_v3 = vld [vmem:[%s314_s11] sm:$0xff]  ;;  %v1369_v4 = vld [vmem:[%s314_s11 + $0x8] sm:$0xff]  ;;  %v614_v27 = vpack.c.bf16 %v1357_v1, %v1355_v0 }
  0x11   : > { %v1129_v5 = vpack.i.bf16 %v1369_v4, %v1367_v3  ;;  %v408_v40 = vpack.c.bf16 %v1369_v4, %v1367_v3  ;;  %v1035_v4 = vld [vmem:[%s1538_s5] sm:$0xf] }
  0x12   : > { %1125 = vrot.lane.b32.xlu1 %v1124_v2, %s1282_s12  ;;  %1115 = vrot.lane.b32.xlu0 %v1124_v2, %s1283_s13 }
  0x13   : > { %1135 = vrot.lane.b32.xlu2 %v1124_v2, %s1284_s14 }
  0x1a   : > { %1130 = vrot.lane.b32.xlu1 %v1129_v5, %s1282_s12  ;;  %1120 = vrot.lane.b32.xlu0 %v1129_v5, %s1283_s13 }
  0x1b   : > { %1140 = vrot.lane.b32.xlu2 %v1129_v5, %s1284_s14 }
  0x22   : > { %1150 = vrot.lane.b32.xlu1 %v1129_v5, %s1285_s15  ;;  %1145 = vrot.lane.b32.xlu0 %v1124_v2, %s1285_s15 }
  0x23   : > { %1155 = vrot.lane.b32.xlu2 %v1124_v2, %s1286_s16 }
  0x2a   : > { %1165 = vrot.lane.b32.xlu1 %v1124_v2, %s1287_s17  ;;  %1160 = vrot.lane.b32.xlu0 %v1129_v5, %s1286_s16 }
  0x2b   : > { %1170 = vrot.lane.b32.xlu2 %v1129_v5, %s1287_s17 }
  0x32   : > { %1180 = vrot.lane.b32.xlu1 %v1124_v2, %s1288_s18  ;;  %1175 = vrot.lane.b32.xlu0 %v1124_v2, %s1289_s19 }
  0x33   : > { %1185 = vrot.lane.b32.xlu2 %v1129_v5, %s1289_s19 }
  0x3a   : > { %1190 = vrot.lane.b32.xlu0 %v1129_v5, %s1288_s18  ;;  %v1076_v5 = vld [vmem:[%s1538_s5 + $0x4] sm:$0xf0] }
  0x6d   : > { %v1136_v6 = vpop.permute.xlu2 %1135 }
  0x6e   : > { %v1138_v15 = vunpack.i.h.bf16 %v1136_v6  ;;  %v1137_v16 = vunpack.i.l.bf16 %v1136_v6  ;;  %v1290_v6 = vmov 0  }
  0x6f   : > { %1194 = vset.pattern.permute.xlu1 %v1290_v6  ;;  %1195 = vset.pattern.permute.xlu2 %v1290_v6 }
  0x70   : > { %v615_v26 = vpack.c.bf16 %v1138_v15, %v1137_v16  ;;  %437 = vperm.xlu1 %1194, %v421_v60   ;;  %442 = vperm.xlu2 %1195, %v422_v61   ;;  %v1008_v15 = vld [vmem:[%s1536_s3] sm:$0xf]  ;;  %v1070_v16 = vld [vmem:[%s1536_s3 + $0x4] sm:$0xf0] }
  0x71   : > { %1236 = vset.pattern.permute.xlu0 %v1290_v6 }
  0x75   : > { %v1141_v7 = vpop.permute.xlu2 %1140 }
  0x76   : > { %v1143_v28 = vunpack.i.h.bf16 %v1141_v7  ;;  %v1142_v29 = vunpack.i.l.bf16 %v1141_v7  ;;  %v1075_v7 = vld [vmem:[%s1538_s5 + $0x4] sm:$0xf] }
  0x78   : > { %v409_v37 = vpack.c.bf16 %v1143_v28, %v1142_v29  ;;  %v1045_v28 = vld [vmem:[%s1538_s5 + $0x18] sm:$0xf0] }
  0x7d   : > { %v1156_v22 = vpop.permute.xlu2 %1155 }
  0x7e   : > { %v1158_v35 = vunpack.i.h.bf16 %v1156_v22  ;;  %v1157_v36 = vunpack.i.l.bf16 %v1156_v22  ;;  %v1010_v22 = vld [vmem:[%s1536_s3 + $0x8] sm:$0xf0] }
  0x80   : > { %v612_v41 = vpack.c.bf16 %v1158_v35, %v1157_v36  ;;  %v1018_v35 = vld [vmem:[%s1536_s3 + $0x18] sm:$0xf0] }
  0x84   : > { %v1126_v8 = vpop.permute.xlu1 %1125  ;;  %v1116_v9 = vpop.permute.xlu0 %1115 }
  0x85   : > { %v1118_v10 = vunpack.i.h.bf16 %v1116_v9  ;;  %v1117_v11 = vunpack.i.l.bf16 %v1116_v9  ;;  %v1128_v12 = vunpack.i.h.bf16 %v1126_v8  ;;  %v1127_v13 = vunpack.i.l.bf16 %v1126_v8  ;;  %v1171_v39 = vpop.permute.xlu2 %1170  ;;  %v1037_v8 = vld [vmem:[%s1538_s5 + $0x8] sm:$0xf0] }
  0x86   : > { %v1173_v53 = vunpack.i.h.bf16 %v1171_v39  ;;  %v1172_v54 = vunpack.i.l.bf16 %v1171_v39 }
  0x87   : > { %v617_v14 = vpack.c.bf16 %v1118_v10, %v1117_v11  ;;  %v616_v17 = vpack.c.bf16 %v1128_v12, %v1127_v13  ;;  %v1036_v12 = vor.u32 %v1076_v5, %v1035_v4  ;;  %v1040_v13 = vor.u32 %v1075_v7, %v1037_v8 }
  0x88   : > { %v405_v9 = vpack.c.bf16 %v1173_v53, %v1172_v54 }
  0x89   : > { %647 = vmatpush.bf16.msra.mxu2 %v617_v14 }
  0x8c   : > { %v1131_v18 = vpop.permute.xlu1 %1130  ;;  %v1121_v19 = vpop.permute.xlu0 %1120 }
  0x8d   : > { %v1123_v20 = vunpack.i.h.bf16 %v1121_v19  ;;  %v1122_v21 = vunpack.i.l.bf16 %v1121_v19  ;;  %648 = vmatpush.bf16.msra.mxu2 %v616_v17  ;;  %v1133_v23 = vunpack.i.h.bf16 %v1131_v18  ;;  %v1132_v24 = vunpack.i.l.bf16 %v1131_v18  ;;  %v1186_v52 = vpop.permute.xlu2 %1185 }
  0x8e   : > { %v1188_v58 = vunpack.i.h.bf16 %v1186_v52  ;;  %v1187_v59 = vunpack.i.l.bf16 %v1186_v52  ;;  %v1009_v18 = vor.u32 %v1070_v16, %v1008_v15  ;;  %v1026_v52 = vld [vmem:[%s1536_s3 + $0x28] sm:$0xf0] }
  0x8f   : > { %v411_v25 = vpack.c.bf16 %v1123_v20, %v1122_v21  ;;  %v410_v30 = vpack.c.bf16 %v1133_v23, %v1132_v24  ;;  %v1069_v21 = vld [vmem:[%s1536_s3 + $0x4] sm:$0xf] }
  0x90   : > { %v404_v14 = vpack.c.bf16 %v1188_v58, %v1187_v59  ;;  %v1013_v24 = vor.u32 %v1069_v21, %v1010_v22 }
  0x91   : > { %492 = vmatpush.bf16.msra.mxu0 %v411_v25  ;;  %649 = vmatpush.bf16.msra.mxu2 %v615_v26  ;;  %v1043_v25 = vld [vmem:[%s1538_s5 + $0x10] sm:$0xf]  ;;  %v1078_v26 = vld [vmem:[%s1538_s5 + $0x14] sm:$0xf0] }
  0x92   : > { %v1044_v29 = vor.u32 %v1078_v26, %v1043_v25 }
  0x94   : > { %v1151_v31 = vpop.permute.xlu1 %1150  ;;  %v1146_v32 = vpop.permute.xlu0 %1145 }
  0x95   : > { %v1148_v33 = vunpack.i.h.bf16 %v1146_v32  ;;  %v1147_v34 = vunpack.i.l.bf16 %v1146_v32  ;;  %493 = vmatpush.bf16.msra.mxu0 %v410_v30  ;;  %650 = vmatpush.bf16.msra.mxu2 %v614_v27  ;;  %v1153_v42 = vunpack.i.h.bf16 %v1151_v31  ;;  %v1152_v43 = vunpack.i.l.bf16 %v1151_v31  ;;  %v1077_v27 = vld [vmem:[%s1538_s5 + $0x14] sm:$0xf]  ;;  %v1016_v31 = vld [vmem:[%s1536_s3 + $0x10] sm:$0xf]  ;;  %v1072_v32 = vld [vmem:[%s1536_s3 + $0x14] sm:$0xf0] }
  0x96   : > { %v1048_v30 = vor.u32 %v1077_v27, %v1045_v28 }
  0x97   : > { %v613_v38 = vpack.c.bf16 %v1148_v33, %v1147_v34  ;;  %v407_v50 = vpack.c.bf16 %v1153_v42, %v1152_v43  ;;  %v1017_v33 = vor.u32 %v1072_v32, %v1016_v31  ;;  %v1071_v34 = vld [vmem:[%s1536_s3 + $0x14] sm:$0xf] }
  0x98   : > { %v1021_v36 = vor.u32 %v1071_v34, %v1018_v35 }
  0x99   : > { %494 = vmatpush.bf16.msra.mxu0 %v409_v37  ;;  %651 = vmatpush.bf16.msra.mxu2 %v613_v38 }
  0x9c   : > { %v1166_v44 = vpop.permute.xlu1 %1165  ;;  %v1161_v45 = vpop.permute.xlu0 %1160 }
  0x9d   : > { %v1168_v46 = vunpack.i.h.bf16 %v1166_v44  ;;  %v1167_v47 = vunpack.i.l.bf16 %v1166_v44  ;;  %495 = vmatpush.bf16.msra.mxu0 %v408_v40  ;;  %652 = vmatpush.bf16.msra.mxu2 %v612_v41  ;;  %v1163_v48 = vunpack.i.h.bf16 %v1161_v45  ;;  %v1162_v49 = vunpack.i.l.bf16 %v1161_v45 }
  0x9f   : > { %v611_v51 = vpack.c.bf16 %v1168_v46, %v1167_v47  ;;  %v406_v55 = vpack.c.bf16 %v1163_v48, %v1162_v49  ;;  %v1024_v47 = vld [vmem:[%s1536_s3 + $0x20] sm:$0xf]  ;;  %v1074_v48 = vld [vmem:[%s1536_s3 + $0x24] sm:$0xf0] }
  0xa0   : > { %v1025_v49 = vor.u32 %v1074_v48, %v1024_v47  ;;  %v423_v47 = vld [vmem:[%s1537_s4 + $0x20] sm:$0xff]  ;;  %v420_v48 = vld [vmem:[%s1537_s4 + $0x8] sm:$0xff] }
  0xa1   : > { %496 = vmatpush.bf16.msra.mxu0 %v407_v50  ;;  %653 = vmatpush.bf16.msra.mxu2 %v611_v51  ;;  %v1073_v51 = vld [vmem:[%s1536_s3 + $0x24] sm:$0xf] }
  0xa2   : > { %v1029_v53 = vor.u32 %v1073_v51, %v1026_v52 }
  0xa4   : > { %v1181_v56 = vpop.permute.xlu1 %1180  ;;  %v1176_v57 = vpop.permute.xlu0 %1175 }
  0xa5   : > { %v1183_v62 = vunpack.i.h.bf16 %v1181_v56  ;;  %v1182_v63 = vunpack.i.l.bf16 %v1181_v56  ;;  %v1178_v2 = vunpack.i.h.bf16 %v1176_v57  ;;  %v1177_v3 = vunpack.i.l.bf16 %v1176_v57  ;;  %497 = vmatpush.bf16.msra.mxu0 %v406_v55 }
  0xa7   : > { %v610_v10 = vpack.c.bf16 %v1178_v2, %v1177_v3  ;;  %v618_v11 = vpack.c.bf16 %v1183_v62, %v1182_v63 }
  0xa9   : > { %498 = vmatpush.bf16.msra.mxu0 %v405_v9  ;;  %654 = vmatpush.bf16.msra.mxu2 %v610_v10 }
  0xaa   : > { %673 = vmatpush.bf16.msra.mxu3 %v618_v11 }
  0xac   : > { %v1191_v17 = vpop.permute.xlu0 %1190  ;;  %655 = vmatmul.bf16.vlgmr.msra.gmra.mxu2 %v1036_v12 }
  0xad   : > { %1049 = vmatmul.msk.bf16.vlgmr.msra.gmra.mxu3 %vm482_vm0, %v1040_v13  ;;  %v1193_v19 = vunpack.i.h.bf16 %v1191_v17  ;;  %v1192_v20 = vunpack.i.l.bf16 %v1191_v17  ;;  %499 = vmatpush.bf16.msra.mxu0 %v404_v14 }
  0xaf   : > { %v412_v23 = vpack.c.bf16 %v1193_v19, %v1192_v20 }
  0xb0   : > { %500 = vmatmul.bf16.vlgmr.msra.gmra.mxu0 %v1009_v18 }
  0xb1   : > { %523 = vmatpush.bf16.msra.mxu1 %v412_v23 }
  0xb4   : > { %1030 = vmatmul.msk.bf16.vlgmr.msra.gmra.mxu1 %vm482_vm0, %v1013_v24 }
  0xbc   : > { %660 = vmatmul.bf16.gmra.mxu2 %v1044_v29 }
  0xbd   : > { %1050 = vmatmul.msk.bf16.gmra.mxu3 %vm482_vm0, %v1048_v30 }
  0xc0   : > { %505 = vmatmul.bf16.gmra.mxu0 %v1017_v33 }
  0xc4   : > { %1031 = vmatmul.msk.bf16.gmra.mxu1 %vm482_vm0, %v1021_v36 }
  0xca   : > { %v443_v62 = vpop.permute.xlu2 %442 }
  0xd0   : > { %510 = vmatmul.bf16.gmra.mxu0 %v1025_v49 }
  0xd4   : > { %1032 = vmatmul.msk.bf16.gmra.mxu1 %vm482_vm0, %v1029_v53 }
  0xe2   : > { %v438_v50 = vpop.permute.xlu1 %437 }
 0x12d   : > { %v1449_v37 = vpop.f32.mrf.mxu0 }
 0x12f   : > { %v656_v38 = vpop.f32.mrf.mxu2 }
 0x130   : > { %v675_v39 = vpop.f32.mrf.mxu3 }
 0x131   : > { %v1451_v40 = vadd.f32 %v675_v39, %v656_v38  ;;  %v1453_v41 = vpop.f32.mrf.mxu1 }
 0x135   : > { %v1455_v42 = vpop.f32.mrf.mxu0 }
 0x137   : > { %v658_v43 = vpop.f32.mrf.mxu2 }
 0x138   : > { %v677_v44 = vpop.f32.mrf.mxu3 }
 0x139   : > { %v1457_v45 = vadd.f32 %v677_v44, %v658_v43  ;;  %v1459_v46 = vpop.f32.mrf.mxu1  ;;  %v419_v43 = vld [vmem:[%s1537_s4] sm:$0xff]  ;;  %v424_v44 = vld [vmem:[%s1537_s4 + $0x28] sm:$0xff] }
 0x13d   : > { %v506_v54 = vpop.f32.mrf.mxu0 }
 0x13e   : > { %v507_v55 = vadd.f32 %v506_v54, %v438_v50 }
 0x13f   : > { %v661_v56 = vpop.f32.mrf.mxu2 }
 0x140   : > { %v680_v57 = vpop.f32.mrf.mxu3 }
 0x141   : > { %v681_v58 = vadd.f32 %v680_v57, %v661_v56  ;;  %v530_v59 = vpop.f32.mrf.mxu1 }
 0x142   : > { %v531_v60 = vadd.f32 %v530_v59, %v507_v55 }
 0x144   : > { %v687_v61 = vadd.f32 %v681_v58, %v531_v60 }
 0x145   : > { %v508_v63 = vpop.f32.mrf.mxu0 }
 0x146   : > { %v1053_v2 = vmul.f32 -1.442695, %v687_v61  ;;  %v509_v4 = vadd.f32 %v508_v63, %v443_v62 }
 0x147   : > { %v663_v3 = vpop.f32.mrf.mxu2 }
 0x148   : > { %1238 = vpow2.f32 %v1053_v2  ;;  %v682_v5 = vpop.f32.mrf.mxu3 }
 0x149   : > { %v532_v6 = vpop.f32.mrf.mxu1  ;;  %v683_v7 = vadd.f32 %v682_v5, %v663_v3 }
 0x14a   : > { %v533_v8 = vadd.f32 %v532_v6, %v509_v4  ;;  %v1079_v6 = vld [vmem:[%s1539_s6 + $0x4] sm:$0xf] }
 0x14c   : > { %v688_v9 = vadd.f32 %v683_v7, %v533_v8  ;;  %v1059_v7 = vld [vmem:[%s1539_s6 + $0x8] sm:$0xf0] }
 0x14e   : > { %v1239_v10 = vpop.eup %1238  ;;  %v1054_v11 = vmul.f32 -1.442695, %v688_v9 }
 0x14f   : > { %v733_v12 = vadd.f32 1.0, %v1239_v10 }
 0x150   : > { %1240 = vpow2.f32 %v1054_v11 }
 0x151   : > { %1242 = vrcp.f32 %v733_v12  ;;  %v746_v22 = vand.u32 2147483648, %v733_v12  ;;  %vm740_vm2 = vweird.f32 %v733_v12  ;;  %v744_v23 = vand.u32 2147483647, %v733_v12 }
 0x153   : > { %v747_v29 = vor.u32 1.1754944e-38, %v746_v22  ;;  %vm745_vm5 = vcmp.eq.f32.partialorder %v744_v23, 8.507059e+37  ;;  %v1080_v22 = vld [vmem:[%s1539_s6 + $0x4] sm:$0xf0] }
 0x156   : > { %v1241_v13 = vpop.eup %1240 }
 0x157   : > { %v1243_v14 = vpop.eup %1242  ;;  %v734_v15 = vadd.f32 1.0, %v1241_v13 }
 0x158   : > { %v736_v16 = vmul.f32 %v1243_v14, %v733_v12  ;;  %vm741_vm1 = vweird.f32 %v1243_v14  ;;  %v1062_v12 = vor.u32 %v1079_v6, %v1059_v7 }
 0x159   : > { %1244 = vrcp.f32 %v734_v15  ;;  %vm742_vm3 = vmor %vm740_vm2, %vm741_vm1  ;;  %v761_v25 = vand.u32 2147483648, %v734_v15  ;;  %v759_v28 = vand.u32 2147483647, %v734_v15  ;;  %vm755_vm6 = vweird.f32 %v734_v15 }
 0x15a   : > { %v737_v17 = vsub.f32 1.0, %v736_v16 }
 0x15b   : > { %v762_v32 = vor.u32 1.1754944e-38, %v761_v25  ;;  %vm760_vm8 = vcmp.eq.f32.partialorder %v759_v28, 8.507059e+37 }
 0x15c   : > { %v738_v18 = vmul.f32 %v1243_v14, %v737_v17 }
 0x15e   : > { %v739_v20 = vadd.f32 %v1243_v14, %v738_v18 }
 0x15f   : > { %v1245_v19 = vpop.eup %1244 }
 0x160   : > { %v751_v21 = vmul.f32 %v1245_v19, %v734_v15  ;;  %v743_v26 = vsel %vm742_vm3, %v1243_v14, %v739_v20  ;;  %vm756_vm4 = vweird.f32 %v1245_v19 }
 0x161   : > { %v748_v31 = vsel %vm745_vm5, %v747_v29, %v743_v26  ;;  %vm757_vm7 = vmor %vm755_vm6, %vm756_vm4 }
 0x162   : > { %v752_v24 = vsub.f32 1.0, %v751_v21  ;;  %v765_v35 = vmul.f32 %v748_v31, %v1355_v0  ;;  %v1057_v21 = vld [vmem:[%s1539_s6] sm:$0xf] }
 0x164   : > { %v753_v27 = vmul.f32 %v1245_v19, %v752_v24  ;;  %v1058_v24 = vor.u32 %v1080_v22, %v1057_v21 }
 0x166   : > { %v754_v30 = vadd.f32 %v1245_v19, %v753_v27 }
 0x168   : > { %v758_v33 = vsel %vm757_vm7, %v1245_v19, %v754_v30 }
 0x169   : > { %v763_v34 = vsel %vm760_vm8, %v762_v32, %v758_v33 }
 0x16a   : > { %v766_v36 = vmul.f32 %v763_v34, %v1357_v1 }
 0x16c   : > { %v1206_v38 = vpack.i.bf16 %v766_v36, %v765_v35  ;;  %v839_v39 = vpack.c.bf16 %v766_v36, %v765_v35 }
 0x16e   : > { %1207 = vrot.lane.b32.xlu2 %v1206_v38, %s1284_s14  ;;  %1202 = vrot.lane.b32.xlu1 %v1206_v38, %s1282_s12 }
 0x16f   : > { %1197 = vrot.lane.b32.xlu0 %v1206_v38, %s1283_s13 }
 0x176   : > { %1222 = vrot.lane.b32.xlu2 %v1206_v38, %s1287_s17  ;;  %1217 = vrot.lane.b32.xlu1 %v1206_v38, %s1286_s16 }
 0x177   : > { %1212 = vrot.lane.b32.xlu0 %v1206_v38, %s1285_s15 }
 0x17e   : > { %427 = vperm.xlu2 %1195, %v419_v43   ;;  %1232 = vrot.lane.b32.xlu1 %v1206_v38, %s1288_s18 }
 0x17f   : > { %1227 = vrot.lane.b32.xlu0 %v1206_v38, %s1289_s19 }
 0x186   : > { %452 = vperm.xlu2 %1195, %v424_v44   ;;  %447 = vperm.xlu1 %1194, %v423_v47   ;;  %v511_v47 = vpop.f32.mrf.mxu0 }
 0x187   : > { %432 = vperm.xlu0 %1236, %v420_v48  }
 0x1c8   : > { %v1208_v56 = vpop.permute.xlu2 %1207 }
 0x1c9   : > { %v1210_v57 = vunpack.i.h.bf16 %v1208_v56  ;;  %v1209_v58 = vunpack.i.l.bf16 %v1208_v56 }
 0x1cb   : > { %v840_v61 = vpack.c.bf16 %v1210_v57, %v1209_v58  ;;  %v513_v58 = vpop.f32.mrf.mxu0 }
 0x1d0   : > { %v1223_v13 = vpop.permute.xlu2 %1222 }
 0x1d1   : > { %v1225_v14 = vunpack.i.h.bf16 %v1223_v13  ;;  %v1224_v15 = vunpack.i.l.bf16 %v1223_v13 }
 0x1d3   : > { %v836_v20 = vpack.c.bf16 %v1225_v14, %v1224_v15 }
 0x1d8   : > { %v428_v25 = vpop.permute.xlu2 %427 }
 0x1d9   : > { %v502_v26 = vadd.f32 %v1449_v37, %v428_v25  ;;  %v535_v37 = vpop.f32.mrf.mxu1 }
 0x1db   : > { %v526_v27 = vadd.f32 %v1453_v41, %v502_v26 }
 0x1dd   : > { %v685_v29 = vadd.f32 %v1451_v40, %v526_v27 }
 0x1df   : > { %v1051_v31 = vmul.f32 -1.442695, %v685_v29 }
 0x1e0   : > { %v1203_v49 = vpop.permute.xlu1 %1202 }
 0x1e1   : > { %v1198_v50 = vpop.permute.xlu0 %1197  ;;  %v1205_v53 = vunpack.i.h.bf16 %v1203_v49  ;;  %v1204_v54 = vunpack.i.l.bf16 %v1203_v49  ;;  %1246 = vpow2.f32 %v1051_v31  ;;  %v537_v44 = vpop.f32.mrf.mxu1 }
 0x1e2   : > { %v1200_v51 = vunpack.i.h.bf16 %v1198_v50  ;;  %v1199_v52 = vunpack.i.l.bf16 %v1198_v50 }
 0x1e3   : > { %v841_v60 = vpack.c.bf16 %v1205_v53, %v1204_v54 }
 0x1e4   : > { %v842_v55 = vpack.c.bf16 %v1200_v51, %v1199_v52 }
 0x1e6   : > { %858 = vmatpush.bf16.msrb.mxu3 %v842_v55 }
 0x1e7   : > { %v1247_v35 = vpop.eup %1246 }
 0x1e8   : > { %v1218_v59 = vpop.permute.xlu1 %1217  ;;  %v695_v36 = vadd.f32 1.0, %v1247_v35 }
 0x1e9   : > { %v1213_v62 = vpop.permute.xlu0 %1212  ;;  %v1220_v9 = vunpack.i.h.bf16 %v1218_v59  ;;  %v1219_v10 = vunpack.i.l.bf16 %v1218_v59  ;;  %v453_v59 = vpop.permute.xlu2 %452 }
 0x1ea   : > { %859 = vmatpush.bf16.msrb.mxu3 %v841_v60  ;;  %v1215_v63 = vunpack.i.h.bf16 %v1213_v62  ;;  %v1214_v2 = vunpack.i.l.bf16 %v1213_v62  ;;  %v708_v53 = vand.u32 2147483648, %v695_v36  ;;  %vm702_vm10 = vweird.f32 %v695_v36 }
 0x1eb   : > { %v837_v16 = vpack.c.bf16 %v1220_v9, %v1219_v10  ;;  %v706_v55 = vand.u32 2147483647, %v695_v36 }
 0x1ec   : > { %v838_v11 = vpack.c.bf16 %v1215_v63, %v1214_v2  ;;  %v709_v62 = vor.u32 1.1754944e-38, %v708_v53  ;;  %v514_v2 = vadd.f32 %v513_v58, %v453_v59 }
 0x1ed   : > { %vm707_vm12 = vcmp.eq.f32.partialorder %v706_v55, 8.507059e+37 }
 0x1ee   : > { %860 = vmatpush.bf16.msrb.mxu3 %v840_v61  ;;  %v538_v10 = vadd.f32 %v537_v44, %v514_v2 }
 0x1f0   : > { %v1233_v3 = vpop.permute.xlu1 %1232 }
 0x1f1   : > { %v1235_v4 = vunpack.i.h.bf16 %v1233_v3  ;;  %v1234_v5 = vunpack.i.l.bf16 %v1233_v3  ;;  %v1228_v17 = vpop.permute.xlu0 %1227 }
 0x1f2   : > { %861 = vmatpush.bf16.msrb.mxu3 %v839_v39  ;;  %v1230_v18 = vunpack.i.h.bf16 %v1228_v17  ;;  %v1229_v19 = vunpack.i.l.bf16 %v1228_v17 }
 0x1f3   : > { %v843_v8 = vpack.c.bf16 %v1235_v4, %v1234_v5 }
 0x1f4   : > { %v835_v23 = vpack.c.bf16 %v1230_v18, %v1229_v19  ;;  %v1237_v18 = vld [vmem:[%s1535_s2] ss:$0 sm:$0xff] }
 0x1f5   : > { %879 = vmatpush.bf16.msrb.mxu1 %v843_v8 }
 0x1f6   : > { %862 = vmatpush.bf16.msrb.mxu3 %v838_v11 }
 0x1f8   : > { %1063 = vmatmul.msk.bf16.vlgmr.msrb.gmra.mxu1 %vm482_vm0, %v1062_v12  ;;  %v448_v48 = vpop.permute.xlu1 %447 }
 0x1f9   : > { %v433_v28 = vpop.permute.xlu0 %432  ;;  %v512_v50 = vadd.f32 %v511_v47, %v448_v48 }
 0x1fa   : > { %863 = vmatpush.bf16.msrb.mxu3 %v837_v16  ;;  %v504_v30 = vadd.f32 %v1455_v42, %v433_v28 }
 0x1fb   : > { %v536_v56 = vadd.f32 %v535_v37, %v512_v50 }
 0x1fc   : > { %v528_v32 = vadd.f32 %v1459_v46, %v504_v30 }
 0x1fe   : > { %864 = vmatpush.bf16.msrb.mxu3 %v836_v20  ;;  %v686_v33 = vadd.f32 %v1457_v45, %v528_v32 }
 0x200   : > { %v1052_v34 = vmul.f32 -1.442695, %v686_v33 }
 0x202   : > { %865 = vmatpush.bf16.msrb.mxu3 %v835_v23  ;;  %1248 = vpow2.f32 %v1052_v34 }
 0x203   : > { %1250 = vrcp.f32 %v695_v36 }
 0x205   : > { %866 = vmatmul.bf16.vlgmr.msrb.gmra.mxu3 %v1058_v24 }
 0x208   : > { %v1249_v38 = vpop.eup %1248 }
 0x209   : > { %v696_v39 = vadd.f32 1.0, %v1249_v38  ;;  %v1251_v41 = vpop.eup %1250 }
 0x20a   : > { %v698_v43 = vmul.f32 %v1251_v41, %v695_v36  ;;  %vm703_vm9 = vweird.f32 %v1251_v41 }
 0x20b   : > { %1252 = vrcp.f32 %v696_v39  ;;  %vm704_vm11 = vmor %vm702_vm10, %vm703_vm9  ;;  %v723_v5 = vand.u32 2147483648, %v696_v39  ;;  %vm717_vm14 = vweird.f32 %v696_v39  ;;  %v721_v8 = vand.u32 2147483647, %v696_v39 }
 0x20c   : > { %v699_v40 = vsub.f32 1.0, %v698_v43 }
 0x20d   : > { %v724_v14 = vor.u32 1.1754944e-38, %v723_v5  ;;  %vm722_vm0 = vcmp.eq.f32.partialorder %v721_v8, 8.507059e+37 }
 0x20e   : > { %v700_v49 = vmul.f32 %v1251_v41, %v699_v40 }
 0x210   : > { %v701_v51 = vadd.f32 %v1251_v41, %v700_v49 }
 0x211   : > { %v1253_v42 = vpop.eup %1252 }
 0x212   : > { %v713_v46 = vmul.f32 %v1253_v42, %v696_v39  ;;  %v705_v60 = vsel %vm704_vm11, %v1251_v41, %v701_v51  ;;  %vm718_vm13 = vweird.f32 %v1253_v42 }
 0x213   : > { %v710_v3 = vsel %vm707_vm12, %v709_v62, %v705_v60  ;;  %vm719_vm15 = vmor %vm717_vm14, %vm718_vm13 }
 0x214   : > { %v714_v45 = vsub.f32 1.0, %v713_v46  ;;  %v890_v6 = vsub.f32 1.0, %v710_v3 }
 0x216   : > { %v715_v61 = vmul.f32 %v1253_v42, %v714_v45  ;;  %v892_v16 = vmul.f32 %v890_v6, %v1355_v0 }
 0x218   : > { %v716_v4 = vadd.f32 %v1253_v42, %v715_v61 }
 0x21a   : > { %v720_v12 = vsel %vm719_vm15, %v1253_v42, %v716_v4 }
 0x21b   : > { %v725_v19 = vsel %vm722_vm0, %v724_v14, %v720_v12 }
 0x21c   : > { %v891_v22 = vsub.f32 1.0, %v725_v19 }
 0x21e   : > { %v893_v24 = vmul.f32 %v891_v22, %v1357_v1 }
 0x275   : > { %v881_v52 = vpop.f32.mrf.mxu1 }
 0x27d   : > { %v883_v9 = vpop.f32.mrf.mxu1 }
 0x288   : > { %v867_v54 = vpop.f32.mrf.mxu3 }
 0x289   : > { %v882_v57 = vadd.f32 %v881_v52, %v867_v54 }
 0x28b   : > { %v886_v63 = vadd.f32 %v882_v57, %v536_v56 }
 0x28d   : > { %1254 = vtanh.f32 %v886_v63 }
 0x290   : > { %v869_v7 = vpop.f32.mrf.mxu3 }
 0x291   : > { %v884_v11 = vadd.f32 %v883_v9, %v869_v7 }
 0x293   : > { %v1255_v13 = vpop.eup %1254  ;;  %v887_v15 = vadd.f32 %v884_v11, %v538_v10 }
 0x294   : > { %v894_v17 = vmul.f32 %v1255_v13, %v710_v3 }
 0x295   : > { %1256 = vtanh.f32 %v887_v15 }
 0x296   : > { %v896_v20 = vadd.f32 %v894_v17, %v892_v16 }
 0x298   : > { %v902_v21 = vmul.f32 %v1237_v18, %v896_v20 }
 0x29a   : > { %909 = vst [vmem:[%s324_s21] sm:$0xff] %v902_v21 }
 0x29b   : > { %v1257_v23 = vpop.eup %1256 }
 0x29c   : > { %v895_v0 = vmul.f32 %v1257_v23, %v725_v19 }
 0x29e   : > { %v897_v25 = vadd.f32 %v895_v0, %v893_v24 }
 0x2a0   : > { %v903_v26 = vmul.f32 %v1237_v18, %v897_v25 }
 0x2a2   : > { %910 = vst [vmem:[%s324_s21 + $0x8] sm:$0xff] %v903_v26 }
 0x2a3 PF: > { %s17_s26 = sadd.s32 1, %s1280_s26   ;;  %s1541_s24 = smov %s1276_s25 }
 0x2a4   : > { %p14_p5 = scmp.ge.s32.totalorder %s17_s26, 4   ;;  %s1542_s25 = smov %s1544_s27 }
 0x2a6   :  { %16 = sbr.rel (!%p14_p5) target bundleno = 2 (0x2), region = 89 }

</bundles_post_ra>
